<compile_context>
chip_gen: v5e
topology: v5e:2x2
jax: 0.10.0
libtpu: 0.0.40
codegen_flags: <defaults>
</compile_context>

<pallas_src>
import jax
import jax.numpy as jnp
from jax.experimental import pallas as pl
from jax.experimental.pallas import tpu as pltpu

# ---- small shapes consistent with the module ----
B, C_IN, H, W = 2, 4, 16, 16
C_OUT = 8
KH = KW = 7
PAD = 3
EPS = 1e-5            # nn.BatchNorm2d default eps
NEG_SLOPE = 0.01      # nn.LeakyReLU() default negative_slope

HP, WP = H + 2 * PAD, W + 2 * PAD          # 22, 22  padded spatial extent
NPIX = B * HP * WP                         # 968     flat padded pixels
NP = ((NPIX + 127) // 128) * 128           # 1024    lane-dense flat axis
N_VALID = B * H * W                        # 512     real output pixels
CI8 = 8                                    # channel rows padded to one sublane tile
K = KH * KW * CI8                          # 392     GEMM contraction size
N_TAPS = KH * KW                           # 49


# ---------------------------- the Pallas kernel ----------------------------
def firstblock_kernel(w_ref, x_ref, gb_ref, o_ref, p_ref):
    """Fused in-kernel im2col + conv-GEMM + BatchNorm(batch stats) + LeakyReLU.

    w_ref:  (C_OUT, K)   conv weights, cols k = (dy*7+dx)*8 + ci  (cols with ci>=C_IN are 0)
    x_ref:  (CI8, NP)    rows 0..C_IN-1: zero-padded input (flat padded-pixel lanes),
                         row C_IN: valid-lane mask (0/1), remaining rows: zeros
    gb_ref: (C_OUT, 2)   packed (gamma, beta)
    o_ref:  (C_OUT, NP)  output (lane-dense; wrapper extracts the 512 valid lanes)
    p_ref:  (K, NP)      VMEM scratch: im2col patch matrix
    """
    xv = x_ref[...]                                            # (CI8, NP)

    # Build im2col with 49 static lane-rolls: tap (dy,dx) needs x[p + dy*WP + dx],
    # a pure constant shift on the padded-stride flat axis (zero padding included,
    # so no per-tap masking is needed).  Extra rows (mask/zeros) get zero weights.
    for t in range(N_TAPS):
        dy, dx = t // KW, t % KW
        s = dy * WP + dx
        rolled = xv if s == 0 else pltpu.roll(xv, shift=NP - s, axis=1)
        p_ref[t * CI8:(t + 1) * CI8, :] = rolled               # aligned full-tile store

    # Conv2d as a single MXU GEMM, f32 accumulation.  (Conv bias intentionally
    # omitted: it is exactly cancelled by the BN mean subtraction below.)
    y = jnp.dot(w_ref[...], p_ref[...],
                preferred_element_type=jnp.float32)            # (C_OUT, NP)

    # BatchNorm2d, training-mode batch statistics over the 512 valid lanes,
    # one pass: two independent cross-lane reductions (XLU), then a fused
    # per-channel FMA epilogue.
    m = x_ref[C_IN:C_IN + 1, :]                                # (1, NP) valid mask
    ym = y * m
    s1 = jnp.sum(ym, axis=1, keepdims=True)                    # (C_OUT, 1)
    s2 = jnp.sum(ym * ym, axis=1, keepdims=True)
    mu = s1 * (1.0 / N_VALID)
    var = s2 * (1.0 / N_VALID) - mu * mu                       # biased variance
    inv = jax.lax.rsqrt(var + EPS)                             # EUP rsqrt
    gb = gb_ref[...]
    scale = gb[:, 0:1] * inv
    shift = gb[:, 1:2] - mu * scale
    z = y * scale + shift

    # LeakyReLU (negative_slope = 0.01)
    o_ref[...] = jnp.where(z >= 0.0, z, NEG_SLOPE * z).astype(o_ref.dtype)


# ---------------------------- wrapper ----------------------------
def firstblock2d(x, w, gamma, beta):
    """x: (B, C_IN, H, W) NCHW float32; w: (C_OUT, C_IN, 7, 7) PyTorch OIHW layout."""
    # --- tiny wrapper-side layout plumbing (all O(10 KB), no 49x inflation) ---
    xpad = jnp.pad(x, ((0, 0), (0, 0), (PAD, PAD), (PAD, PAD)))            # (B,Ci,22,22)
    xf = jnp.transpose(xpad, (1, 0, 2, 3)).reshape(C_IN, NPIX)             # (Ci, 968)
    xf = jnp.pad(xf, ((0, 0), (0, NP - NPIX)))                             # (Ci, 1024)

    # valid-lane mask: p = b*HP*WP + y*WP + x is a real output pixel iff y<H, x<W, b<B
    p_idx = jnp.arange(NP)
    r = p_idx % (HP * WP)
    valid = (p_idx < NPIX) & ((r // WP) < H) & ((r % WP) < W)
    mask = valid.astype(jnp.float32)[None, :]                              # (1, 1024)

    # pack channels + mask + zero rows into one (8, 1024) input slab (one DMA)
    xfm = jnp.concatenate(
        [xf, mask, jnp.zeros((CI8 - C_IN - 1, NP), jnp.float32)], axis=0)  # (8, 1024)

    # weights -> (C_OUT, 392), cols k = (dy*7+dx)*8 + ci, zero for ci >= C_IN
    wt = jnp.transpose(w, (0, 2, 3, 1))                                    # (Co,7,7,Ci)
    wt = jnp.pad(wt, ((0, 0), (0, 0), (0, 0), (0, CI8 - C_IN)))            # (Co,7,7,8)
    wmat = wt.reshape(C_OUT, K)

    gb = jnp.stack([gamma, beta], axis=1)                                  # (Co, 2)

    vmem = pl.BlockSpec(memory_space=pltpu.MemorySpace.VMEM)
    out_flat = pl.pallas_call(
        firstblock_kernel,
        out_shape=jax.ShapeDtypeStruct((C_OUT, NP), jnp.float32),
        in_specs=[vmem, vmem, vmem],
        out_specs=vmem,
        scratch_shapes=[pltpu.VMEM((K, NP), jnp.float32)],
        cost_estimate=pl.CostEstimate(
            flops=2 * C_OUT * K * NP,
            transcendentals=C_OUT,
            bytes_accessed=4 * (C_OUT * K + CI8 * NP + 2 * C_OUT + C_OUT * NP)),
    )(wmat, xfm, gb)

    # (C_OUT, 1024) -> (B, C_OUT, H, W): keep only the valid padded-pixel lanes
    out = out_flat[:, :NPIX].reshape(C_OUT, B, HP, WP)[:, :, :H, :W]
    return jnp.transpose(out, (1, 0, 2, 3))


# ------------------- pure-JAX reference (full PyTorch semantics, incl. bias) -------------------
def reference(x, w, b, gamma, beta):
    hi = jax.lax.Precision.HIGHEST
    y = jax.lax.conv_general_dilated(
        x, w, window_strides=(1, 1), padding=((PAD, PAD), (PAD, PAD)),
        dimension_numbers=('NCHW', 'OIHW', 'NCHW'), precision=hi)
    y = y + b[None, :, None, None]
    mu = jnp.mean(y, axis=(0, 2, 3), keepdims=True)
    var = jnp.mean((y - mu) ** 2, axis=(0, 2, 3), keepdims=True)
    y = (y - mu) / jnp.sqrt(var + EPS)
    y = y * gamma[None, :, None, None] + beta[None, :, None, None]
    return jnp.where(y >= 0.0, y, NEG_SLOPE * y)


# ---------------------------- main ----------------------------
if __name__ == "__main__":
    key = jax.random.PRNGKey(0)
    kx, kw, kb, kg, kbeta = jax.random.split(key, 5)

    x = jax.random.normal(kx, (B, C_IN, H, W), dtype=jnp.float32)
    w = (0.08 * jax.random.normal(kw, (C_OUT, C_IN, KH, KW))).astype(jnp.float32)
    b = (0.02 * jax.random.normal(kb, (C_OUT,))).astype(jnp.float32)
    gamma = (1.0 + 0.05 * jax.random.normal(kg, (C_OUT,))).astype(jnp.float32)
    beta = (0.05 * jax.random.normal(kbeta, (C_OUT,))).astype(jnp.float32)

    # Note: the conv bias `b` is only fed to the reference — inside the kernel it is
    # provably a no-op (cancelled exactly by the training-mode BN mean subtraction).
    out = jax.block_until_ready(firstblock2d(x, w, gamma, beta))
    ref = jax.block_until_ready(reference(x, w, b, gamma, beta))

    assert out.shape == (B, C_OUT, H, W)
    assert bool(jnp.all(jnp.isfinite(out)))
    max_err = float(jnp.max(jnp.abs(out - ref)))
    assert max_err < 2e-2, f"kernel/reference mismatch: max abs err = {max_err}"
    print("KERNEL_OK")
</pallas_src>

<mosaic_0001>
module attributes {stable_mosaic.version = 11 : i64} {
  func.func @firstblock_kernel(%arg0: memref<8x392xf32, #tpu.memory_space<vmem>>, %arg1: memref<8x1024xf32, #tpu.memory_space<vmem>>, %arg2: memref<8x2xf32, #tpu.memory_space<vmem>>, %arg3: memref<8x1024xf32, #tpu.memory_space<vmem>>, %arg4: memref<392x1024xf32, #tpu.memory_space<vmem>>) attributes {dimension_semantics = [], scalar_prefetch = 0 : i64, scratch_operands = 1 : i64, tpu.core_type = #tpu.core_type<tc>} {
    %c0 = arith.constant 0 : index
    %c0_0 = arith.constant 0 : index
    %0 = vector.load %arg1[%c0, %c0_0] : memref<8x1024xf32, #tpu.memory_space<vmem>>, vector<8x1024xf32>
    %c0_1 = arith.constant 0 : index
    %c0_2 = arith.constant 0 : index
    %1 = vector.load %arg4[%c0_1, %c0_2] : memref<392x1024xf32, #tpu.memory_space<vmem>>, vector<8x1024xf32>
    tpu.vector_store %arg4[%c0_1, %c0_2], %0 {strides = array<i32>} : memref<392x1024xf32, #tpu.memory_space<vmem>>, vector<8x1024xf32>,
    %c1023_i32 = arith.constant 1023 : i32
    %2 = tpu.dynamic_rotate %0 by %c1023_i32 dim 1 : vector<8x1024xf32>, i32 -> vector<8x1024xf32>
    %c8 = arith.constant 8 : index
    %c0_3 = arith.constant 0 : index
    %3 = vector.load %arg4[%c8, %c0_3] : memref<392x1024xf32, #tpu.memory_space<vmem>>, vector<8x1024xf32>
    tpu.vector_store %arg4[%c8, %c0_3], %2 {strides = array<i32>} : memref<392x1024xf32, #tpu.memory_space<vmem>>, vector<8x1024xf32>,
    %c1022_i32 = arith.constant 1022 : i32
    %4 = tpu.dynamic_rotate %0 by %c1022_i32 dim 1 : vector<8x1024xf32>, i32 -> vector<8x1024xf32>
    %c16 = arith.constant 16 : index
    %c0_4 = arith.constant 0 : index
    %5 = vector.load %arg4[%c16, %c0_4] : memref<392x1024xf32, #tpu.memory_space<vmem>>, vector<8x1024xf32>
    tpu.vector_store %arg4[%c16, %c0_4], %4 {strides = array<i32>} : memref<392x1024xf32, #tpu.memory_space<vmem>>, vector<8x1024xf32>,
    %c1021_i32 = arith.constant 1021 : i32
    %6 = tpu.dynamic_rotate %0 by %c1021_i32 dim 1 : vector<8x1024xf32>, i32 -> vector<8x1024xf32>
    %c24 = arith.constant 24 : index
    %c0_5 = arith.constant 0 : index
    %7 = vector.load %arg4[%c24, %c0_5] : memref<392x1024xf32, #tpu.memory_space<vmem>>, vector<8x1024xf32>
    tpu.vector_store %arg4[%c24, %c0_5], %6 {strides = array<i32>} : memref<392x1024xf32, #tpu.memory_space<vmem>>, vector<8x1024xf32>,
    %c1020_i32 = arith.constant 1020 : i32
    %8 = tpu.dynamic_rotate %0 by %c1020_i32 dim 1 : vector<8x1024xf32>, i32 -> vector<8x1024xf32>
    %c32 = arith.constant 32 : index
    %c0_6 = arith.constant 0 : index
    %9 = vector.load %arg4[%c32, %c0_6] : memref<392x1024xf32, #tpu.memory_space<vmem>>, vector<8x1024xf32>
    tpu.vector_store %arg4[%c32, %c0_6], %8 {strides = array<i32>} : memref<392x1024xf32, #tpu.memory_space<vmem>>, vector<8x1024xf32>,
    %c1019_i32 = arith.constant 1019 : i32
    %10 = tpu.dynamic_rotate %0 by %c1019_i32 dim 1 : vector<8x1024xf32>, i32 -> vector<8x1024xf32>
    %c40 = arith.constant 40 : index
    %c0_7 = arith.constant 0 : index
    %11 = vector.load %arg4[%c40, %c0_7] : memref<392x1024xf32, #tpu.memory_space<vmem>>, vector<8x1024xf32>
    tpu.vector_store %arg4[%c40, %c0_7], %10 {strides = array<i32>} : memref<392x1024xf32, #tpu.memory_space<vmem>>, vector<8x1024xf32>,
    %c1018_i32 = arith.constant 1018 : i32
    %12 = tpu.dynamic_rotate %0 by %c1018_i32 dim 1 : vector<8x1024xf32>, i32 -> vector<8x1024xf32>
    %c48 = arith.constant 48 : index
    %c0_8 = arith.constant 0 : index
    %13 = vector.load %arg4[%c48, %c0_8] : memref<392x1024xf32, #tpu.memory_space<vmem>>, vector<8x1024xf32>
    tpu.vector_store %arg4[%c48, %c0_8], %12 {strides = array<i32>} : memref<392x1024xf32, #tpu.memory_space<vmem>>, vector<8x1024xf32>,
    %c1002_i32 = arith.constant 1002 : i32
    %14 = tpu.dynamic_rotate %0 by %c1002_i32 dim 1 : vector<8x1024xf32>, i32 -> vector<8x1024xf32>
    %c56 = arith.constant 56 : index
    %c0_9 = arith.constant 0 : index
    %15 = vector.load %arg4[%c56, %c0_9] : memref<392x1024xf32, #tpu.memory_space<vmem>>, vector<8x1024xf32>
    tpu.vector_store %arg4[%c56, %c0_9], %14 {strides = array<i32>} : memref<392x1024xf32, #tpu.memory_space<vmem>>, vector<8x1024xf32>,
    %c1001_i32 = arith.constant 1001 : i32
    %16 = tpu.dynamic_rotate %0 by %c1001_i32 dim 1 : vector<8x1024xf32>, i32 -> vector<8x1024xf32>
    %c64 = arith.constant 64 : index
    %c0_10 = arith.constant 0 : index
    %17 = vector.load %arg4[%c64, %c0_10] : memref<392x1024xf32, #tpu.memory_space<vmem>>, vector<8x1024xf32>
    tpu.vector_store %arg4[%c64, %c0_10], %16 {strides = array<i32>} : memref<392x1024xf32, #tpu.memory_space<vmem>>, vector<8x1024xf32>,
    %c1000_i32 = arith.constant 1000 : i32
    %18 = tpu.dynamic_rotate %0 by %c1000_i32 dim 1 : vector<8x1024xf32>, i32 -> vector<8x1024xf32>
    %c72 = arith.constant 72 : index
    %c0_11 = arith.constant 0 : index
    %19 = vector.load %arg4[%c72, %c0_11] : memref<392x1024xf32, #tpu.memory_space<vmem>>, vector<8x1024xf32>
    tpu.vector_store %arg4[%c72, %c0_11], %18 {strides = array<i32>} : memref<392x1024xf32, #tpu.memory_space<vmem>>, vector<8x1024xf32>,
    %c999_i32 = arith.constant 999 : i32
    %20 = tpu.dynamic_rotate %0 by %c999_i32 dim 1 : vector<8x1024xf32>, i32 -> vector<8x1024xf32>
    %c80 = arith.constant 80 : index
    %c0_12 = arith.constant 0 : index
    %21 = vector.load %arg4[%c80, %c0_12] : memref<392x1024xf32, #tpu.memory_space<vmem>>, vector<8x1024xf32>
    tpu.vector_store %arg4[%c80, %c0_12], %20 {strides = array<i32>} : memref<392x1024xf32, #tpu.memory_space<vmem>>, vector<8x1024xf32>,
    %c998_i32 = arith.constant 998 : i32
    %22 = tpu.dynamic_rotate %0 by %c998_i32 dim 1 : vector<8x1024xf32>, i32 -> vector<8x1024xf32>
    %c88 = arith.constant 88 : index
    %c0_13 = arith.constant 0 : index
    %23 = vector.load %arg4[%c88, %c0_13] : memref<392x1024xf32, #tpu.memory_space<vmem>>, vector<8x1024xf32>
    tpu.vector_store %arg4[%c88, %c0_13], %22 {strides = array<i32>} : memref<392x1024xf32, #tpu.memory_space<vmem>>, vector<8x1024xf32>,
    %c997_i32 = arith.constant 997 : i32
    %24 = tpu.dynamic_rotate %0 by %c997_i32 dim 1 : vector<8x1024xf32>, i32 -> vector<8x1024xf32>
    %c96 = arith.constant 96 : index
    %c0_14 = arith.constant 0 : index
    %25 = vector.load %arg4[%c96, %c0_14] : memref<392x1024xf32, #tpu.memory_space<vmem>>, vector<8x1024xf32>
    tpu.vector_store %arg4[%c96, %c0_14], %24 {strides = array<i32>} : memref<392x1024xf32, #tpu.memory_space<vmem>>, vector<8x1024xf32>,
    %c996_i32 = arith.constant 996 : i32
    %26 = tpu.dynamic_rotate %0 by %c996_i32 dim 1 : vector<8x1024xf32>, i32 -> vector<8x1024xf32>
    %c104 = arith.constant 104 : index
    %c0_15 = arith.constant 0 : index
    %27 = vector.load %arg4[%c104, %c0_15] : memref<392x1024xf32, #tpu.memory_space<vmem>>, vector<8x1024xf32>
    tpu.vector_store %arg4[%c104, %c0_15], %26 {strides = array<i32>} : memref<392x1024xf32, #tpu.memory_space<vmem>>, vector<8x1024xf32>,
    %c980_i32 = arith.constant 980 : i32
    %28 = tpu.dynamic_rotate %0 by %c980_i32 dim 1 : vector<8x1024xf32>, i32 -> vector<8x1024xf32>
    %c112 = arith.constant 112 : index
    %c0_16 = arith.constant 0 : index
    %29 = vector.load %arg4[%c112, %c0_16] : memref<392x1024xf32, #tpu.memory_space<vmem>>, vector<8x1024xf32>
    tpu.vector_store %arg4[%c112, %c0_16], %28 {strides = array<i32>} : memref<392x1024xf32, #tpu.memory_space<vmem>>, vector<8x1024xf32>,
    %c979_i32 = arith.constant 979 : i32
    %30 = tpu.dynamic_rotate %0 by %c979_i32 dim 1 : vector<8x1024xf32>, i32 -> vector<8x1024xf32>
    %c120 = arith.constant 120 : index
    %c0_17 = arith.constant 0 : index
    %31 = vector.load %arg4[%c120, %c0_17] : memref<392x1024xf32, #tpu.memory_space<vmem>>, vector<8x1024xf32>
    tpu.vector_store %arg4[%c120, %c0_17], %30 {strides = array<i32>} : memref<392x1024xf32, #tpu.memory_space<vmem>>, vector<8x1024xf32>,
    %c978_i32 = arith.constant 978 : i32
    %32 = tpu.dynamic_rotate %0 by %c978_i32 dim 1 : vector<8x1024xf32>, i32 -> vector<8x1024xf32>
    %c128 = arith.constant 128 : index
    %c0_18 = arith.constant 0 : index
    %33 = vector.load %arg4[%c128, %c0_18] : memref<392x1024xf32, #tpu.memory_space<vmem>>, vector<8x1024xf32>
    tpu.vector_store %arg4[%c128, %c0_18], %32 {strides = array<i32>} : memref<392x1024xf32, #tpu.memory_space<vmem>>, vector<8x1024xf32>,
    %c977_i32 = arith.constant 977 : i32
    %34 = tpu.dynamic_rotate %0 by %c977_i32 dim 1 : vector<8x1024xf32>, i32 -> vector<8x1024xf32>
    %c136 = arith.constant 136 : index
    %c0_19 = arith.constant 0 : index
    %35 = vector.load %arg4[%c136, %c0_19] : memref<392x1024xf32, #tpu.memory_space<vmem>>, vector<8x1024xf32>
    tpu.vector_store %arg4[%c136, %c0_19], %34 {strides = array<i32>} : memref<392x1024xf32, #tpu.memory_space<vmem>>, vector<8x1024xf32>,
    %c976_i32 = arith.constant 976 : i32
    %36 = tpu.dynamic_rotate %0 by %c976_i32 dim 1 : vector<8x1024xf32>, i32 -> vector<8x1024xf32>
    %c144 = arith.constant 144 : index
    %c0_20 = arith.constant 0 : index
    %37 = vector.load %arg4[%c144, %c0_20] : memref<392x1024xf32, #tpu.memory_space<vmem>>, vector<8x1024xf32>
    tpu.vector_store %arg4[%c144, %c0_20], %36 {strides = array<i32>} : memref<392x1024xf32, #tpu.memory_space<vmem>>, vector<8x1024xf32>,
    %c975_i32 = arith.constant 975 : i32
    %38 = tpu.dynamic_rotate %0 by %c975_i32 dim 1 : vector<8x1024xf32>, i32 -> vector<8x1024xf32>
    %c152 = arith.constant 152 : index
    %c0_21 = arith.constant 0 : index
    %39 = vector.load %arg4[%c152, %c0_21] : memref<392x1024xf32, #tpu.memory_space<vmem>>, vector<8x1024xf32>
    tpu.vector_store %arg4[%c152, %c0_21], %38 {strides = array<i32>} : memref<392x1024xf32, #tpu.memory_space<vmem>>, vector<8x1024xf32>,
    %c974_i32 = arith.constant 974 : i32
    %40 = tpu.dynamic_rotate %0 by %c974_i32 dim 1 : vector<8x1024xf32>, i32 -> vector<8x1024xf32>
    %c160 = arith.constant 160 : index
    %c0_22 = arith.constant 0 : index
    %41 = vector.load %arg4[%c160, %c0_22] : memref<392x1024xf32, #tpu.memory_space<vmem>>, vector<8x1024xf32>
    tpu.vector_store %arg4[%c160, %c0_22], %40 {strides = array<i32>} : memref<392x1024xf32, #tpu.memory_space<vmem>>, vector<8x1024xf32>,
    %c958_i32 = arith.constant 958 : i32
    %42 = tpu.dynamic_rotate %0 by %c958_i32 dim 1 : vector<8x1024xf32>, i32 -> vector<8x1024xf32>
    %c168 = arith.constant 168 : index
    %c0_23 = arith.constant 0 : index
    %43 = vector.load %arg4[%c168, %c0_23] : memref<392x1024xf32, #tpu.memory_space<vmem>>, vector<8x1024xf32>
    tpu.vector_store %arg4[%c168, %c0_23], %42 {strides = array<i32>} : memref<392x1024xf32, #tpu.memory_space<vmem>>, vector<8x1024xf32>,
    %c957_i32 = arith.constant 957 : i32
    %44 = tpu.dynamic_rotate %0 by %c957_i32 dim 1 : vector<8x1024xf32>, i32 -> vector<8x1024xf32>
    %c176 = arith.constant 176 : index
    %c0_24 = arith.constant 0 : index
    %45 = vector.load %arg4[%c176, %c0_24] : memref<392x1024xf32, #tpu.memory_space<vmem>>, vector<8x1024xf32>
    tpu.vector_store %arg4[%c176, %c0_24], %44 {strides = array<i32>} : memref<392x1024xf32, #tpu.memory_space<vmem>>, vector<8x1024xf32>,
    %c956_i32 = arith.constant 956 : i32
    %46 = tpu.dynamic_rotate %0 by %c956_i32 dim 1 : vector<8x1024xf32>, i32 -> vector<8x1024xf32>
    %c184 = arith.constant 184 : index
    %c0_25 = arith.constant 0 : index
    %47 = vector.load %arg4[%c184, %c0_25] : memref<392x1024xf32, #tpu.memory_space<vmem>>, vector<8x1024xf32>
    tpu.vector_store %arg4[%c184, %c0_25], %46 {strides = array<i32>} : memref<392x1024xf32, #tpu.memory_space<vmem>>, vector<8x1024xf32>,
    %c955_i32 = arith.constant 955 : i32
    %48 = tpu.dynamic_rotate %0 by %c955_i32 dim 1 : vector<8x1024xf32>, i32 -> vector<8x1024xf32>
    %c192 = arith.constant 192 : index
    %c0_26 = arith.constant 0 : index
    %49 = vector.load %arg4[%c192, %c0_26] : memref<392x1024xf32, #tpu.memory_space<vmem>>, vector<8x1024xf32>
    tpu.vector_store %arg4[%c192, %c0_26], %48 {strides = array<i32>} : memref<392x1024xf32, #tpu.memory_space<vmem>>, vector<8x1024xf32>,
    %c954_i32 = arith.constant 954 : i32
    %50 = tpu.dynamic_rotate %0 by %c954_i32 dim 1 : vector<8x1024xf32>, i32 -> vector<8x1024xf32>
    %c200 = arith.constant 200 : index
    %c0_27 = arith.constant 0 : index
    %51 = vector.load %arg4[%c200, %c0_27] : memref<392x1024xf32, #tpu.memory_space<vmem>>, vector<8x1024xf32>
    tpu.vector_store %arg4[%c200, %c0_27], %50 {strides = array<i32>} : memref<392x1024xf32, #tpu.memory_space<vmem>>, vector<8x1024xf32>,
    %c953_i32 = arith.constant 953 : i32
    %52 = tpu.dynamic_rotate %0 by %c953_i32 dim 1 : vector<8x1024xf32>, i32 -> vector<8x1024xf32>
    %c208 = arith.constant 208 : index
    %c0_28 = arith.constant 0 : index
    %53 = vector.load %arg4[%c208, %c0_28] : memref<392x1024xf32, #tpu.memory_space<vmem>>, vector<8x1024xf32>
    tpu.vector_store %arg4[%c208, %c0_28], %52 {strides = array<i32>} : memref<392x1024xf32, #tpu.memory_space<vmem>>, vector<8x1024xf32>,
    %c952_i32 = arith.constant 952 : i32
    %54 = tpu.dynamic_rotate %0 by %c952_i32 dim 1 : vector<8x1024xf32>, i32 -> vector<8x1024xf32>
    %c216 = arith.constant 216 : index
    %c0_29 = arith.constant 0 : index
    %55 = vector.load %arg4[%c216, %c0_29] : memref<392x1024xf32, #tpu.memory_space<vmem>>, vector<8x1024xf32>
    tpu.vector_store %arg4[%c216, %c0_29], %54 {strides = array<i32>} : memref<392x1024xf32, #tpu.memory_space<vmem>>, vector<8x1024xf32>,
    %c936_i32 = arith.constant 936 : i32
    %56 = tpu.dynamic_rotate %0 by %c936_i32 dim 1 : vector<8x1024xf32>, i32 -> vector<8x1024xf32>
    %c224 = arith.constant 224 : index
    %c0_30 = arith.constant 0 : index
    %57 = vector.load %arg4[%c224, %c0_30] : memref<392x1024xf32, #tpu.memory_space<vmem>>, vector<8x1024xf32>
    tpu.vector_store %arg4[%c224, %c0_30], %56 {strides = array<i32>} : memref<392x1024xf32, #tpu.memory_space<vmem>>, vector<8x1024xf32>,
    %c935_i32 = arith.constant 935 : i32
    %58 = tpu.dynamic_rotate %0 by %c935_i32 dim 1 : vector<8x1024xf32>, i32 -> vector<8x1024xf32>
    %c232 = arith.constant 232 : index
    %c0_31 = arith.constant 0 : index
    %59 = vector.load %arg4[%c232, %c0_31] : memref<392x1024xf32, #tpu.memory_space<vmem>>, vector<8x1024xf32>
    tpu.vector_store %arg4[%c232, %c0_31], %58 {strides = array<i32>} : memref<392x1024xf32, #tpu.memory_space<vmem>>, vector<8x1024xf32>,
    %c934_i32 = arith.constant 934 : i32
    %60 = tpu.dynamic_rotate %0 by %c934_i32 dim 1 : vector<8x1024xf32>, i32 -> vector<8x1024xf32>
    %c240 = arith.constant 240 : index
    %c0_32 = arith.constant 0 : index
    %61 = vector.load %arg4[%c240, %c0_32] : memref<392x1024xf32, #tpu.memory_space<vmem>>, vector<8x1024xf32>
    tpu.vector_store %arg4[%c240, %c0_32], %60 {strides = array<i32>} : memref<392x1024xf32, #tpu.memory_space<vmem>>, vector<8x1024xf32>,
    %c933_i32 = arith.constant 933 : i32
    %62 = tpu.dynamic_rotate %0 by %c933_i32 dim 1 : vector<8x1024xf32>, i32 -> vector<8x1024xf32>
    %c248 = arith.constant 248 : index
    %c0_33 = arith.constant 0 : index
    %63 = vector.load %arg4[%c248, %c0_33] : memref<392x1024xf32, #tpu.memory_space<vmem>>, vector<8x1024xf32>
    tpu.vector_store %arg4[%c248, %c0_33], %62 {strides = array<i32>} : memref<392x1024xf32, #tpu.memory_space<vmem>>, vector<8x1024xf32>,
    %c932_i32 = arith.constant 932 : i32
    %64 = tpu.dynamic_rotate %0 by %c932_i32 dim 1 : vector<8x1024xf32>, i32 -> vector<8x1024xf32>
    %c256 = arith.constant 256 : index
    %c0_34 = arith.constant 0 : index
    %65 = vector.load %arg4[%c256, %c0_34] : memref<392x1024xf32, #tpu.memory_space<vmem>>, vector<8x1024xf32>
    tpu.vector_store %arg4[%c256, %c0_34], %64 {strides = array<i32>} : memref<392x1024xf32, #tpu.memory_space<vmem>>, vector<8x1024xf32>,
    %c931_i32 = arith.constant 931 : i32
    %66 = tpu.dynamic_rotate %0 by %c931_i32 dim 1 : vector<8x1024xf32>, i32 -> vector<8x1024xf32>
    %c264 = arith.constant 264 : index
    %c0_35 = arith.constant 0 : index
    %67 = vector.load %arg4[%c264, %c0_35] : memref<392x1024xf32, #tpu.memory_space<vmem>>, vector<8x1024xf32>
    tpu.vector_store %arg4[%c264, %c0_35], %66 {strides = array<i32>} : memref<392x1024xf32, #tpu.memory_space<vmem>>, vector<8x1024xf32>,
    %c930_i32 = arith.constant 930 : i32
    %68 = tpu.dynamic_rotate %0 by %c930_i32 dim 1 : vector<8x1024xf32>, i32 -> vector<8x1024xf32>
    %c272 = arith.constant 272 : index
    %c0_36 = arith.constant 0 : index
    %69 = vector.load %arg4[%c272, %c0_36] : memref<392x1024xf32, #tpu.memory_space<vmem>>, vector<8x1024xf32>
    tpu.vector_store %arg4[%c272, %c0_36], %68 {strides = array<i32>} : memref<392x1024xf32, #tpu.memory_space<vmem>>, vector<8x1024xf32>,
    %c914_i32 = arith.constant 914 : i32
    %70 = tpu.dynamic_rotate %0 by %c914_i32 dim 1 : vector<8x1024xf32>, i32 -> vector<8x1024xf32>
    %c280 = arith.constant 280 : index
    %c0_37 = arith.constant 0 : index
    %71 = vector.load %arg4[%c280, %c0_37] : memref<392x1024xf32, #tpu.memory_space<vmem>>, vector<8x1024xf32>
    tpu.vector_store %arg4[%c280, %c0_37], %70 {strides = array<i32>} : memref<392x1024xf32, #tpu.memory_space<vmem>>, vector<8x1024xf32>,
    %c913_i32 = arith.constant 913 : i32
    %72 = tpu.dynamic_rotate %0 by %c913_i32 dim 1 : vector<8x1024xf32>, i32 -> vector<8x1024xf32>
    %c288 = arith.constant 288 : index
    %c0_38 = arith.constant 0 : index
    %73 = vector.load %arg4[%c288, %c0_38] : memref<392x1024xf32, #tpu.memory_space<vmem>>, vector<8x1024xf32>
    tpu.vector_store %arg4[%c288, %c0_38], %72 {strides = array<i32>} : memref<392x1024xf32, #tpu.memory_space<vmem>>, vector<8x1024xf32>,
    %c912_i32 = arith.constant 912 : i32
    %74 = tpu.dynamic_rotate %0 by %c912_i32 dim 1 : vector<8x1024xf32>, i32 -> vector<8x1024xf32>
    %c296 = arith.constant 296 : index
    %c0_39 = arith.constant 0 : index
    %75 = vector.load %arg4[%c296, %c0_39] : memref<392x1024xf32, #tpu.memory_space<vmem>>, vector<8x1024xf32>
    tpu.vector_store %arg4[%c296, %c0_39], %74 {strides = array<i32>} : memref<392x1024xf32, #tpu.memory_space<vmem>>, vector<8x1024xf32>,
    %c911_i32 = arith.constant 911 : i32
    %76 = tpu.dynamic_rotate %0 by %c911_i32 dim 1 : vector<8x1024xf32>, i32 -> vector<8x1024xf32>
    %c304 = arith.constant 304 : index
    %c0_40 = arith.constant 0 : index
    %77 = vector.load %arg4[%c304, %c0_40] : memref<392x1024xf32, #tpu.memory_space<vmem>>, vector<8x1024xf32>
    tpu.vector_store %arg4[%c304, %c0_40], %76 {strides = array<i32>} : memref<392x1024xf32, #tpu.memory_space<vmem>>, vector<8x1024xf32>,
    %c910_i32 = arith.constant 910 : i32
    %78 = tpu.dynamic_rotate %0 by %c910_i32 dim 1 : vector<8x1024xf32>, i32 -> vector<8x1024xf32>
    %c312 = arith.constant 312 : index
    %c0_41 = arith.constant 0 : index
    %79 = vector.load %arg4[%c312, %c0_41] : memref<392x1024xf32, #tpu.memory_space<vmem>>, vector<8x1024xf32>
    tpu.vector_store %arg4[%c312, %c0_41], %78 {strides = array<i32>} : memref<392x1024xf32, #tpu.memory_space<vmem>>, vector<8x1024xf32>,
    %c909_i32 = arith.constant 909 : i32
    %80 = tpu.dynamic_rotate %0 by %c909_i32 dim 1 : vector<8x1024xf32>, i32 -> vector<8x1024xf32>
    %c320 = arith.constant 320 : index
    %c0_42 = arith.constant 0 : index
    %81 = vector.load %arg4[%c320, %c0_42] : memref<392x1024xf32, #tpu.memory_space<vmem>>, vector<8x1024xf32>
    tpu.vector_store %arg4[%c320, %c0_42], %80 {strides = array<i32>} : memref<392x1024xf32, #tpu.memory_space<vmem>>, vector<8x1024xf32>,
    %c908_i32 = arith.constant 908 : i32
    %82 = tpu.dynamic_rotate %0 by %c908_i32 dim 1 : vector<8x1024xf32>, i32 -> vector<8x1024xf32>
    %c328 = arith.constant 328 : index
    %c0_43 = arith.constant 0 : index
    %83 = vector.load %arg4[%c328, %c0_43] : memref<392x1024xf32, #tpu.memory_space<vmem>>, vector<8x1024xf32>
    tpu.vector_store %arg4[%c328, %c0_43], %82 {strides = array<i32>} : memref<392x1024xf32, #tpu.memory_space<vmem>>, vector<8x1024xf32>,
    %c892_i32 = arith.constant 892 : i32
    %84 = tpu.dynamic_rotate %0 by %c892_i32 dim 1 : vector<8x1024xf32>, i32 -> vector<8x1024xf32>
    %c336 = arith.constant 336 : index
    %c0_44 = arith.constant 0 : index
    %85 = vector.load %arg4[%c336, %c0_44] : memref<392x1024xf32, #tpu.memory_space<vmem>>, vector<8x1024xf32>
    tpu.vector_store %arg4[%c336, %c0_44], %84 {strides = array<i32>} : memref<392x1024xf32, #tpu.memory_space<vmem>>, vector<8x1024xf32>,
    %c891_i32 = arith.constant 891 : i32
    %86 = tpu.dynamic_rotate %0 by %c891_i32 dim 1 : vector<8x1024xf32>, i32 -> vector<8x1024xf32>
    %c344 = arith.constant 344 : index
    %c0_45 = arith.constant 0 : index
    %87 = vector.load %arg4[%c344, %c0_45] : memref<392x1024xf32, #tpu.memory_space<vmem>>, vector<8x1024xf32>
    tpu.vector_store %arg4[%c344, %c0_45], %86 {strides = array<i32>} : memref<392x1024xf32, #tpu.memory_space<vmem>>, vector<8x1024xf32>,
    %c890_i32 = arith.constant 890 : i32
    %88 = tpu.dynamic_rotate %0 by %c890_i32 dim 1 : vector<8x1024xf32>, i32 -> vector<8x1024xf32>
    %c352 = arith.constant 352 : index
    %c0_46 = arith.constant 0 : index
    %89 = vector.load %arg4[%c352, %c0_46] : memref<392x1024xf32, #tpu.memory_space<vmem>>, vector<8x1024xf32>
    tpu.vector_store %arg4[%c352, %c0_46], %88 {strides = array<i32>} : memref<392x1024xf32, #tpu.memory_space<vmem>>, vector<8x1024xf32>,
    %c889_i32 = arith.constant 889 : i32
    %90 = tpu.dynamic_rotate %0 by %c889_i32 dim 1 : vector<8x1024xf32>, i32 -> vector<8x1024xf32>
    %c360 = arith.constant 360 : index
    %c0_47 = arith.constant 0 : index
    %91 = vector.load %arg4[%c360, %c0_47] : memref<392x1024xf32, #tpu.memory_space<vmem>>, vector<8x1024xf32>
    tpu.vector_store %arg4[%c360, %c0_47], %90 {strides = array<i32>} : memref<392x1024xf32, #tpu.memory_space<vmem>>, vector<8x1024xf32>,
    %c888_i32 = arith.constant 888 : i32
    %92 = tpu.dynamic_rotate %0 by %c888_i32 dim 1 : vector<8x1024xf32>, i32 -> vector<8x1024xf32>
    %c368 = arith.constant 368 : index
    %c0_48 = arith.constant 0 : index
    %93 = vector.load %arg4[%c368, %c0_48] : memref<392x1024xf32, #tpu.memory_space<vmem>>, vector<8x1024xf32>
    tpu.vector_store %arg4[%c368, %c0_48], %92 {strides = array<i32>} : memref<392x1024xf32, #tpu.memory_space<vmem>>, vector<8x1024xf32>,
    %c887_i32 = arith.constant 887 : i32
    %94 = tpu.dynamic_rotate %0 by %c887_i32 dim 1 : vector<8x1024xf32>, i32 -> vector<8x1024xf32>
    %c376 = arith.constant 376 : index
    %c0_49 = arith.constant 0 : index
    %95 = vector.load %arg4[%c376, %c0_49] : memref<392x1024xf32, #tpu.memory_space<vmem>>, vector<8x1024xf32>
    tpu.vector_store %arg4[%c376, %c0_49], %94 {strides = array<i32>} : memref<392x1024xf32, #tpu.memory_space<vmem>>, vector<8x1024xf32>,
    %c886_i32 = arith.constant 886 : i32
    %96 = tpu.dynamic_rotate %0 by %c886_i32 dim 1 : vector<8x1024xf32>, i32 -> vector<8x1024xf32>
    %c384 = arith.constant 384 : index
    %c0_50 = arith.constant 0 : index
    %97 = vector.load %arg4[%c384, %c0_50] : memref<392x1024xf32, #tpu.memory_space<vmem>>, vector<8x1024xf32>
    tpu.vector_store %arg4[%c384, %c0_50], %96 {strides = array<i32>} : memref<392x1024xf32, #tpu.memory_space<vmem>>, vector<8x1024xf32>,
    %c0_51 = arith.constant 0 : index
    %c0_52 = arith.constant 0 : index
    %98 = vector.load %arg0[%c0_51, %c0_52] : memref<8x392xf32, #tpu.memory_space<vmem>>, vector<8x392xf32>
    %c0_53 = arith.constant 0 : index
    %c0_54 = arith.constant 0 : index
    %99 = vector.load %arg4[%c0_53, %c0_54] : memref<392x1024xf32, #tpu.memory_space<vmem>>, vector<392x1024xf32>
    %cst = arith.constant dense<0.000000e+00> : vector<8x1024xf32>
    %100 = tpu.matmul %98, %99, %cst {dimension_numbers = #tpu.dot_dimension_numbers<[1], [0], [0], [1], [0, 0, 1, 1], [], []>} : vector<8x392xf32>, vector<392x1024xf32>, vector<8x1024xf32> -> vector<8x1024xf32>
    %c4 = arith.constant 4 : index
    %c0_55 = arith.constant 0 : index
    %101 = vector.load %arg1[%c4, %c0_55] : memref<8x1024xf32, #tpu.memory_space<vmem>>, vector<1x1024xf32>
    %102 = vector.broadcast %101 : vector<1x1024xf32> to vector<8x1024xf32>
    %103 = arith.mulf %100, %102 : vector<8x1024xf32>
    %cst_56 = arith.constant dense<0.000000e+00> : vector<8xf32>
    %104 = vector.multi_reduction <add>, %103, %cst_56 [1] : vector<8x1024xf32> to vector<8xf32>
    %105 = vector.shape_cast %104 : vector<8xf32> to vector<8x1xf32>
    %106 = arith.mulf %103, %103 : vector<8x1024xf32>
    %cst_57 = arith.constant dense<0.000000e+00> : vector<8xf32>
    %107 = vector.multi_reduction <add>, %106, %cst_57 [1] : vector<8x1024xf32> to vector<8xf32>
    %108 = vector.shape_cast %107 : vector<8xf32> to vector<8x1xf32>
    %cst_58 = arith.constant 0.001953125 : f32
    %109 = vector.broadcast %cst_58 : f32 to vector<8x1xf32>
    %110 = arith.mulf %105, %109 : vector<8x1xf32>
    %cst_59 = arith.constant 0.001953125 : f32
    %111 = vector.broadcast %cst_59 : f32 to vector<8x1xf32>
    %112 = arith.mulf %108, %111 : vector<8x1xf32>
    %113 = arith.mulf %110, %110 : vector<8x1xf32>
    %114 = arith.subf %112, %113 : vector<8x1xf32>
    %cst_60 = arith.constant 9.99999974E-6 : f32
    %115 = vector.broadcast %cst_60 : f32 to vector<8x1xf32>
    %116 = arith.addf %114, %115 : vector<8x1xf32>
    %117 = math.rsqrt %116 : vector<8x1xf32>
    %c0_61 = arith.constant 0 : index
    %c0_62 = arith.constant 0 : index
    %118 = vector.load %arg2[%c0_61, %c0_62] : memref<8x2xf32, #tpu.memory_space<vmem>>, vector<8x2xf32>
    %119 = vector.extract_strided_slice %118 {offsets = [0, 0], sizes = [8, 1], strides = [1, 1]} : vector<8x2xf32> to vector<8x1xf32>
    %120 = arith.mulf %119, %117 : vector<8x1xf32>
    %121 = vector.extract_strided_slice %118 {offsets = [0, 1], sizes = [8, 1], strides = [1, 1]} : vector<8x2xf32> to vector<8x1xf32>
    %122 = arith.mulf %110, %120 : vector<8x1xf32>
    %123 = arith.subf %121, %122 : vector<8x1xf32>
    %124 = vector.broadcast %120 : vector<8x1xf32> to vector<8x1024xf32>
    %125 = arith.mulf %100, %124 : vector<8x1024xf32>
    %126 = vector.broadcast %123 : vector<8x1xf32> to vector<8x1024xf32>
    %127 = arith.addf %125, %126 : vector<8x1024xf32>
    %cst_63 = arith.constant 0.000000e+00 : f32
    %128 = vector.broadcast %cst_63 : f32 to vector<8x1024xf32>
    %129 = arith.cmpf oge, %127, %128 : vector<8x1024xf32>
    %cst_64 = arith.constant 0.00999999977 : f32
    %130 = vector.broadcast %cst_64 : f32 to vector<8x1024xf32>
    %131 = arith.mulf %130, %127 : vector<8x1024xf32>
    %132 = arith.select %129, %127, %131 : vector<8x1024xi1>, vector<8x1024xf32>
    %c0_65 = arith.constant 0 : index
    %c0_66 = arith.constant 0 : index
    %133 = vector.load %arg3[%c0_65, %c0_66] : memref<8x1024xf32, #tpu.memory_space<vmem>>, vector<8x1024xf32>
    tpu.vector_store %arg3[%c0_65, %c0_66], %132 {strides = array<i32>} : memref<8x1024xf32, #tpu.memory_space<vmem>>, vector<8x1024xf32>,
    return
  }
}

</mosaic_0001>

<bundles_post_ra>
// kernel: tpu_custom_call.1
= control target key start
LH: loop header
LB: loop body
LE: loop exit
PB: predicated region body
PF: predicated region fallthrough
CT: control target
= control target key end

     0   :  { %8 = vsyncpa [#allocation4], 0  ;;  %s7070_s0 = inlined_call_operand.hbm [shape: f32[8,392], index: 0, kind: input, shape index: {}]   ;;  %s7071_s1 = inlined_call_operand.hbm [shape: f32[8,1024], index: 1, kind: input, shape index: {}]   ;;  %s7072_s2 = inlined_call_operand.vmem [shape: f32[8,2], index: 2, kind: input, shape index: {}]   ;;  %s7073_s3 = inlined_call_operand.hbm [shape: f32[8,1024], index: 3, kind: output, shape index: {}]  }
   0x1   :  { %9 = vsyncpa [#allocation7], 0 }
   0x2   :  { %10 = vsyncpa [#allocation5], 0  ;;  %s16_s14 = sshll.u32 %s7070_s0, 4  ;;  %s3766_s15 = smov [#allocation3]   ;;  %s17_s14 = int_to_ptr.hbm [resolvable:$true] %s16_s14 }
   0x3   :  { %s18_s16 = sshll.u32 %s3766_s15, 4  ;;  %s27_s19 = sshll.u32 %s7071_s1, 4  ;;  %s19_s16 = int_to_ptr.vmem [resolvable:$true] %s18_s16  ;;  %s28_s19 = int_to_ptr.hbm [resolvable:$true] %s27_s19 }
   0x4   :  { %21 = dma.hbm_to_vmem [thread:$0]  %s17_s14, 512, %s19_s16, [#allocation4]  }
   0x5   :  { %s3767_s20 = smov [#allocation6]  }
   0x6   :  { %s29_s21 = sshll.u32 %s3767_s20, 4  ;;  %s30_s21 = int_to_ptr.vmem [resolvable:$true] %s29_s21 }
   0x7   :  { %32 = dma.hbm_to_vmem [thread:$0]  %s28_s19, 1024, %s30_s21, [#allocation7]  }
   0x8   :  { %3760 = dma.done.wait [#allocation4], 512  }
   0x9   :  { %3761 = vsyncadd [#allocation4], 4294966784 }
   0xa   :  { %3762 = dma.done.wait [#allocation7], 1024  }
   0xb   :  { %3763 = vsyncadd [#allocation7], 4294966272  ;;  %v47_v0 = vld [vmem:[#allocation6 + $0x20] sm:$0xff]  ;;  %v48_v1 = vld [vmem:[#allocation6 + $0x28] sm:$0xff]  ;;  %s3768_s0 = smov 127   ;;  %s3769_s1 = smov 126   ;;  %v75_v13 = vlaneseq }
   0xc   :  { %v3843_v2 = vld [vmem:[#allocation6] sm:$0xff]  ;;  %v3845_v3 = vpack.i.bf16 %v48_v1, %v47_v0  ;;  %v3847_v4 = vld [vmem:[#allocation6 + $0x8] sm:$0xff]  ;;  %v49_v6 = vld [vmem:[#allocation6 + $0x30] sm:$0xff]  ;;  %s3770_s22 = smov 125   ;;  %s3771_s23 = smov 124  }
   0xd   :  { %v3851_v5 = vpack.i.bf16 %v3847_v4, %v3843_v2  ;;  %v50_v7 = vld [vmem:[#allocation6 + $0x38] sm:$0xff]  ;;  %v3856_v8 = vld [vmem:[#allocation6 + $0x10] sm:$0xff]  ;;  %s3772_s24 = smov 123   ;;  %s3773_s25 = smov 122   ;;  %v3901_v14 = vand.u32 127, %v75_v13 }
   0xe   :  { %2834 = vrot.lane.b32.xlu1 %v3845_v3, %s3768_s0  ;;  %v46_v9 = vld [vmem:[#allocation6 + $0x18] sm:$0xff]  ;;  %v3858_v10 = vpack.i.bf16 %v50_v7, %v49_v6  ;;  %s3774_s26 = smov 106   ;;  %s3775_s27 = smov 105  }
   0xf   :  { %2844 = vrot.lane.b32.xlu2 %v3851_v5, %s3769_s1  ;;  %2824 = vrot.lane.b32.xlu0 %v3851_v5, %s3768_s0  ;;  %v3861_v11 = vpack.i.bf16 %v46_v9, %v3856_v8  ;;  %s3776_s28 = smov 104   ;;  %s3777_s29 = smov 103   ;;  %vm7188_vm0 = vcmp.lt.s32.totalorder %v3901_v14, 126  ;;  %vm7191_vm1 = vcmp.lt.s32.totalorder %v3901_v14, 125  ;;  %vm7180_vm2 = vcmp.lt.s32.totalorder %v3901_v14, 127 }
  0x10   :  { %s3778_s30 = smov 102   ;;  %s3779_s4 = smov 101   ;;  %vm7250_vm3 = vcmp.lt.s32.totalorder %v3901_v14, 122  ;;  %vm7241_vm4 = vcmp.lt.s32.totalorder %v3901_v14, 124  ;;  %vm7242_vm5 = vcmp.lt.s32.totalorder %v3901_v14, 123  ;;  %vm7206_vm6 = vcmp.lt.s32.totalorder %v3901_v14, 104 }
  0x11   :  { %s3780_s5 = smov 100   ;;  %s3781_s6 = smov 84   ;;  %vm7194_vm7 = vcmp.lt.s32.totalorder %v3901_v14, 106  ;;  %vm7202_vm8 = vcmp.lt.s32.totalorder %v3901_v14, 105  ;;  %vm7233_vm9 = vcmp.lt.s32.totalorder %v3901_v14, 101  ;;  %vm7217_vm10 = vcmp.lt.s32.totalorder %v3901_v14, 103 }
  0x12   :  { %s3782_s7 = smov 83   ;;  %s3783_s8 = smov 82   ;;  %vm7224_vm11 = vcmp.lt.s32.totalorder %v3901_v14, 102  ;;  %vm539_vm12 = vcmp.lt.s32.totalorder %v3901_v14, 83  ;;  %vm7174_vm13 = vcmp.lt.s32.totalorder %v3901_v14, 100  ;;  %vm7240_vm14 = vcmp.lt.s32.totalorder %v3901_v14, 84 }
  0x13   :  { %s3784_s9 = smov 81   ;;  %s3785_s10 = smov 80   ;;  %vm7263_vm15 = vcmp.lt.s32.totalorder %v3901_v14, 82 }
  0x14   :  { %s3786_s11 = smov 79   ;;  %s3787_s12 = smov 78  }
  0x15   :  { %s3788_s13 = smov 62   ;;  %s3789_s14 = smov 61  }
  0x16   :  { %2839 = vrot.lane.b32.xlu1 %v3858_v10, %s3768_s0  ;;  %s3790_s15 = smov 60   ;;  %s3791_s16 = smov 59  }
  0x17   :  { %2849 = vrot.lane.b32.xlu2 %v3861_v11, %s3769_s1  ;;  %2829 = vrot.lane.b32.xlu0 %v3861_v11, %s3768_s0  ;;  %s3792_s17 = smov 58   ;;  %s3793_s18 = smov 57  }
  0x18   :  { %s3794_s19 = smov 56   ;;  %s3795_s20 = smov 120  }
  0x19   :  { %s3796_s21 = smov 121   ;;  %s3797_s0 = smov 119  }
  0x1e   :  { %2859 = vrot.lane.b32.xlu1 %v3858_v10, %s3769_s1 }
  0x1f   :  { %2864 = vrot.lane.b32.xlu2 %v3851_v5, %s3770_s22  ;;  %2854 = vrot.lane.b32.xlu0 %v3845_v3, %s3769_s1  ;;  %s3798_s1 = smov 13  }
  0x26   :  { %2874 = vrot.lane.b32.xlu1 %v3845_v3, %s3770_s22 }
  0x27   :  { %2879 = vrot.lane.b32.xlu2 %v3858_v10, %s3770_s22  ;;  %2869 = vrot.lane.b32.xlu0 %v3861_v11, %s3770_s22  ;;  %s3799_s22 = smov 14  }
  0x2e   :  { %2889 = vrot.lane.b32.xlu1 %v3861_v11, %s3771_s23 }
  0x2f   :  { %2894 = vrot.lane.b32.xlu2 %v3845_v3, %s3771_s23  ;;  %2884 = vrot.lane.b32.xlu0 %v3851_v5, %s3771_s23 }
  0x36   :  { %2904 = vrot.lane.b32.xlu1 %v3851_v5, %s3772_s24 }
  0x37   :  { %2909 = vrot.lane.b32.xlu2 %v3861_v11, %s3772_s24  ;;  %2899 = vrot.lane.b32.xlu0 %v3858_v10, %s3771_s23  ;;  %s3800_s23 = smov 12  }
  0x3e   :  { %2919 = vrot.lane.b32.xlu1 %v3858_v10, %s3772_s24 }
  0x3f   :  { %2924 = vrot.lane.b32.xlu2 %v3851_v5, %s3773_s25  ;;  %2914 = vrot.lane.b32.xlu0 %v3845_v3, %s3772_s24  ;;  %s3801_s24 = smov 37  }
  0x46   :  { %2934 = vrot.lane.b32.xlu1 %v3845_v3, %s3773_s25 }
  0x47   :  { %2939 = vrot.lane.b32.xlu2 %v3858_v10, %s3773_s25  ;;  %2929 = vrot.lane.b32.xlu0 %v3861_v11, %s3773_s25  ;;  %s3802_s25 = smov 16  }
  0x4e   :  { %2949 = vrot.lane.b32.xlu1 %v3861_v11, %s3774_s26 }
  0x4f   :  { %2954 = vrot.lane.b32.xlu2 %v3845_v3, %s3774_s26  ;;  %2944 = vrot.lane.b32.xlu0 %v3851_v5, %s3774_s26 }
  0x56   :  { %2964 = vrot.lane.b32.xlu1 %v3851_v5, %s3775_s27 }
  0x57   :  { %2969 = vrot.lane.b32.xlu2 %v3861_v11, %s3775_s27  ;;  %2959 = vrot.lane.b32.xlu0 %v3858_v10, %s3774_s26  ;;  %s3803_s26 = smov 15  }
  0x5e   :  { %2979 = vrot.lane.b32.xlu1 %v3858_v10, %s3775_s27 }
  0x5f   :  { %2984 = vrot.lane.b32.xlu2 %v3851_v5, %s3776_s28  ;;  %2974 = vrot.lane.b32.xlu0 %v3845_v3, %s3775_s27  ;;  %s3804_s27 = smov 17  }
  0x66   :  { %2994 = vrot.lane.b32.xlu1 %v3845_v3, %s3776_s28 }
  0x67   :  { %2999 = vrot.lane.b32.xlu2 %v3858_v10, %s3776_s28  ;;  %2989 = vrot.lane.b32.xlu0 %v3861_v11, %s3776_s28  ;;  %s3805_s28 = smov 39  }
  0x69   :  { %v3896_v12 = vpop.permute.xlu2 %2844 }
  0x6a   :  { %v7089_v15 = vunpack.i.h.bf16 %v3896_v12  ;;  %v7088_v36 = vunpack.i.l.bf16 %v3896_v12 }
  0x6e   :  { %3009 = vrot.lane.b32.xlu1 %v3861_v11, %s3777_s29 }
  0x6f   :  { %3014 = vrot.lane.b32.xlu2 %v3845_v3, %s3777_s29  ;;  %3004 = vrot.lane.b32.xlu0 %v3851_v5, %s3777_s29 }
  0x71   :  { %v3904_v16 = vpop.permute.xlu2 %2849 }
  0x72   :  { %7368 = vst [vmem:[#allocation12_spill] sm:$0xff] %v3904_v16  ;;  %v7081_v17 = vunpack.i.l.bf16 %v3904_v16 }
  0x74   :  { %v3914_v18 = vsel %vm7188_vm0, %v7089_v15, %v7081_v17 }
  0x75   :  { %7369 = vst [vmem:[#allocation13_spill] sm:$0xff] %v3914_v18 }
  0x76   :  { %3024 = vrot.lane.b32.xlu1 %v3851_v5, %s3778_s30 }
  0x77   :  { %3029 = vrot.lane.b32.xlu2 %v3861_v11, %s3778_s30  ;;  %3019 = vrot.lane.b32.xlu0 %v3858_v10, %s3777_s29  ;;  %s3806_s29 = smov 38  }
  0x79   :  { %v3919_v19 = vpop.permute.xlu2 %2864 }
  0x7a   :  { %v7090_v20 = vunpack.i.l.bf16 %v3919_v19  ;;  %v7091_v44 = vunpack.i.h.bf16 %v3919_v19 }
  0x7e   :  { %3039 = vrot.lane.b32.xlu1 %v3858_v10, %s3778_s30 }
  0x7f   :  { %3044 = vrot.lane.b32.xlu2 %v3851_v5, %s3779_s4  ;;  %3034 = vrot.lane.b32.xlu0 %v3845_v3, %s3778_s30  ;;  %s3807_s30 = smov 40  }
  0x80   :  { %v3925_v21 = vpop.permute.xlu1 %2834 }
  0x81   :  { %7370 = vst [vmem:[#allocation14_spill] sm:$0xff] %v3925_v21  ;;  %v3927_v22 = vpop.permute.xlu2 %2879  ;;  %v3929_v23 = vpop.permute.xlu0 %2824 }
  0x82   :  { %7371 = vst [vmem:[#allocation15_spill] sm:$0xff] %v3927_v22  ;;  %v7076_v24 = vunpack.i.h.bf16 %v3927_v22  ;;  %v7085_v27 = vunpack.i.l.bf16 %v3929_v23  ;;  %v7087_v31 = vunpack.i.h.bf16 %v3929_v23 }
  0x84   :  { %v3939_v25 = vsel %vm7191_vm1, %v7076_v24, %v7090_v20 }
  0x85   :  { %7372 = vst [vmem:[#allocation16_spill] sm:$0xff] %v3939_v25 }
  0x86   :  { %3054 = vrot.lane.b32.xlu1 %v3845_v3, %s3779_s4 }
  0x87   :  { %3059 = vrot.lane.b32.xlu2 %v3858_v10, %s3779_s4  ;;  %3049 = vrot.lane.b32.xlu0 %v3861_v11, %s3779_s4  ;;  %s3808_s4 = smov 34  }
  0x88   :  { %v3944_v26 = vpop.permute.xlu1 %2839 }
  0x89   :  { %7373 = vst [vmem:[#allocation17_spill] sm:$0xff] %v3944_v26  ;;  %v7074_v28 = vunpack.i.h.bf16 %v3944_v26  ;;  %v3948_v29 = vpop.permute.xlu2 %2894  ;;  %v3950_v30 = vpop.permute.xlu0 %2829 }
  0x8a   :  { %7374 = vst [vmem:[#allocation18_spill] sm:$0xff] %v3948_v29  ;;  %v7079_v32 = vunpack.i.l.bf16 %v3950_v30 }
  0x8b   :  { %7375 = vst [vmem:[#allocation19_spill] sm:$0xff] %v3950_v30  ;;  %v3961_v33 = vsel %vm7180_vm2, %v7074_v28, %v7085_v27 }
  0x8c   :  { %7376 = vst [vmem:[#allocation20_spill] sm:$0xff] %v3961_v33  ;;  %v3969_v34 = vsel %vm7180_vm2, %v7087_v31, %v7079_v32 }
  0x8d   :  { %7377 = vst [vmem:[#allocation21_spill] sm:$0xff] %v3969_v34 }
  0x8e   :  { %3069 = vrot.lane.b32.xlu1 %v3861_v11, %s3780_s5 }
  0x8f   :  { %3074 = vrot.lane.b32.xlu2 %v3845_v3, %s3780_s5  ;;  %3064 = vrot.lane.b32.xlu0 %v3851_v5, %s3780_s5 }
  0x90   :  { %v3974_v35 = vpop.permute.xlu1 %2859 }
  0x91   :  { %7378 = vst [vmem:[#allocation22_spill] sm:$0xff] %v3974_v35  ;;  %v7075_v37 = vunpack.i.h.bf16 %v3974_v35  ;;  %v3978_v38 = vpop.permute.xlu2 %2909  ;;  %v3980_v39 = vpop.permute.xlu0 %2854 }
  0x92   :  { %7379 = vst [vmem:[#allocation23_spill] sm:$0xff] %v3980_v39  ;;  %v7084_v56 = vunpack.i.l.bf16 %v3978_v38 }
  0x93   :  { %v3988_v40 = vsel %vm7188_vm0, %v7075_v37, %v7088_v36 }
  0x94   :  { %7380 = vst [vmem:[#allocation24_spill] sm:$0xff] %v3988_v40 }
  0x96   :  { %3084 = vrot.lane.b32.xlu1 %v3851_v5, %s3781_s6 }
  0x97   :  { %3089 = vrot.lane.b32.xlu2 %v3861_v11, %s3781_s6  ;;  %3079 = vrot.lane.b32.xlu0 %v3858_v10, %s3780_s5  ;;  %s3809_s5 = smov 18  }
  0x98   :  { %v3993_v41 = vpop.permute.xlu1 %2874 }
  0x99   :  { %7381 = vst [vmem:[#allocation25_spill] sm:$0xff] %v3993_v41  ;;  %v3995_v42 = vpop.permute.xlu2 %2924  ;;  %v3997_v43 = vpop.permute.xlu0 %2869 }
  0x9a   :  { %7382 = vst [vmem:[#allocation26_spill] sm:$0xff] %v3997_v43  ;;  %v7082_v45 = vunpack.i.l.bf16 %v3997_v43  ;;  %v7098_v47 = vunpack.i.l.bf16 %v3995_v42 }
  0x9c   :  { %v4007_v46 = vsel %vm7191_vm1, %v7091_v44, %v7082_v45 }
  0x9d   :  { %7383 = vst [vmem:[#allocation27_spill] sm:$0xff] %v4007_v46 }
  0x9e   :  { %3099 = vrot.lane.b32.xlu1 %v3858_v10, %s3781_s6 }
  0x9f   :  { %3104 = vrot.lane.b32.xlu2 %v3851_v5, %s3782_s7  ;;  %3094 = vrot.lane.b32.xlu0 %v3845_v3, %s3781_s6  ;;  %s3810_s6 = smov 35  }
  0xa0   :  { %v4013_v48 = vpop.permute.xlu1 %2889 }
  0xa1   :  { %v7083_v49 = vunpack.i.l.bf16 %v4013_v48  ;;  %v4016_v50 = vpop.permute.xlu2 %2939  ;;  %v4018_v51 = vpop.permute.xlu0 %2884 }
  0xa2   :  { %7384 = vst [vmem:[#allocation28_spill] sm:$0xff] %v4016_v50  ;;  %v7078_v52 = vunpack.i.h.bf16 %v4016_v50  ;;  %v7094_v53 = vunpack.i.h.bf16 %v4018_v51  ;;  %v7093_v61 = vunpack.i.l.bf16 %v4018_v51 }
  0xa4   :  { %v4030_v54 = vsel %vm7241_vm4, %v7094_v53, %v7083_v49  ;;  %v4038_v55 = vsel %vm7250_vm3, %v7078_v52, %v7098_v47  ;;  %v7099_v52 = vunpack.i.h.bf16 %v3995_v42 }
  0xa5   :  { %7385 = vst [vmem:[#allocation29_spill] sm:$0xff] %v4030_v54 }
  0xa6   :  { %7386 = vst [vmem:[#allocation30_spill] sm:$0xff] %v4038_v55  ;;  %3114 = vrot.lane.b32.xlu1 %v3845_v3, %s3782_s7 }
  0xa7   :  { %3119 = vrot.lane.b32.xlu2 %v3858_v10, %s3782_s7  ;;  %3109 = vrot.lane.b32.xlu0 %v3861_v11, %s3782_s7  ;;  %s3811_s7 = smov 36  }
  0xa8   :  { %v4044_v57 = vpop.permute.xlu1 %2904 }
  0xa9   :  { %v7097_v58 = vunpack.i.h.bf16 %v4044_v57  ;;  %v4048_v59 = vpop.permute.xlu2 %2954  ;;  %v4050_v60 = vpop.permute.xlu0 %2899  ;;  %v7096_v1 = vunpack.i.l.bf16 %v4044_v57 }
  0xaa   :  { %7387 = vst [vmem:[#allocation31_spill] sm:$0xff] %v4048_v59  ;;  %v7077_v62 = vunpack.i.h.bf16 %v4050_v60 }
  0xab   :  { %7388 = vst [vmem:[#allocation32_spill] sm:$0xff] %v4050_v60  ;;  %v4060_v63 = vsel %vm7242_vm5, %v7097_v58, %v7084_v56 }
  0xac   :  { %v4068_v0 = vsel %vm7241_vm4, %v7077_v62, %v7093_v61 }
  0xad   :  { %7389 = vst [vmem:[#allocation33_spill] sm:$0xff] %v4068_v0 }
  0xae   :  { %3129 = vrot.lane.b32.xlu1 %v3861_v11, %s3783_s8 }
  0xaf   :  { %3134 = vrot.lane.b32.xlu2 %v3845_v3, %s3783_s8  ;;  %3124 = vrot.lane.b32.xlu0 %v3851_v5, %s3783_s8 }
  0xb0   :  { %v4074_v6 = vpop.permute.xlu1 %2919 }
  0xb1   :  { %7390 = vst [vmem:[#allocation34_spill] sm:$0xff] %v4074_v6  ;;  %v7080_v7 = vunpack.i.h.bf16 %v4074_v6  ;;  %v4077_v9 = vpop.permute.xlu2 %2969  ;;  %v4079_v13 = vpop.permute.xlu0 %2914 }
  0xb2   :  { %7391 = vst [vmem:[#allocation35_spill] sm:$0xff] %v4077_v9  ;;  %v7101_v20 = vunpack.i.l.bf16 %v4077_v9 }
  0xb3   :  { %7392 = vst [vmem:[#allocation36_spill] sm:$0xff] %v4079_v13  ;;  %v4087_v28 = vsel %vm7242_vm5, %v7080_v7, %v7096_v1 }
  0xb4   :  { %7393 = vst [vmem:[#allocation37_spill] sm:$0xff] %v4087_v28 }
  0xb6   :  { %3144 = vrot.lane.b32.xlu1 %v3851_v5, %s3784_s9 }
  0xb7   :  { %3149 = vrot.lane.b32.xlu2 %v3861_v11, %s3784_s9  ;;  %3139 = vrot.lane.b32.xlu0 %v3858_v10, %s3783_s8  ;;  %s3812_s8 = smov 118  }
  0xb8   :  { %v4092_v37 = vpop.permute.xlu1 %2934 }
  0xb9   :  { %7394 = vst [vmem:[#allocation38_spill] sm:$0xff] %v4092_v37  ;;  %v4094_v24 = vpop.permute.xlu2 %2984  ;;  %v4096_v62 = vpop.permute.xlu0 %2929 }
  0xba   :  { %v7086_v32 = vunpack.i.l.bf16 %v4096_v62  ;;  %v7103_v17 = vunpack.i.l.bf16 %v4094_v24  ;;  %v7112_v25 = vunpack.i.h.bf16 %v4094_v24 }
  0xbc   :  { %v4106_v7 = vsel %vm7250_vm3, %v7099_v52, %v7086_v32 }
  0xbe   :  { %3159 = vrot.lane.b32.xlu1 %v3858_v10, %s3784_s9 }
  0xbf   :  { %3164 = vrot.lane.b32.xlu2 %v3851_v5, %s3785_s10  ;;  %3154 = vrot.lane.b32.xlu0 %v3845_v3, %s3784_s9 }
  0xc0   :  { %v4112_v45 = vpop.permute.xlu1 %2949 }
  0xc1   :  { %7395 = vst [vmem:[#allocation39_spill] sm:$0xff] %v4112_v45  ;;  %v7092_v49 = vunpack.i.l.bf16 %v4112_v45  ;;  %v4115_v56 = vpop.permute.xlu2 %2999  ;;  %v4117_v27 = vpop.permute.xlu0 %2944 }
  0xc2   :  { %7396 = vst [vmem:[#allocation40_spill] sm:$0xff] %v4115_v56  ;;  %v7095_v32 = vunpack.i.h.bf16 %v4115_v56  ;;  %v7100_v31 = vunpack.i.h.bf16 %v4117_v27 }
  0xc4   :  { %v4129_v36 = vsel %vm7194_vm7, %v7100_v31, %v7092_v49  ;;  %v4137_v15 = vsel %vm7206_vm6, %v7095_v32, %v7103_v17  ;;  %v7105_v32 = vunpack.i.l.bf16 %v4117_v27 }
  0xc5   :  { %7397 = vst [vmem:[#allocation41_spill] sm:$0xff] %v4137_v15 }
  0xc6   :  { %3174 = vrot.lane.b32.xlu1 %v3845_v3, %s3785_s10 }
  0xc7   :  { %3179 = vrot.lane.b32.xlu2 %v3858_v10, %s3785_s10  ;;  %3169 = vrot.lane.b32.xlu0 %v3861_v11, %s3785_s10 }
  0xc8   :  { %v4143_v44 = vpop.permute.xlu1 %2964 }
  0xc9   :  { %v7102_v49 = vunpack.i.h.bf16 %v4143_v44  ;;  %v4147_v61 = vpop.permute.xlu2 %3014  ;;  %v4149_v53 = vpop.permute.xlu0 %2959  ;;  %v7108_v52 = vunpack.i.l.bf16 %v4143_v44 }
  0xca   :  { %7398 = vst [vmem:[#allocation42_spill] sm:$0xff] %v4147_v61  ;;  %v7104_v1 = vunpack.i.h.bf16 %v4149_v53 }
  0xcb   :  { %7399 = vst [vmem:[#allocation43_spill] sm:$0xff] %v4149_v53  ;;  %v4159_v58 = vsel %vm7202_vm8, %v7102_v49, %v7101_v20 }
  0xcc   :  { %v4167_v47 = vsel %vm7194_vm7, %v7104_v1, %v7105_v32 }
  0xcd   :  { %7400 = vst [vmem:[#allocation44_spill] sm:$0xff] %v4167_v47 }
  0xce   :  { %3189 = vrot.lane.b32.xlu1 %v3861_v11, %s3786_s11 }
  0xcf   :  { %3194 = vrot.lane.b32.xlu2 %v3845_v3, %s3786_s11  ;;  %3184 = vrot.lane.b32.xlu0 %v3851_v5, %s3786_s11 }
  0xd0   :  { %v4173_v31 = vpop.permute.xlu1 %2979 }
  0xd1   :  { %7401 = vst [vmem:[#allocation45_spill] sm:$0xff] %v4173_v31  ;;  %v7107_v20 = vunpack.i.h.bf16 %v4173_v31  ;;  %v4176_v49 = vpop.permute.xlu2 %3029  ;;  %v4178_v17 = vpop.permute.xlu0 %2974 }
  0xd2   :  { %7402 = vst [vmem:[#allocation46_spill] sm:$0xff] %v4176_v49  ;;  %v7130_v35 = vunpack.i.l.bf16 %v4176_v49 }
  0xd3   :  { %7403 = vst [vmem:[#allocation47_spill] sm:$0xff] %v4178_v17  ;;  %v4186_v1 = vsel %vm7202_vm8, %v7107_v20, %v7108_v52 }
  0xd4   :  { %7404 = vst [vmem:[#allocation48_spill] sm:$0xff] %v4186_v1 }
  0xd6   :  { %3204 = vrot.lane.b32.xlu1 %v3851_v5, %s3787_s12 }
  0xd7   :  { %3209 = vrot.lane.b32.xlu2 %v3861_v11, %s3787_s12  ;;  %3199 = vrot.lane.b32.xlu0 %v3858_v10, %s3786_s11  ;;  %s3814_s11 = smov 1  }
  0xd8   :  { %v4191_v32 = vpop.permute.xlu1 %2994 }
  0xd9   :  { %7405 = vst [vmem:[#allocation49_spill] sm:$0xff] %v4191_v32  ;;  %v4193_v33 = vpop.permute.xlu2 %3044  ;;  %v4195_v40 = vpop.permute.xlu0 %2989 }
  0xda   :  { %7406 = vst [vmem:[#allocation50_spill] sm:$0xff] %v4195_v40  ;;  %v7111_v0 = vunpack.i.l.bf16 %v4195_v40  ;;  %v7409_v15 = vunpack.i.l.bf16 %v4193_v33 }
  0xdc   :  { %v4205_v20 = vsel %vm7206_vm6, %v7112_v25, %v7111_v0 }
  0xde   :  { %3219 = vrot.lane.b32.xlu1 %v3858_v10, %s3787_s12 }
  0xdf   :  { %3224 = vrot.lane.b32.xlu2 %v3851_v5, %s3788_s13  ;;  %3214 = vrot.lane.b32.xlu0 %v3845_v3, %s3787_s12 }
  0xe0   :  { %v4211_v28 = vpop.permute.xlu1 %3009 }
  0xe1   :  { %7407 = vst [vmem:[#allocation51_spill] sm:$0xff] %v4211_v28  ;;  %v7119_v55 = vunpack.i.l.bf16 %v4211_v28  ;;  %v4214_v47 = vpop.permute.xlu2 %3059  ;;  %v4216_v1 = vpop.permute.xlu0 %3004 }
  0xe2   :  { %7408 = vst [vmem:[#allocation52_spill] sm:$0xff] %v4214_v47  ;;  %v7123_v0 = vunpack.i.h.bf16 %v4214_v47  ;;  %v7120_v25 = vunpack.i.h.bf16 %v4216_v1 }
  0xe4   :  { %v4228_v52 = vsel %vm7217_vm10, %v7120_v25, %v7119_v55  ;;  %v4236_v26 = vsel %vm7233_vm9, %v7123_v0, %v7409_v15  ;;  %v7135_v0 = vunpack.i.l.bf16 %v4216_v1 }
  0xe5   :  { %7410 = vst [vmem:[#allocation53_spill] sm:$0xff] %v4236_v26 }
  0xe6   :  { %3234 = vrot.lane.b32.xlu1 %v3845_v3, %s3788_s13 }
  0xe7   :  { %3239 = vrot.lane.b32.xlu2 %v3858_v10, %s3788_s13  ;;  %3229 = vrot.lane.b32.xlu0 %v3861_v11, %s3788_s13 }
  0xe8   :  { %v4242_v22 = vpop.permute.xlu1 %3024 }
  0xe9   :  { %v7131_v55 = vunpack.i.h.bf16 %v4242_v22  ;;  %v4246_v25 = vpop.permute.xlu2 %3074  ;;  %v4248_v60 = vpop.permute.xlu0 %3019  ;;  %v7140_v50 = vunpack.i.l.bf16 %v4242_v22 }
  0xea   :  { %7411 = vst [vmem:[#allocation54_spill] sm:$0xff] %v4246_v25  ;;  %v7134_v15 = vunpack.i.h.bf16 %v4248_v60 }
  0xeb   :  { %7412 = vst [vmem:[#allocation55_spill] sm:$0xff] %v4248_v60  ;;  %v4258_v26 = vsel %vm7224_vm11, %v7131_v55, %v7130_v35 }
  0xec   :  { %v4266_v6 = vsel %vm7217_vm10, %v7134_v15, %v7135_v0 }
  0xed   :  { %7413 = vst [vmem:[#allocation56_spill] sm:$0xff] %v4266_v6  ;;  %v3047_v6 = vunpack.i.h.bf16 %v4193_v33 }
  0xee   :  { %3249 = vrot.lane.b32.xlu1 %v3861_v11, %s3789_s14 }
  0xef   :  { %3254 = vrot.lane.b32.xlu2 %v3845_v3, %s3789_s14  ;;  %3244 = vrot.lane.b32.xlu0 %v3851_v5, %s3789_s14 }
  0xf0   :  { %v4272_v53 = vpop.permute.xlu1 %3039 }
  0xf1   :  { %7414 = vst [vmem:[#allocation57_spill] sm:$0xff] %v4272_v53  ;;  %v7139_v35 = vunpack.i.h.bf16 %v4272_v53  ;;  %v4275_v55 = vpop.permute.xlu2 %3089  ;;  %v4277_v31 = vpop.permute.xlu0 %3034  ;;  %v7159_v53 = vunpack.i.l.bf16 %v4246_v25 }
  0xf2   :  { %7415 = vst [vmem:[#allocation58_spill] sm:$0xff] %v4275_v55 }
  0xf3   :  { %7416 = vst [vmem:[#allocation59_spill] sm:$0xff] %v4277_v31  ;;  %v4285_v15 = vsel %vm7224_vm11, %v7139_v35, %v7140_v50 }
  0xf4   :  { %7417 = vst [vmem:[#allocation60_spill] sm:$0xff] %v4285_v15 }
  0xf6   :  { %3264 = vrot.lane.b32.xlu1 %v3851_v5, %s3790_s15 }
  0xf7   :  { %3269 = vrot.lane.b32.xlu2 %v3861_v11, %s3790_s15  ;;  %3259 = vrot.lane.b32.xlu0 %v3858_v10, %s3789_s14 }
  0xf8   :  { %v4290_v0 = vpop.permute.xlu1 %3054 }
  0xf9   :  { %7418 = vst [vmem:[#allocation61_spill] sm:$0xff] %v4290_v0  ;;  %v4293_v56 = vpop.permute.xlu2 %3104  ;;  %v4295_v21 = vpop.permute.xlu0 %3049  ;;  %v7170_v0 = vunpack.i.l.bf16 %v4275_v55 }
  0xfa   :  { %7419 = vst [vmem:[#allocation62_spill] sm:$0xff] %v4295_v21  ;;  %v7150_v35 = vunpack.i.h.bf16 %v4293_v56  ;;  %v3106_v50 = vunpack.i.l.bf16 %v4293_v56  ;;  %v7152_v15 = vunpack.i.l.bf16 %v4295_v21 }
  0xfc   :  { %v546_v60 = vsel %vm539_vm12, %v3106_v50, %v7150_v35  ;;  %v4309_v39 = vsel %vm7233_vm9, %v3047_v6, %v7152_v15 }
  0xfd   :  { %1970 = vmatpush.msra.mxu0 %v546_v60 }
  0xfe   :  { %3279 = vrot.lane.b32.xlu1 %v3858_v10, %s3790_s15 }
  0xff   :  { %3284 = vrot.lane.b32.xlu2 %v3851_v5, %s3791_s16  ;;  %3274 = vrot.lane.b32.xlu0 %v3845_v3, %s3790_s15  ;;  %s2753_s15 = sshll.u32 %s7073_s3, 4  ;;  %s2754_s15 = int_to_ptr.hbm [resolvable:$true] %s2753_s15 }
 0x100   :  { %v3070_v41 = vpop.permute.xlu1 %3069 }
 0x101   :  { %v3072_v47 = vunpack.i.h.bf16 %v3070_v41  ;;  %v3071_v59 = vunpack.i.l.bf16 %v3070_v41  ;;  %v4315_v35 = vpop.permute.xlu2 %3119  ;;  %v3065_v17 = vpop.permute.xlu0 %3064 }
 0x102   :  { %v3122_v15 = vunpack.i.h.bf16 %v4315_v35  ;;  %v3067_v60 = vunpack.i.h.bf16 %v3065_v17  ;;  %v7423_v28 = vunpack.i.l.bf16 %v4315_v35 }
 0x103   :  { %v4321_v32 = vsel %vm7174_vm13, %v3071_v59, %v3072_v47  ;;  %v4327_v61 = vsel %vm7174_vm13, %v3072_v47, %v7159_v53  ;;  %v3066_v53 = vunpack.i.l.bf16 %v3065_v17 }
 0x104   :  { %7420 = vst [vmem:[#allocation63_spill] sm:$0xff] %v4321_v32  ;;  %v4331_v41 = vsel %vm7174_vm13, %v3067_v60, %v3071_v59  ;;  %v4335_v31 = vsel %vm539_vm12, %v3122_v15, %v3106_v50  ;;  %v7171_v59 = vunpack.i.h.bf16 %v4246_v25  ;;  %v4358_v17 = vsel %vm539_vm12, %v7423_v28, %v3122_v15 }
 0x105   :  { %7421 = vst [vmem:[#allocation64_spill] sm:$0xff] %v4327_v61  ;;  %v7429_v15 = vunpack.i.h.bf16 %v4216_v1 }
 0x106   :  { %7422 = vst [vmem:[#allocation65_spill] sm:$0xff] %v4335_v31  ;;  %3294 = vrot.lane.b32.xlu1 %v3845_v3, %s3791_s16 }
 0x107   :  { %3299 = vrot.lane.b32.xlu2 %v3858_v10, %s3791_s16  ;;  %3289 = vrot.lane.b32.xlu0 %v3861_v11, %s3791_s16  ;;  %7424 = vst [vmem:[#allocation66_spill] sm:$0xff] %v4358_v17 }
 0x108   :  { %v3085_v47 = vpop.permute.xlu1 %3084 }
 0x109   :  { %v3087_v61 = vunpack.i.h.bf16 %v3085_v47  ;;  %v3086_v16 = vunpack.i.l.bf16 %v3085_v47  ;;  %v4344_v50 = vpop.permute.xlu2 %3134  ;;  %v3080_v31 = vpop.permute.xlu0 %3079 }
 0x10a   :  { %v3082_v43 = vunpack.i.h.bf16 %v3080_v31  ;;  %v3081_v45 = vunpack.i.l.bf16 %v3080_v31 }
 0x10b   :  { %v513_v30 = vsel %vm7240_vm14, %v3086_v16, %v3087_v61  ;;  %v4352_v9 = vsel %vm7240_vm14, %v3087_v61, %v7170_v0  ;;  %v480_v0 = vsel %vm7174_vm13, %v3066_v53, %v3067_v60 }
 0x10c   :  { %1971 = vmatpush.msra.mxu0 %v513_v30  ;;  %v4364_v31 = vsel %vm7174_vm13, %v7171_v59, %v3081_v45  ;;  %v4368_v47 = vsel %vm7174_vm13, %v3081_v45, %v3082_v43  ;;  %v4372_v61 = vsel %vm7174_vm13, %v3082_v43, %v3066_v53  ;;  %v7428_v43 = vunpack.i.l.bf16 %v4193_v33 }
 0x10d   :  { %7425 = vst [vmem:[#allocation67_spill] sm:$0xff] %v4364_v31  ;;  %v7172_v59 = vunpack.i.h.bf16 %v4275_v55  ;;  %v7432_v33 = vunpack.i.h.bf16 %v4242_v22  ;;  %vm7300_vm13 = vcmp.lt.s32.totalorder %v3901_v14, 81 }
 0x10e   :  { %7426 = vst [vmem:[#allocation68_spill] sm:$0xff] %v4368_v47  ;;  %3309 = vrot.lane.b32.xlu1 %v3861_v11, %s3792_s17  ;;  %1972 = vmatpush.msra.mxu0 %v480_v0  ;;  %v447_v45 = vsel %vm7233_vm9, %v7428_v43, %v3047_v6  ;;  %v7430_v0 = vunpack.i.l.bf16 %v4216_v1  ;;  %v7433_v6 = vunpack.i.l.bf16 %v4242_v22  ;;  %v7434_v1 = vunpack.i.h.bf16 %v4344_v50 }
 0x10f   :  { %7427 = vst [vmem:[#allocation69_spill] sm:$0xff] %v4372_v61  ;;  %3314 = vrot.lane.b32.xlu2 %v3845_v3, %s3792_s17  ;;  %3304 = vrot.lane.b32.xlu0 %v3851_v5, %s3792_s17  ;;  %vm902_vm9 = vcmp.lt.s32.totalorder %v3901_v14, 57 }
 0x110   :  { %v3100_v53 = vpop.permute.xlu1 %3099  ;;  %1973 = vmatpush.msra.mxu0 %v447_v45  ;;  %v381_v60 = vsel %vm7217_vm10, %v7430_v0, %v7429_v15  ;;  %v414_v43 = vsel %vm7224_vm11, %v7433_v6, %v7432_v33  ;;  %v7435_v15 = vunpack.i.l.bf16 %v4344_v50  ;;  %vm869_vm10 = vcmp.lt.s32.totalorder %v3901_v14, 58 }
 0x111   :  { %v3102_v30 = vunpack.i.h.bf16 %v3100_v53  ;;  %v3101_v28 = vunpack.i.l.bf16 %v3100_v53  ;;  %v4395_v61 = vpop.permute.xlu2 %3149  ;;  %v3095_v47 = vpop.permute.xlu0 %3094  ;;  %vm935_vm11 = vcmp.lt.s32.totalorder %v3901_v14, 56 }
 0x112   :  { %7431 = vst [vmem:[#allocation70_spill] sm:$0xff] %v4395_v61  ;;  %v3097_v45 = vunpack.i.h.bf16 %v3095_v47  ;;  %v3096_v17 = vunpack.i.l.bf16 %v3095_v47  ;;  %1974 = vmatpush.msra.mxu0 %v414_v43  ;;  %v4410_v53 = vsel %vm7263_vm15, %v7435_v15, %v7434_v1  ;;  %v7443_v43 = vunpack.i.l.bf16 %v4094_v24 }
 0x113   :  { %7436 = vst [vmem:[#allocation71_spill] sm:$0xff] %v4410_v53  ;;  %v4414_v0 = vsel %vm7240_vm14, %v3101_v28, %v3102_v30  ;;  %v4432_v6 = vsel %vm7240_vm14, %v3102_v30, %v3086_v16  ;;  %v7445_v16 = vunpack.i.l.bf16 %v4143_v44 }
 0x114   :  { %7437 = vst [vmem:[#allocation72_spill] sm:$0xff] %v4414_v0  ;;  %1975 = vmatpush.msra.mxu0 %v381_v60  ;;  %v4420_v22 = vsel %vm7240_vm14, %v7172_v59, %v3096_v17  ;;  %v4424_v47 = vsel %vm7240_vm14, %v3097_v45, %v3101_v28  ;;  %v4428_v33 = vsel %vm7240_vm14, %v3096_v17, %v3097_v45  ;;  %v7442_v60 = vunpack.i.h.bf16 %v4094_v24 }
 0x115   :  { %7438 = vst [vmem:[#allocation73_spill] sm:$0xff] %v4420_v22  ;;  %v7444_v17 = vunpack.i.h.bf16 %v4143_v44  ;;  %v7448_v44 = vunpack.i.h.bf16 %v3995_v42  ;;  %v3672_v22 = vld [vmem:[#allocation6 + $0x10] sm:$0xff]  ;;  %vm7254_vm14 = vcmp.lt.s32.totalorder %v3901_v14, 119 }
 0x116   :  { %7439 = vst [vmem:[#allocation74_spill] sm:$0xff] %v4424_v47  ;;  %v348_v1 = vsel %vm7206_vm6, %v7443_v43, %v7442_v60  ;;  %3324 = vrot.lane.b32.xlu1 %v3851_v5, %s3793_s18  ;;  %v7446_v43 = vunpack.i.h.bf16 %v4117_v27  ;;  %v3671_v47 = vld [vmem:[#allocation6 + $0x18] sm:$0xff]  ;;  %vm803_vm6 = vcmp.lt.s32.totalorder %v3901_v14, 60 }
 0x117   :  { %7440 = vst [vmem:[#allocation75_spill] sm:$0xff] %v4428_v33  ;;  %1976 = vmatpush.msra.mxu0 %v348_v1  ;;  %3329 = vrot.lane.b32.xlu2 %v3861_v11, %s3793_s18  ;;  %v315_v28 = vsel %vm7202_vm8, %v7445_v16, %v7444_v17  ;;  %v7447_v1 = vunpack.i.l.bf16 %v4117_v27  ;;  %v7449_v17 = vunpack.i.l.bf16 %v3995_v42  ;;  %vm836_vm8 = vcmp.lt.s32.totalorder %v3901_v14, 59 }
 0x118   :  { %7441 = vst [vmem:[#allocation76_spill] sm:$0xff] %v4432_v6  ;;  %3319 = vrot.lane.b32.xlu0 %v3858_v10, %s3792_s17  ;;  %v3115_v24 = vpop.permute.xlu1 %3114 }
 0x119   :  { %1977 = vmatpush.msra.mxu0 %v315_v28  ;;  %v3117_v30 = vunpack.i.h.bf16 %v3115_v24  ;;  %v3116_v45 = vunpack.i.l.bf16 %v3115_v24  ;;  %v4450_v15 = vpop.permute.xlu2 %3164  ;;  %v3110_v60 = vpop.permute.xlu0 %3109  ;;  %v282_v59 = vsel %vm7194_vm7, %v7447_v1, %v7446_v43  ;;  %v4464_v16 = vsel %vm7250_vm3, %v7449_v17, %v7448_v44 }
 0x11a   :  { %v3112_v6 = vunpack.i.h.bf16 %v3110_v60  ;;  %v3111_v0 = vunpack.i.l.bf16 %v3110_v60  ;;  %7450 = vst [vmem:[#allocation77_spill] sm:$0xff] %v4464_v16  ;;  %v7451_v28 = vunpack.i.l.bf16 %v4315_v35  ;;  %v7457_v43 = vunpack.i.h.bf16 %v4044_v57 }
 0x11b   :  { %1978 = vmatpush.msra.mxu0 %v282_v59  ;;  %v4474_v27 = vsel %vm539_vm12, %v3116_v45, %v3117_v30  ;;  %v7454_v59 = vunpack.i.h.bf16 %v4293_v56  ;;  %v7460_v56 = vunpack.i.h.bf16 %v4018_v51  ;;  %v7468_v44 = vunpack.i.l.bf16 %v4344_v50 }
 0x11c   :  { %v4470_v24 = vsel %vm539_vm12, %v3117_v30, %v7451_v28  ;;  %7453 = vst [vmem:[#allocation79_spill] sm:$0xff] %v4474_v27  ;;  %v4485_v60 = vsel %vm539_vm12, %v3111_v0, %v3112_v6  ;;  %v4489_v35 = vsel %vm539_vm12, %v3112_v6, %v3116_v45  ;;  %v7458_v30 = vunpack.i.l.bf16 %v4044_v57 }
 0x11d   :  { %7452 = vst [vmem:[#allocation78_spill] sm:$0xff] %v4470_v24  ;;  %1979 = vmatpush.msra.mxu0 %v4464_v16  ;;  %v4481_v42 = vsel %vm539_vm12, %v7454_v59, %v3111_v0  ;;  %v7461_v0 = vunpack.i.l.bf16 %v4018_v51  ;;  %v7464_v51 = vunpack.i.h.bf16 %v3919_v19  ;;  %v7465_v59 = vunpack.i.l.bf16 %v3919_v19 }
 0x11e   :  { %7455 = vst [vmem:[#allocation80_spill] sm:$0xff] %v4485_v60  ;;  %v4497_v1 = vsel %vm7242_vm5, %v7458_v30, %v7457_v43  ;;  %3339 = vrot.lane.b32.xlu1 %v3858_v10, %s3793_s18  ;;  %vm638_vm12 = vcmp.lt.s32.totalorder %v3901_v14, 80  ;;  %v7467_v45 = vunpack.i.l.bf16 %v3896_v12  ;;  %vm770_vm7 = vcmp.lt.s32.totalorder %v3901_v14, 61 }
 0x11f   :  { %7456 = vst [vmem:[#allocation81_spill] sm:$0xff] %v4489_v35  ;;  %1980 = vmatpush.msra.mxu0 %v4497_v1  ;;  %3344 = vrot.lane.b32.xlu2 %v3851_v5, %s3794_s19  ;;  %v4509_v57 = vsel %vm7241_vm4, %v7461_v0, %v7460_v56  ;;  %v150_v43 = vsel %vm7191_vm1, %v7465_v59, %v7464_v51  ;;  %v7466_v0 = vunpack.i.h.bf16 %v3896_v12  ;;  %v7473_v12 = vunpack.i.h.bf16 %v3929_v23 }
 0x120   :  { %7459 = vst [vmem:[#allocation82_spill] sm:$0xff] %v4497_v1  ;;  %3334 = vrot.lane.b32.xlu0 %v3845_v3, %s3793_s18  ;;  %v4511_v6 = vpop.permute.xlu1 %3129  ;;  %vm704_vm1 = vcmp.lt.s32.totalorder %v3901_v14, 78  ;;  %vm7253_vm4 = vcmp.lt.s32.totalorder %v3901_v14, 120  ;;  %vm7251_vm5 = vcmp.lt.s32.totalorder %v3901_v14, 121  ;;  %vm7260_vm3 = vcmp.lt.s32.totalorder %v3901_v14, 12 }
 0x121   :  { %7462 = vst [vmem:[#allocation83_spill] sm:$0xff] %v4509_v57  ;;  %1981 = vmatpush.msra.mxu0 %v4509_v57  ;;  %v4517_v17 = vpop.permute.xlu2 %3179  ;;  %v4519_v28 = vpop.permute.xlu0 %3124  ;;  %v117_v5 = vsel %vm7188_vm0, %v7467_v45, %v7466_v0  ;;  %v7469_v19 = vunpack.i.h.bf16 %v4511_v6  ;;  %v7471_v59 = vunpack.i.l.bf16 %v4511_v6  ;;  %v7474_v45 = vunpack.i.l.bf16 %v3929_v23 }
 0x122   :  { %7463 = vst [vmem:[#allocation84_spill] sm:$0xff] %v4511_v6  ;;  %v3182_v30 = vunpack.i.h.bf16 %v4517_v17  ;;  %v7177_v56 = vunpack.i.h.bf16 %v4519_v28  ;;  %v7475_v57 = vunpack.i.l.bf16 %v4450_v15  ;;  %v3181_v23 = vunpack.i.l.bf16 %v4517_v17 }
 0x123   :  { %1982 = vmatpush.msra.mxu0 %v150_v43  ;;  %v4542_v51 = vsel %vm7263_vm15, %v7469_v19, %v7468_v44  ;;  %v84_v0 = vsel %vm7180_vm2, %v7474_v45, %v7473_v12  ;;  %v7176_v12 = vunpack.i.l.bf16 %v4519_v28  ;;  %vm671_vm2 = vcmp.lt.s32.totalorder %v3901_v14, 79 }
 0x124   :  { %7470 = vst [vmem:[#allocation85_spill] sm:$0xff] %v4542_v51  ;;  %v4550_v43 = vsel %vm7263_vm15, %v7177_v56, %v7471_v59  ;;  %v4562_v44 = vsel %vm638_vm12, %v3182_v30, %v7475_v57  ;;  %vm737_vm0 = vcmp.lt.s32.totalorder %v3901_v14, 62 }
 0x125   :  { %1983 = vmatpush.msra.mxu0 %v117_v5  ;;  %7472 = vst [vmem:[#allocation86_spill] sm:$0xff] %v4550_v43  ;;  %v7175_v5 = vunpack.i.l.bf16 %v4395_v61 }
 0x126   :  { %7476 = vst [vmem:[#allocation87_spill] sm:$0xff] %v4562_v44  ;;  %3354 = vrot.lane.b32.xlu1 %v3845_v3, %s3794_s19  ;;  %v4616_v44 = vld [vmem:[#allocation6] sm:$0xff] }
 0x127   :  { %1984 = vmatpush.msra.mxu0 %v84_v0  ;;  %3359 = vrot.lane.b32.xlu2 %v3858_v10, %s3794_s19  ;;  %v3368_v10 = vpack.i.bf16 %v3856_v8, %v3847_v4 }
 0x128   :  { %3349 = vrot.lane.b32.xlu0 %v3861_v11, %s3794_s19  ;;  %v4569_v19 = vpop.permute.xlu1 %3144  ;;  %v4589_v11 = vsel %vm638_vm12, %v3181_v23, %v3182_v30 }
 0x129   :  { %1985 = vmatpush.msra.mxu0 %v3843_v2  ;;  %v7178_v57 = vunpack.i.h.bf16 %v4569_v19  ;;  %v4574_v59 = vpop.permute.xlu2 %3194  ;;  %v3140_v3 = vpop.permute.xlu0 %3139  ;;  %7478 = vst [vmem:[#allocation89_spill] sm:$0xff] %v4589_v11 }
 0x12a   :  { %v3142_v45 = vunpack.i.h.bf16 %v3140_v3  ;;  %v3141_v0 = vunpack.i.l.bf16 %v3140_v3  ;;  %v7480_v3 = vunpack.i.h.bf16 %v4344_v50 }
 0x12b   :  { %v4585_v2 = vsel %vm7300_vm13, %v7178_v57, %v7175_v5  ;;  %v3196_v5 = vunpack.i.l.bf16 %v4574_v59 }
 0x12c   :  { %7477 = vst [vmem:[#allocation88_spill] sm:$0xff] %v4585_v2  ;;  %v4593_v17 = vsel %vm7263_vm15, %v3141_v0, %v3142_v45  ;;  %v4599_v4 = vsel %vm7263_vm15, %v7480_v3, %v3141_v0  ;;  %v4605_v8 = vsel %vm7263_vm15, %v3142_v45, %v7176_v12  ;;  %v7182_v3 = vunpack.i.h.bf16 %v4395_v61 }
 0x12d   :  { %7479 = vst [vmem:[#allocation90_spill] sm:$0xff] %v4593_v17  ;;  %vm7270_vm15 = vcmp.lt.s32.totalorder %v3901_v14, 17 }
 0x12e   :  { %7481 = vst [vmem:[#allocation91_spill] sm:$0xff] %v4599_v4  ;;  %3369 = vrot.lane.b32.xlu1 %v3368_v10, %s3795_s20  ;;  %v4618_v4 = vld [vmem:[#allocation6 + $0x8] sm:$0xff] }
 0x12f   :  { %7482 = vst [vmem:[#allocation92_spill] sm:$0xff] %v4605_v8  ;;  %3374 = vrot.lane.b32.xlu2 %v3368_v10, %s3796_s21  ;;  %v4622_v1 = vpack.i.bf16 %v4618_v4, %v4616_v44 }
 0x130   :  { %3364 = vrot.lane.b32.xlu0 %v3368_v10, %s3797_s0  ;;  %v3160_v0 = vpop.permute.xlu1 %3159  ;;  %v7484_v10 = vunpack.i.h.bf16 %v4574_v59 }
 0x131   :  { %v3162_v45 = vunpack.i.h.bf16 %v3160_v0  ;;  %v3161_v12 = vunpack.i.l.bf16 %v3160_v0  ;;  %v4614_v56 = vpop.permute.xlu2 %3209  ;;  %v3155_v57 = vpop.permute.xlu0 %3154 }
 0x132   :  { %7483 = vst [vmem:[#allocation93_spill] sm:$0xff] %v4614_v56  ;;  %v3157_v8 = vunpack.i.h.bf16 %v3155_v57  ;;  %v3156_v30 = vunpack.i.l.bf16 %v3155_v57  ;;  %v4629_v0 = vsel %vm671_vm2, %v3196_v5, %v7484_v10  ;;  %v7490_v10 = vunpack.i.l.bf16 %v4569_v19 }
 0x133   :  { %7485 = vst [vmem:[#allocation94_spill] sm:$0xff] %v4629_v0  ;;  %v4633_v50 = vsel %vm7300_vm13, %v3161_v12, %v3162_v45  ;;  %v7514_v35 = vunpack.i.h.bf16 %v4614_v56 }
 0x134   :  { %7486 = vst [vmem:[#allocation95_spill] sm:$0xff] %v4633_v50  ;;  %v4639_v57 = vsel %vm7300_vm13, %v7182_v3, %v3156_v30  ;;  %v4643_v16 = vsel %vm7300_vm13, %v3156_v30, %v3157_v8  ;;  %v4647_v17 = vsel %vm7300_vm13, %v3157_v8, %v3161_v12  ;;  %v4653_v11 = vsel %vm7300_vm13, %v3162_v45, %v7490_v10 }
 0x135   :  { %7487 = vst [vmem:[#allocation96_spill] sm:$0xff] %v4639_v57  ;;  %v7187_v45 = vunpack.i.h.bf16 %v4450_v15  ;;  %v7502_v57 = vunpack.i.l.bf16 %v4614_v56 }
 0x136   :  { %7488 = vst [vmem:[#allocation97_spill] sm:$0xff] %v4643_v16  ;;  %3384 = vrot.lane.b32.xlu1 %v4622_v1, %s3798_s1 }
 0x137   :  { %7489 = vst [vmem:[#allocation98_spill] sm:$0xff] %v4647_v17  ;;  %3389 = vrot.lane.b32.xlu2 %v4622_v1, %s3799_s22 }
 0x138   :  { %7491 = vst [vmem:[#allocation99_spill] sm:$0xff] %v4653_v11  ;;  %3379 = vrot.lane.b32.xlu0 %v4622_v1, %s3800_s23  ;;  %v3175_v12 = vpop.permute.xlu1 %3174 }
 0x139   :  { %v3177_v8 = vunpack.i.h.bf16 %v3175_v12  ;;  %v3176_v30 = vunpack.i.l.bf16 %v3175_v12  ;;  %v4661_v3 = vpop.permute.xlu2 %3224  ;;  %v4663_v17 = vpop.permute.xlu0 %3169 }
 0x13a   :  { %7492 = vst [vmem:[#allocation100_spill] sm:$0xff] %v4663_v17  ;;  %v7186_v10 = vunpack.i.h.bf16 %v4663_v17  ;;  %v7185_v11 = vunpack.i.l.bf16 %v4663_v17  ;;  %v7500_v16 = vunpack.i.l.bf16 %v4661_v3 }
 0x13b   :  { %v4670_v50 = vsel %vm638_vm12, %v3176_v30, %v3177_v8  ;;  %v4674_v25 = vsel %vm638_vm12, %v3177_v8, %v3181_v23 }
 0x13c   :  { %7493 = vst [vmem:[#allocation101_spill] sm:$0xff] %v4670_v50  ;;  %v4682_v12 = vsel %vm638_vm12, %v7187_v45, %v7185_v11  ;;  %v4688_v33 = vsel %vm638_vm12, %v7186_v10, %v3176_v30 }
 0x13d   :  { %7494 = vst [vmem:[#allocation102_spill] sm:$0xff] %v4674_v25 }
 0x13e   :  { %7495 = vst [vmem:[#allocation103_spill] sm:$0xff] %v4682_v12  ;;  %3399 = vrot.lane.b32.xlu1 %v4622_v1, %s3801_s24 }
 0x13f   :  { %7496 = vst [vmem:[#allocation104_spill] sm:$0xff] %v4688_v33  ;;  %3404 = vrot.lane.b32.xlu2 %v4622_v1, %s3802_s25 }
 0x140   :  { %3394 = vrot.lane.b32.xlu0 %v4622_v1, %s3803_s26  ;;  %v4696_v23 = vpop.permute.xlu1 %3189 }
 0x141   :  { %7497 = vst [vmem:[#allocation105_spill] sm:$0xff] %v4696_v23  ;;  %v7189_v11 = vunpack.i.h.bf16 %v4696_v23  ;;  %v7190_v30 = vunpack.i.l.bf16 %v4696_v23  ;;  %v4701_v10 = vpop.permute.xlu2 %3239  ;;  %v4703_v45 = vpop.permute.xlu0 %3184 }
 0x142   :  { %v3242_v25 = vunpack.i.h.bf16 %v4701_v10  ;;  %v7192_v53 = vunpack.i.h.bf16 %v4703_v45  ;;  %v7508_v31 = vunpack.i.l.bf16 %v4703_v45 }
 0x143   :  { %v4712_v27 = vsel %vm671_vm2, %v7189_v11, %v3196_v5  ;;  %v3241_v11 = vunpack.i.l.bf16 %v4701_v10  ;;  %v7506_v5 = vunpack.i.h.bf16 %v4574_v59  ;;  %v4789_v59 = vpack.i.bf16 %v3671_v47, %v3672_v22 }
 0x144   :  { %7498 = vst [vmem:[#allocation106_spill] sm:$0xff] %v4712_v27  ;;  %v4720_v8 = vsel %vm671_vm2, %v7192_v53, %v7190_v30  ;;  %v4726_v51 = vsel %vm737_vm0, %v3242_v25, %v7500_v16 }
 0x145   :  { %7499 = vst [vmem:[#allocation107_spill] sm:$0xff] %v4720_v8  ;;  %v4753_v33 = vsel %vm737_vm0, %v3241_v11, %v3242_v25 }
 0x146   :  { %7501 = vst [vmem:[#allocation108_spill] sm:$0xff] %v4726_v51  ;;  %3414 = vrot.lane.b32.xlu1 %v4622_v1, %s3804_s27 }
 0x147   :  { %3419 = vrot.lane.b32.xlu2 %v4622_v1, %s3805_s28  ;;  %7504 = vst [vmem:[#allocation110_spill] sm:$0xff] %v4753_v33  ;;  %v4784_v33 = vld [vmem:[#allocation6 + $0x20] sm:$0xff] }
 0x148   :  { %3409 = vrot.lane.b32.xlu0 %v4622_v1, %s3806_s29  ;;  %v4736_v30 = vpop.permute.xlu1 %3204  ;;  %v4787_v24 = vpack.i.bf16 %v4784_v33, %v3671_v47 }
 0x149   :  { %v7193_v16 = vunpack.i.h.bf16 %v4736_v30  ;;  %v4740_v53 = vpop.permute.xlu2 %3254  ;;  %v3200_v51 = vpop.permute.xlu0 %3199 }
 0x14a   :  { %v3202_v10 = vunpack.i.h.bf16 %v3200_v51  ;;  %v3201_v50 = vunpack.i.l.bf16 %v3200_v51 }
 0x14b   :  { %v4749_v0 = vsel %vm704_vm1, %v7193_v16, %v7502_v57  ;;  %v3256_v16 = vunpack.i.l.bf16 %v4740_v53 }
 0x14c   :  { %7503 = vst [vmem:[#allocation109_spill] sm:$0xff] %v4749_v0  ;;  %v4757_v27 = vsel %vm671_vm2, %v3201_v50, %v3202_v10  ;;  %v4763_v51 = vsel %vm671_vm2, %v7506_v5, %v3201_v50  ;;  %v4769_v57 = vsel %vm671_vm2, %v3202_v10, %v7508_v31  ;;  %v7511_v50 = vunpack.i.h.bf16 %v4740_v53 }
 0x14d   :  { %7505 = vst [vmem:[#allocation111_spill] sm:$0xff] %v4757_v27 }
 0x14e   :  { %7507 = vst [vmem:[#allocation112_spill] sm:$0xff] %v4763_v51  ;;  %3429 = vrot.lane.b32.xlu1 %v4622_v1, %s3807_s30 }
 0x14f   :  { %7509 = vst [vmem:[#allocation113_spill] sm:$0xff] %v4769_v57  ;;  %3434 = vrot.lane.b32.xlu2 %v4622_v1, %s3808_s4 }
 0x150   :  { %3424 = vrot.lane.b32.xlu0 %v4622_v1, %s3809_s5  ;;  %v3220_v31 = vpop.permute.xlu1 %3219 }
 0x151   :  { %v3222_v5 = vunpack.i.h.bf16 %v3220_v31  ;;  %v3221_v10 = vunpack.i.l.bf16 %v3220_v31  ;;  %v4781_v57 = vpop.permute.xlu2 %3269  ;;  %v3215_v25 = vpop.permute.xlu0 %3214  ;;  %v4795_v31 = vsel %vm770_vm7, %v3256_v16, %v7511_v50  ;;  %v7518_v50 = vunpack.i.l.bf16 %v4736_v30 }
 0x152   :  { %7510 = vst [vmem:[#allocation114_spill] sm:$0xff] %v4781_v57  ;;  %v3217_v51 = vunpack.i.h.bf16 %v3215_v25  ;;  %v3216_v27 = vunpack.i.l.bf16 %v3215_v25 }
 0x153   :  { %7512 = vst [vmem:[#allocation115_spill] sm:$0xff] %v4795_v31  ;;  %v4799_v25 = vsel %vm704_vm1, %v3221_v10, %v3222_v5  ;;  %v4819_v31 = vsel %vm704_vm1, %v3222_v5, %v7518_v50  ;;  %v7200_v5 = vunpack.i.h.bf16 %v4661_v3 }
 0x154   :  { %7513 = vst [vmem:[#allocation116_spill] sm:$0xff] %v4799_v25  ;;  %v4805_v40 = vsel %vm704_vm1, %v7514_v35, %v3216_v27  ;;  %v4809_v47 = vsel %vm704_vm1, %v3216_v27, %v3217_v51  ;;  %v4813_v6 = vsel %vm704_vm1, %v3217_v51, %v3221_v10 }
 0x155   :  { %7515 = vst [vmem:[#allocation117_spill] sm:$0xff] %v4805_v40 }
 0x156   :  { %7516 = vst [vmem:[#allocation118_spill] sm:$0xff] %v4809_v47  ;;  %3444 = vrot.lane.b32.xlu1 %v4622_v1, %s3810_s6 }
 0x157   :  { %7517 = vst [vmem:[#allocation119_spill] sm:$0xff] %v4813_v6  ;;  %3449 = vrot.lane.b32.xlu2 %v4787_v24, %s3797_s0 }
 0x158   :  { %7519 = vst [vmem:[#allocation120_spill] sm:$0xff] %v4819_v31  ;;  %3439 = vrot.lane.b32.xlu0 %v4789_v59, %s3801_s24  ;;  %v3235_v27 = vpop.permute.xlu1 %3234 }
 0x159   :  { %v3237_v35 = vunpack.i.h.bf16 %v3235_v27  ;;  %v3236_v51 = vunpack.i.l.bf16 %v3235_v27  ;;  %v4827_v10 = vpop.permute.xlu2 %3284  ;;  %v4829_v6 = vpop.permute.xlu0 %3229 }
 0x15a   :  { %7520 = vst [vmem:[#allocation121_spill] sm:$0xff] %v4829_v6  ;;  %v7201_v50 = vunpack.i.h.bf16 %v4829_v6  ;;  %v7199_v31 = vunpack.i.l.bf16 %v4829_v6  ;;  %v7527_v29 = vunpack.i.l.bf16 %v4827_v10 }
 0x15b   :  { %v4836_v25 = vsel %vm737_vm0, %v3236_v51, %v3237_v35  ;;  %v4840_v47 = vsel %vm737_vm0, %v3237_v35, %v3241_v11 }
 0x15c   :  { %7521 = vst [vmem:[#allocation122_spill] sm:$0xff] %v4836_v25  ;;  %v4848_v27 = vsel %vm737_vm0, %v7200_v5, %v7199_v31  ;;  %v4854_v40 = vsel %vm737_vm0, %v7201_v50, %v3236_v51  ;;  %v3468_v25 = vpack.i.bf16 %v3672_v22, %v4618_v4 }
 0x15d   :  { %7522 = vst [vmem:[#allocation123_spill] sm:$0xff] %v4840_v47 }
 0x15e   :  { %7523 = vst [vmem:[#allocation124_spill] sm:$0xff] %v4848_v27  ;;  %3459 = vrot.lane.b32.xlu1 %v4622_v1, %s3811_s7 }
 0x15f   :  { %7524 = vst [vmem:[#allocation125_spill] sm:$0xff] %v4854_v40  ;;  %3464 = vrot.lane.b32.xlu2 %v4787_v24, %s3795_s20 }
 0x160   :  { %3454 = vrot.lane.b32.xlu0 %v4789_v59, %s3806_s29  ;;  %v4862_v11 = vpop.permute.xlu1 %3249 }
 0x161   :  { %7525 = vst [vmem:[#allocation126_spill] sm:$0xff] %v4862_v11  ;;  %v7208_v31 = vunpack.i.h.bf16 %v4862_v11  ;;  %v7207_v5 = vunpack.i.l.bf16 %v4862_v11  ;;  %v4867_v51 = vpop.permute.xlu2 %3299  ;;  %v4869_v50 = vpop.permute.xlu0 %3244 }
 0x162   :  { %v3302_v1 = vunpack.i.h.bf16 %v4867_v51  ;;  %v7209_v47 = vunpack.i.h.bf16 %v4869_v50  ;;  %v3301_v4 = vunpack.i.l.bf16 %v4867_v51  ;;  %v3673_v51 = vld [vmem:[#allocation6 + $0x28] sm:$0xff]  ;;  %v7534_v37 = vunpack.i.l.bf16 %v4869_v50 }
 0x163   :  { %v4879_v35 = vsel %vm770_vm7, %v7208_v31, %v3256_v16 }
 0x164   :  { %7526 = vst [vmem:[#allocation127_spill] sm:$0xff] %v4879_v35  ;;  %v4887_v40 = vsel %vm770_vm7, %v7209_v47, %v7207_v5  ;;  %v4893_v61 = vsel %vm836_vm8, %v3302_v1, %v7527_v29  ;;  %v4909_v35 = vld [vmem:[#allocation6 + $0x30] sm:$0xff]  ;;  %v4924_v49 = vsel %vm836_vm8, %v3301_v4, %v3302_v1  ;;  %v7532_v47 = vunpack.i.h.bf16 %v4740_v53 }
 0x165   :  { %7528 = vst [vmem:[#allocation128_spill] sm:$0xff] %v4893_v61  ;;  %v4912_v32 = vpack.i.bf16 %v4909_v35, %v3673_v51 }
 0x166   :  { %3474 = vrot.lane.b32.xlu1 %v4789_v59, %s3805_s28  ;;  %7530 = vst [vmem:[#allocation129_spill] sm:$0xff] %v4924_v49 }
 0x167   :  { %3479 = vrot.lane.b32.xlu2 %v4787_v24, %s3796_s21 }
 0x168   :  { %3469 = vrot.lane.b32.xlu0 %v3468_v25, %s3812_s8  ;;  %v4902_v16 = vpop.permute.xlu1 %3264  ;;  %v7529_v25 = vunpack.i.l.bf16 %v4781_v57 }
 0x169   :  { %v7216_v29 = vunpack.i.h.bf16 %v4902_v16  ;;  %v4906_v5 = vpop.permute.xlu2 %3314  ;;  %v3260_v31 = vpop.permute.xlu0 %3259 }
 0x16a   :  { %v3262_v22 = vunpack.i.h.bf16 %v3260_v31  ;;  %v3261_v61 = vunpack.i.l.bf16 %v3260_v31 }
 0x16b   :  { %v4920_v13 = vsel %vm803_vm6, %v7216_v29, %v7529_v25  ;;  %v3316_v29 = vunpack.i.l.bf16 %v4906_v5 }
 0x16c   :  { %v4928_v31 = vsel %vm770_vm7, %v3261_v61, %v3262_v22  ;;  %v4934_v17 = vsel %vm770_vm7, %v7532_v47, %v3261_v61  ;;  %v4940_v25 = vsel %vm770_vm7, %v3262_v22, %v7534_v37  ;;  %v7220_v47 = vunpack.i.h.bf16 %v4781_v57 }
 0x16d   :  { %7531 = vst [vmem:[#allocation130_spill] sm:$0xff] %v4928_v31  ;;  %v7536_v31 = vunpack.i.h.bf16 %v4906_v5 }
 0x16e   :  { %7533 = vst [vmem:[#allocation131_spill] sm:$0xff] %v4934_v17  ;;  %3489 = vrot.lane.b32.xlu1 %v4787_v24, %s3812_s8 }
 0x16f   :  { %7535 = vst [vmem:[#allocation132_spill] sm:$0xff] %v4940_v25  ;;  %3494 = vrot.lane.b32.xlu2 %v4912_v32, %s3797_s0  ;;  %v4959_v49 = vsel %vm869_vm10, %v3316_v29, %v7536_v31  ;;  %v7542_v31 = vunpack.i.l.bf16 %v4902_v16 }
 0x170   :  { %3484 = vrot.lane.b32.xlu0 %v4789_v59, %s3807_s30  ;;  %v3280_v53 = vpop.permute.xlu1 %3279  ;;  %7537 = vst [vmem:[#allocation133_spill] sm:$0xff] %v4959_v49 }
 0x171   :  { %v3282_v37 = vunpack.i.h.bf16 %v3280_v53  ;;  %v3281_v22 = vunpack.i.l.bf16 %v3280_v53  ;;  %v4952_v25 = vpop.permute.xlu2 %3329  ;;  %v3275_v24 = vpop.permute.xlu0 %3274 }
 0x172   :  { %v3277_v17 = vunpack.i.h.bf16 %v3275_v24  ;;  %v3276_v1 = vunpack.i.l.bf16 %v3275_v24 }
 0x173   :  { %v4963_v61 = vsel %vm803_vm6, %v3281_v22, %v3282_v37  ;;  %v4983_v49 = vsel %vm803_vm6, %v3282_v37, %v7542_v31 }
 0x174   :  { %7538 = vst [vmem:[#allocation134_spill] sm:$0xff] %v4963_v61  ;;  %v4969_v53 = vsel %vm803_vm6, %v7220_v47, %v3276_v1  ;;  %v4973_v24 = vsel %vm803_vm6, %v3276_v1, %v3277_v17  ;;  %v4977_v55 = vsel %vm803_vm6, %v3277_v17, %v3281_v22 }
 0x175   :  { %7539 = vst [vmem:[#allocation135_spill] sm:$0xff] %v4969_v53 }
 0x176   :  { %7540 = vst [vmem:[#allocation136_spill] sm:$0xff] %v4973_v24  ;;  %3504 = vrot.lane.b32.xlu1 %v4912_v32, %s3795_s20 }
 0x177   :  { %7541 = vst [vmem:[#allocation137_spill] sm:$0xff] %v4977_v55  ;;  %3509 = vrot.lane.b32.xlu2 %v4789_v59, %s3798_s1  ;;  %v7222_v55 = vunpack.i.h.bf16 %v4827_v10 }
 0x178   :  { %7543 = vst [vmem:[#allocation138_spill] sm:$0xff] %v4983_v49  ;;  %3499 = vrot.lane.b32.xlu0 %v4789_v59, %s3800_s23  ;;  %v3295_v1 = vpop.permute.xlu1 %3294 }
 0x179   :  { %v3297_v47 = vunpack.i.h.bf16 %v3295_v1  ;;  %v3296_v61 = vunpack.i.l.bf16 %v3295_v1  ;;  %v4991_v17 = vpop.permute.xlu2 %3344  ;;  %v4993_v22 = vpop.permute.xlu0 %3289 }
 0x17a   :  { %7544 = vst [vmem:[#allocation139_spill] sm:$0xff] %v4993_v22  ;;  %v7223_v37 = vunpack.i.h.bf16 %v4993_v22  ;;  %v7221_v31 = vunpack.i.l.bf16 %v4993_v22  ;;  %v7589_v22 = vunpack.i.l.bf16 %v4991_v17 }
 0x17b   :  { %v5000_v49 = vsel %vm836_vm8, %v3296_v61, %v3297_v47  ;;  %v5004_v24 = vsel %vm836_vm8, %v3297_v47, %v3301_v4 }
 0x17c   :  { %7545 = vst [vmem:[#allocation140_spill] sm:$0xff] %v5000_v49  ;;  %v5012_v1 = vsel %vm836_vm8, %v7222_v55, %v7221_v31  ;;  %v5018_v53 = vsel %vm836_vm8, %v7223_v37, %v3296_v61 }
 0x17d   :  { %7546 = vst [vmem:[#allocation141_spill] sm:$0xff] %v5004_v24 }
 0x17e   :  { %7547 = vst [vmem:[#allocation142_spill] sm:$0xff] %v5018_v53  ;;  %3519 = vrot.lane.b32.xlu1 %v4789_v59, %s3799_s22  ;;  %v5035_v53 = vpack.i.bf16 %v3673_v51, %v4784_v33  ;;  %v7549_v33 = vunpack.i.l.bf16 %v4991_v17 }
 0x17f   :  { %3524 = vrot.lane.b32.xlu2 %v4789_v59, %s3803_s26 }
 0x180   :  { %3514 = vrot.lane.b32.xlu0 %v4912_v32, %s3796_s21  ;;  %v5026_v4 = vpop.permute.xlu1 %3309 }
 0x181   :  { %v7230_v47 = vunpack.i.h.bf16 %v5026_v4  ;;  %v7229_v31 = vunpack.i.l.bf16 %v5026_v4  ;;  %v3360_v55 = vpop.permute.xlu2 %3359  ;;  %v5030_v24 = vpop.permute.xlu0 %3304 }
 0x182   :  { %v3362_v37 = vunpack.i.h.bf16 %v3360_v55  ;;  %v7231_v49 = vunpack.i.h.bf16 %v5030_v24  ;;  %v3361_v23 = vunpack.i.l.bf16 %v3360_v55  ;;  %v7232_v43 = vunpack.i.l.bf16 %v5030_v24 }
 0x183   :  { %v5042_v21 = vsel %vm869_vm10, %v7230_v47, %v3316_v29 }
 0x184   :  { %7548 = vst [vmem:[#allocation143_spill] sm:$0xff] %v5042_v21  ;;  %v5050_v61 = vsel %vm869_vm10, %v7231_v49, %v7229_v31  ;;  %v5058_v51 = vsel %vm935_vm11, %v3362_v37, %v7549_v33  ;;  %v5071_v33 = vsel %vm935_vm11, %v3361_v23, %v3362_v37 }
 0x185   :  { %7550 = vst [vmem:[#allocation144_spill] sm:$0xff] %v5058_v51  ;;  %v7554_v51 = vunpack.i.h.bf16 %v4906_v5 }
 0x186   :  { %3534 = vrot.lane.b32.xlu1 %v4789_v59, %s3804_s27  ;;  %7552 = vst [vmem:[#allocation146_spill] sm:$0xff] %v5071_v33 }
 0x187   :  { %3539 = vrot.lane.b32.xlu2 %v5035_v53, %s3800_s23 }
 0x188   :  { %3529 = vrot.lane.b32.xlu0 %v4789_v59, %s3802_s25  ;;  %v5064_v29 = vpop.permute.xlu1 %3324 }
 0x189   :  { %v5066_v31 = vpop.permute.xlu2 %3374  ;;  %v7559_v33 = vunpack.i.l.bf16 %v5064_v29 }
 0x18a   :  { %7551 = vst [vmem:[#allocation145_spill] sm:$0xff] %v5066_v31  ;;  %v3320_v47 = vpop.permute.xlu0 %3319 }
 0x18b   :  { %v3322_v49 = vunpack.i.h.bf16 %v3320_v47  ;;  %v3321_v21 = vunpack.i.l.bf16 %v3320_v47 }
 0x18d   :  { %v5075_v55 = vsel %vm869_vm10, %v3321_v21, %v3322_v49  ;;  %v5081_v60 = vsel %vm869_vm10, %v7554_v51, %v3321_v21  ;;  %v5087_v47 = vsel %vm869_vm10, %v3322_v49, %v7232_v43  ;;  %v7236_v21 = vunpack.i.h.bf16 %v4952_v25 }
 0x18e   :  { %7553 = vst [vmem:[#allocation147_spill] sm:$0xff] %v5075_v55  ;;  %3549 = vrot.lane.b32.xlu1 %v5035_v53, %s3798_s1 }
 0x18f   :  { %7555 = vst [vmem:[#allocation148_spill] sm:$0xff] %v5081_v60  ;;  %3554 = vrot.lane.b32.xlu2 %v4789_v59, %s3808_s4 }
 0x190   :  { %7556 = vst [vmem:[#allocation149_spill] sm:$0xff] %v5087_v47  ;;  %3544 = vrot.lane.b32.xlu0 %v4789_v59, %s3809_s5  ;;  %v3340_v5 = vpop.permute.xlu1 %3339 }
 0x191   :  { %v3342_v51 = vunpack.i.h.bf16 %v3340_v5  ;;  %v3341_v60 = vunpack.i.l.bf16 %v3340_v5  ;;  %v5097_v55 = vpop.permute.xlu2 %3389 }
 0x192   :  { %7557 = vst [vmem:[#allocation150_spill] sm:$0xff] %v5097_v55  ;;  %v3335_v49 = vpop.permute.xlu0 %3334 }
 0x193   :  { %v3337_v43 = vunpack.i.h.bf16 %v3335_v49  ;;  %v3336_v47 = vunpack.i.l.bf16 %v3335_v49  ;;  %v5102_v37 = vsel %vm902_vm9, %v3341_v60, %v3342_v51  ;;  %v5108_v56 = vsel %vm902_vm9, %v3342_v51, %v7559_v33 }
 0x194   :  { %7558 = vst [vmem:[#allocation151_spill] sm:$0xff] %v5102_v37  ;;  %v7238_v37 = vunpack.i.h.bf16 %v4991_v17 }
 0x195   :  { %7560 = vst [vmem:[#allocation152_spill] sm:$0xff] %v5108_v56  ;;  %v5114_v5 = vsel %vm902_vm9, %v7236_v21, %v3336_v47  ;;  %v5118_v49 = vsel %vm902_vm9, %v3336_v47, %v3337_v43  ;;  %v5122_v2 = vsel %vm902_vm9, %v3337_v43, %v3341_v60 }
 0x196   :  { %7561 = vst [vmem:[#allocation153_spill] sm:$0xff] %v5114_v5  ;;  %3564 = vrot.lane.b32.xlu1 %v4789_v59, %s3810_s6 }
 0x197   :  { %7562 = vst [vmem:[#allocation154_spill] sm:$0xff] %v5118_v49  ;;  %3569 = vrot.lane.b32.xlu2 %v5035_v53, %s3803_s26 }
 0x198   :  { %7563 = vst [vmem:[#allocation155_spill] sm:$0xff] %v5122_v2  ;;  %3559 = vrot.lane.b32.xlu0 %v5035_v53, %s3799_s22  ;;  %v3355_v33 = vpop.permute.xlu1 %3354 }
 0x199   :  { %v3357_v51 = vunpack.i.h.bf16 %v3355_v33  ;;  %v3356_v21 = vunpack.i.l.bf16 %v3355_v33  ;;  %v5130_v56 = vpop.permute.xlu2 %3404 }
 0x19a   :  { %7564 = vst [vmem:[#allocation156_spill] sm:$0xff] %v5130_v56  ;;  %v5132_v47 = vpop.permute.xlu0 %3349  ;;  %v7266_v34 = vunpack.i.h.bf16 %v5130_v56  ;;  %v7264_v46 = vunpack.i.l.bf16 %v5130_v56  ;;  %v7588_v56 = vunpack.i.h.bf16 %v4991_v17 }
 0x19b   :  { %v7239_v60 = vunpack.i.h.bf16 %v5132_v47  ;;  %v7237_v43 = vunpack.i.l.bf16 %v5132_v47  ;;  %v5139_v2 = vsel %vm935_vm11, %v3356_v21, %v3357_v51  ;;  %v5157_v5 = vsel %vm935_vm11, %v3357_v51, %v3361_v23 }
 0x19c   :  { %7565 = vst [vmem:[#allocation157_spill] sm:$0xff] %v5139_v2  ;;  %v942_v27 = vsel %vm935_vm11, %v7589_v22, %v7588_v56  ;;  %v7592_v56 = vunpack.i.l.bf16 %v5064_v29 }
 0x19d   :  { %v5147_v33 = vsel %vm935_vm11, %v7238_v37, %v7237_v43  ;;  %v5153_v49 = vsel %vm935_vm11, %v7239_v60, %v3356_v21  ;;  %7567 = vst [vmem:[#allocation159_spill] sm:$0xff] %v5157_v5  ;;  %v7252_v5 = vunpack.i.l.bf16 %v5066_v31 }
 0x19e   :  { %7566 = vst [vmem:[#allocation158_spill] sm:$0xff] %v5153_v49  ;;  %3579 = vrot.lane.b32.xlu1 %v5035_v53, %s3802_s25 }
 0x19f   :  { %3584 = vrot.lane.b32.xlu2 %v5035_v53, %s3801_s24 }
 0x1a0   :  { %3574 = vrot.lane.b32.xlu0 %v4789_v59, %s3811_s7  ;;  %v5165_v43 = vpop.permute.xlu1 %3369  ;;  %v7255_v59 = vunpack.i.h.bf16 %v5066_v31 }
 0x1a1   :  { %7568 = vst [vmem:[#allocation160_spill] sm:$0xff] %v5165_v43  ;;  %v7246_v37 = vunpack.i.h.bf16 %v5165_v43  ;;  %v5169_v60 = vpop.permute.xlu2 %3419  ;;  %v7571_v49 = vunpack.i.l.bf16 %v5165_v43 }
 0x1a2   :  { %7569 = vst [vmem:[#allocation161_spill] sm:$0xff] %v5169_v60  ;;  %v5171_v2 = vpop.permute.xlu0 %3364 }
 0x1a3   :  { %7570 = vst [vmem:[#allocation162_spill] sm:$0xff] %v5171_v2  ;;  %v7247_v23 = vunpack.i.h.bf16 %v5171_v2  ;;  %v7245_v51 = vunpack.i.l.bf16 %v5171_v2  ;;  %v1493_v6 = vsel %vm7253_vm4, %v7571_v49, %v7246_v37  ;;  %vm7262_vm4 = vcmp.lt.s32.totalorder %v3901_v14, 14 }
 0x1a5   :  { %v1526_v21 = vsel %vm7254_vm14, %v7245_v51, %v7247_v23  ;;  %vm1067_vm14 = vcmp.lt.s32.totalorder %v3901_v14, 37 }
 0x1a6   :  { %2010 = vmatpush.msra.mxu2 %v1526_v21  ;;  %3594 = vrot.lane.b32.xlu1 %v5035_v53, %s3806_s29  ;;  %v1460_v21 = vsel %vm7251_vm5, %v7252_v5, %v7255_v59  ;;  %vm7261_vm5 = vcmp.lt.s32.totalorder %v3901_v14, 13 }
 0x1a7   :  { %3599 = vrot.lane.b32.xlu2 %v5035_v53, %s3809_s5 }
 0x1a8   :  { %3589 = vrot.lane.b32.xlu0 %v5035_v53, %s3804_s27  ;;  %2011 = vmatpush.msra.mxu2 %v1493_v6  ;;  %v5204_v51 = vpop.permute.xlu1 %3384 }
 0x1a9   :  { %7572 = vst [vmem:[#allocation163_spill] sm:$0xff] %v5204_v51  ;;  %v5206_v49 = vpop.permute.xlu2 %3434  ;;  %v7578_v18 = vunpack.i.h.bf16 %v5204_v51  ;;  %v7579_v8 = vunpack.i.l.bf16 %v5204_v51 }
 0x1aa   :  { %7573 = vst [vmem:[#allocation164_spill] sm:$0xff] %v5206_v49  ;;  %v5208_v37 = vpop.permute.xlu0 %3379  ;;  %2012 = vmatpush.msra.mxu2 %v1460_v21 }
 0x1ab   :  { %7574 = vst [vmem:[#allocation165_spill] sm:$0xff] %v5208_v37  ;;  %v7259_v12 = vunpack.i.h.bf16 %v5208_v37  ;;  %v7577_v21 = vunpack.i.l.bf16 %v5208_v37  ;;  %v1371_v59 = vsel %vm7261_vm5, %v7579_v8, %v7578_v18  ;;  %vm7267_vm5 = vcmp.lt.s32.totalorder %v3901_v14, 16 }
 0x1ac   :  { %2013 = vmatpush.msra.mxu2 %v4106_v7  ;;  %v7582_v18 = vunpack.i.h.bf16 %v5097_v55  ;;  %v7583_v8 = vunpack.i.l.bf16 %v5097_v55 }
 0x1ad   :  { %v1404_v6 = vsel %vm7260_vm3, %v7577_v21, %v7259_v12  ;;  %vm7271_vm3 = vcmp.lt.s32.totalorder %v3901_v14, 15 }
 0x1ae   :  { %2014 = vmatpush.msra.mxu2 %v4060_v63  ;;  %3609 = vrot.lane.b32.xlu1 %v5035_v53, %s3808_s4 }
 0x1af   :  { %3614 = vrot.lane.b32.xlu2 %v5035_v53, %s3807_s30 }
 0x1b0   :  { %3604 = vrot.lane.b32.xlu0 %v5035_v53, %s3805_s28  ;;  %2015 = vmatpush.msra.mxu2 %v4030_v54  ;;  %v5227_v5 = vpop.permute.xlu1 %3399 }
 0x1b1   :  { %7575 = vst [vmem:[#allocation166_spill] sm:$0xff] %v5227_v5  ;;  %v5233_v23 = vpop.permute.xlu2 %3449  ;;  %v7580_v54 = vunpack.i.h.bf16 %v5227_v5  ;;  %v7581_v21 = vunpack.i.l.bf16 %v5227_v5 }
 0x1b2   :  { %v5235_v11 = vpop.permute.xlu0 %3394  ;;  %2016 = vmatpush.msra.mxu2 %v1404_v6  ;;  %v1338_v6 = vsel %vm7262_vm4, %v7583_v8, %v7582_v18  ;;  %vm7311_vm4 = vcmp.lt.s32.totalorder %v3901_v14, 38 }
 0x1b3   :  { %7576 = vst [vmem:[#allocation167_spill] sm:$0xff] %v5235_v11  ;;  %v7268_v57 = vunpack.i.h.bf16 %v5235_v11  ;;  %v7265_v0 = vunpack.i.l.bf16 %v5235_v11  ;;  %v1074_v12 = vsel %vm1067_vm14, %v7581_v21, %v7580_v54 }
 0x1b4   :  { %2017 = vmatpush.msra.mxu2 %v1371_v59  ;;  %1990 = vmatpush.msra.mxu1 %v1074_v12  ;;  %v1272_v12 = vsel %vm7267_vm5, %v7264_v46, %v7266_v34  ;;  %vm7277_vm5 = vcmp.lt.s32.totalorder %v3901_v14, 39 }
 0x1b5   :  { %v1305_v54 = vsel %vm7271_vm3, %v7265_v0, %v7268_v57  ;;  %v5299_v0 = vld [vmem:[#allocation6 + $0x38] sm:$0xff]  ;;  %vm7298_vm3 = vcmp.lt.s32.totalorder %v3901_v14, 18 }
 0x1b6   :  { %2018 = vmatpush.msra.mxu2 %v1338_v6  ;;  %3624 = vrot.lane.b32.xlu1 %v5035_v53, %s3811_s7  ;;  %v3638_v34 = vpack.i.bf16 %v4616_v44, %v5299_v0 }
 0x1b7   :  { %3629 = vrot.lane.b32.xlu2 %v4912_v32, %s3812_s8  ;;  %v7275_v32 = vunpack.i.h.bf16 %v5169_v60 }
 0x1b8   :  { %3619 = vrot.lane.b32.xlu0 %v5035_v53, %s3810_s6  ;;  %2019 = vmatpush.msra.mxu2 %v1305_v54  ;;  %v5285_v59 = vpop.permute.xlu1 %3414  ;;  %v7272_v53 = vunpack.i.l.bf16 %v5169_v60 }
 0x1b9   :  { %7584 = vst [vmem:[#allocation168_spill] sm:$0xff] %v5285_v59  ;;  %v7274_v21 = vunpack.i.h.bf16 %v5285_v59  ;;  %v7269_v18 = vunpack.i.l.bf16 %v5285_v59  ;;  %v5293_v8 = vpop.permute.xlu2 %3464  ;;  %v7289_v59 = vunpack.i.h.bf16 %v5064_v29 }
 0x1ba   :  { %v5295_v6 = vpop.permute.xlu0 %3409  ;;  %2020 = vmatpush.msra.mxu2 %v1272_v12  ;;  %v1008_v44 = vsel %vm7277_vm5, %v7272_v53, %v7275_v32  ;;  %vm7286_vm5 = vcmp.lt.s32.totalorder %v3901_v14, 34 }
 0x1bb   :  { %7585 = vst [vmem:[#allocation169_spill] sm:$0xff] %v5295_v6  ;;  %v7276_v54 = vunpack.i.h.bf16 %v5295_v6  ;;  %v7273_v46 = vunpack.i.l.bf16 %v5295_v6  ;;  %v1239_v57 = vsel %vm7270_vm15, %v7269_v18, %v7274_v21  ;;  %vm968_vm15 = vcmp.lt.s32.totalorder %v3901_v14, 40 }
 0x1bc   :  { %2021 = vmatpush.msra.mxu2 %v1239_v57  ;;  %v909_v17 = vsel %vm902_vm9, %v7592_v56, %v7289_v59  ;;  %v7597_v59 = vunpack.i.l.bf16 %v4827_v10 }
 0x1bd   :  { %v1041_v12 = vsel %vm7311_vm4, %v7273_v46, %v7276_v54  ;;  %v3643_v54 = vpack.i.bf16 %v5299_v0, %v4909_v35 }
 0x1be   :  { %1991 = vmatpush.msra.mxu1 %v1041_v12  ;;  %3639 = vrot.lane.b32.xlu1 %v3638_v34, %s3795_s20 }
 0x1bf   :  { %1452 = vrot.lane.b32.xlu2 %v5299_v0, %s3796_s21 }
 0x1c0   :  { %3634 = vrot.lane.b32.xlu0 %v3638_v34, %s3797_s0  ;;  %v5326_v18 = vpop.permute.xlu1 %3429  ;;  %1992 = vmatpush.msra.mxu1 %v1008_v44 }
 0x1c1   :  { %7586 = vst [vmem:[#allocation170_spill] sm:$0xff] %v5326_v18  ;;  %v7285_v53 = vunpack.i.h.bf16 %v5326_v18  ;;  %v7284_v46 = vunpack.i.l.bf16 %v5326_v18  ;;  %v5334_v21 = vpop.permute.xlu2 %3479 }
 0x1c2   :  { %v5336_v32 = vpop.permute.xlu0 %3424 }
 0x1c3   :  { %7587 = vst [vmem:[#allocation171_spill] sm:$0xff] %v5336_v32  ;;  %v7288_v34 = vunpack.i.h.bf16 %v5336_v32  ;;  %v7287_v44 = vunpack.i.l.bf16 %v5336_v32  ;;  %v975_v12 = vsel %vm968_vm15, %v7284_v46, %v7285_v53  ;;  %v7590_v46 = vunpack.i.h.bf16 %v5206_v49 }
 0x1c4   :  { %1993 = vmatpush.msra.mxu1 %v975_v12  ;;  %v7591_v12 = vunpack.i.l.bf16 %v5206_v49 }
 0x1c5   :  { %v1206_v57 = vsel %vm7298_vm3, %v7287_v44, %v7288_v34  ;;  %v7594_v44 = vunpack.i.h.bf16 %v5030_v24  ;;  %v7595_v34 = vunpack.i.l.bf16 %v5030_v24  ;;  %vm7619_vm3 = vcmp.lt.s32.totalorder %v3901_v14, 82 }
 0x1c6   :  { %2022 = vmatpush.msra.mxu2 %v1206_v57  ;;  %v1173_v53 = vsel %vm7286_vm5, %v7591_v12, %v7590_v46  ;;  %3644 = vrot.lane.b32.xlu1 %v3643_v54, %s3801_s24  ;;  %vm7292_vm5 = vcmp.lt.s32.totalorder %v3901_v14, 35 }
 0x1c7   :  { %1994 = vmatpush.msra.mxu1 %v942_v27  ;;  %1360 = vrot.lane.b32.xlu2 %v4909_v35, %s3798_s1  ;;  %v876_v56 = vsel %vm869_vm10, %v7595_v34, %v7594_v44  ;;  %v7599_v34 = vunpack.i.h.bf16 %v5227_v5 }
 0x1c8   :  { %1393 = vrot.lane.b32.xlu0 %v4909_v35, %s3800_s23  ;;  %v5379_v22 = vpop.permute.xlu1 %3444  ;;  %2023 = vmatpush.msra.mxu2 %v1173_v53  ;;  %v7596_v53 = vunpack.i.h.bf16 %v4827_v10  ;;  %v7600_v10 = vunpack.i.h.bf16 %v4902_v16 }
 0x1c9   :  { %7593 = vst [vmem:[#allocation172_spill] sm:$0xff] %v5379_v22  ;;  %1995 = vmatpush.msra.mxu1 %v909_v17  ;;  %v7293_v46 = vunpack.i.h.bf16 %v5379_v22  ;;  %v5384_v57 = vpop.permute.xlu2 %3494  ;;  %v7598_v49 = vunpack.i.l.bf16 %v5379_v22 }
 0x1ca   :  { %v5386_v12 = vpop.permute.xlu0 %3439  ;;  %v843_v27 = vsel %vm836_vm8, %v7597_v59, %v7596_v53  ;;  %v7601_v59 = vunpack.i.l.bf16 %v4902_v16 }
 0x1cb   :  { %v7294_v17 = vunpack.i.l.bf16 %v5386_v12  ;;  %1996 = vmatpush.msra.mxu1 %v876_v56  ;;  %v1140_v24 = vsel %vm7292_vm5, %v7598_v49, %v7293_v46  ;;  %v7602_v49 = vunpack.i.h.bf16 %v4869_v50  ;;  %vm7295_vm5 = vcmp.lt.s32.totalorder %v3901_v14, 36 }
 0x1cc   :  { %2024 = vmatpush.msra.mxu2 %v1140_v24  ;;  %v810_v56 = vsel %vm803_vm6, %v7601_v59, %v7600_v10  ;;  %v7605_v59 = vunpack.i.h.bf16 %v4661_v3  ;;  %v7608_v46 = vunpack.i.l.bf16 %v4736_v30 }
 0x1cd   :  { %1997 = vmatpush.msra.mxu1 %v843_v27  ;;  %v1073_v44 = vsel %vm1067_vm14, %v7599_v34, %v7294_v17  ;;  %v7603_v27 = vunpack.i.l.bf16 %v4869_v50  ;;  %v7606_v50 = vunpack.i.l.bf16 %v4661_v3 }
 0x1ce   :  { %2070 = vmatpush.msrb.mxu0 %v1073_v44  ;;  %1327 = vrot.lane.b32.xlu1 %v4909_v35, %s3799_s22 }
 0x1cf   :  { %1998 = vmatpush.msra.mxu1 %v810_v56  ;;  %3654 = vrot.lane.b32.xlu2 %v3643_v54, %s3805_s28  ;;  %v777_v53 = vsel %vm770_vm7, %v7603_v27, %v7602_v49  ;;  %v744_v56 = vsel %vm737_vm0, %v7606_v50, %v7605_v59  ;;  %v5445_v27 = vld [vmem:[#allocation3 + $0x10] sm:$0xff]  ;;  %v7609_v59 = vunpack.i.h.bf16 %v5295_v6  ;;  %v7711_v6 = vld [vmem:[#allocation63_spill] sm:$0xff] }
 0x1d0   :  { %3649 = vrot.lane.b32.xlu0 %v3643_v54, %s3806_s29  ;;  %v5429_v24 = vpop.permute.xlu1 %3459 }
 0x1d1   :  { %7604 = vst [vmem:[#allocation173_spill] sm:$0xff] %v5429_v24  ;;  %1999 = vmatpush.msra.mxu1 %v777_v53  ;;  %v7297_v16 = vunpack.i.h.bf16 %v5429_v24  ;;  %v7296_v34 = vunpack.i.l.bf16 %v5429_v24  ;;  %v5434_v44 = vpop.permute.xlu2 %3509  ;;  %v7607_v53 = vunpack.i.h.bf16 %v4736_v30  ;;  %v7610_v30 = vunpack.i.h.bf16 %v4703_v45 }
 0x1d2   :  { %v5436_v10 = vpop.permute.xlu0 %3454 }
 0x1d3   :  { %v7299_v49 = vunpack.i.l.bf16 %v5436_v10  ;;  %2000 = vmatpush.msra.mxu1 %v744_v56  ;;  %v711_v17 = vsel %vm704_vm1, %v7608_v46, %v7607_v53  ;;  %v1107_v3 = vsel %vm7295_vm5, %v7296_v34, %v7297_v16  ;;  %v7611_v46 = vunpack.i.l.bf16 %v4703_v45 }
 0x1d4   :  { %2025 = vmatpush.msra.mxu2 %v1107_v3  ;;  %v7613_v53 = vunpack.i.l.bf16 %v4450_v15  ;;  %v7303_v3 = vunpack.i.l.bf16 %v5233_v23  ;;  %vm1553_vm5 = vcmp.lt.s32.totalorder %v3901_v14, 118  ;;  %v7617_v34 = vunpack.i.h.bf16 %v4519_v28 }
 0x1d5   :  { %2001 = vmatpush.msra.mxu1 %v711_v17  ;;  %v1040_v50 = vsel %vm7311_vm4, %v7609_v59, %v7299_v49  ;;  %v678_v56 = vsel %vm671_vm2, %v7611_v46, %v7610_v30  ;;  %2026 = vmatmul.f32.vlgmr.msra.gmra.mxu2 %v5445_v27  ;;  %v7612_v17 = vunpack.i.h.bf16 %v4450_v15  ;;  %v7615_v46 = vunpack.i.h.bf16 %v4569_v19 }
 0x1d6   :  { %2071 = vmatpush.msrb.mxu0 %v1040_v50  ;;  %3659 = vrot.lane.b32.xlu1 %v3643_v54, %s3807_s30  ;;  %v7618_v16 = vunpack.i.l.bf16 %v4519_v28  ;;  %v7622_v28 = vunpack.i.h.bf16 %v5171_v2  ;;  %v7809_v2 = vunpack.i.h.bf16 %v5386_v12 }
 0x1d7   :  { %2002 = vmatpush.msra.mxu1 %v678_v56  ;;  %1261 = vrot.lane.b32.xlu2 %v4909_v35, %s3802_s25  ;;  %v645_v45 = vsel %vm638_vm12, %v7613_v53, %v7612_v17  ;;  %v7616_v56 = vunpack.i.l.bf16 %v4569_v19  ;;  %v7620_v19 = vunpack.i.h.bf16 %v5169_v60 }
 0x1d8   :  { %1294 = vrot.lane.b32.xlu0 %v4909_v35, %s3803_s26  ;;  %v5484_v59 = vpop.permute.xlu1 %3474  ;;  %v579_v49 = vsel %vm7619_vm3, %v7618_v16, %v7617_v34  ;;  %vm7623_vm3 = vcmp.lt.s32.totalorder %v3901_v14, 119  ;;  %v7305_v34 = vunpack.i.l.bf16 %v5334_v21 }
 0x1d9   :  { %2003 = vmatpush.msra.mxu1 %v645_v45  ;;  %v7304_v54 = vunpack.i.l.bf16 %v5484_v59  ;;  %v5487_v50 = vpop.permute.xlu2 %3524  ;;  %v612_v15 = vsel %vm7300_vm13, %v7616_v56, %v7615_v46  ;;  %v7302_v45 = vunpack.i.l.bf16 %v5293_v8  ;;  %vm7621_vm13 = vcmp.lt.s32.totalorder %v3901_v14, 39 }
 0x1da   :  { %v5489_v30 = vpop.permute.xlu0 %3469  ;;  %v1525_v16 = vsel %vm7623_vm3, %v7622_v28, %v7303_v3  ;;  %vm1966_vm3 = vcmask 64512  }
 0x1db   :  { %7614 = vst [vmem:[#allocation174_spill] sm:$0xff] %v5489_v30  ;;  %v3472_v17 = vunpack.i.h.bf16 %v5489_v30  ;;  %v7301_v53 = vunpack.i.l.bf16 %v5489_v30  ;;  %2004 = vmatpush.msra.mxu1 %v612_v15  ;;  %v1007_v46 = vsel %vm7621_vm13, %v7620_v19, %v7304_v54  ;;  %v7624_v15 = vunpack.i.h.bf16 %v5165_v43  ;;  %v5562_v54 = vld [vmem:[#allocation3 + $0x8] sm:$0xff] }
 0x1dc   :  { %2072 = vmatpush.msrb.mxu0 %v1007_v46  ;;  %vm7625_vm13 = vcmp.lt.s32.totalorder %v3901_v14, 120  ;;  %v5541_v46 = vld [vmem:[#allocation3 + $0x18] sm:$0xff]  ;;  %v7639_v30 = vunpack.i.h.bf16 %v5064_v29 }
 0x1dd   :  { %2005 = vmatpush.msra.mxu1 %v579_v49  ;;  %v1559_v56 = vsel %vm1553_vm5, %v7301_v53, %v3472_v17  ;;  %v7306_v49 = vunpack.i.h.bf16 %v4096_v62  ;;  %v1492_v19 = vsel %vm7625_vm13, %v7624_v15, %v7302_v45  ;;  %v7626_v15 = vunpack.i.h.bf16 %v5066_v31  ;;  %v7794_v31 = vld [vmem:[#allocation19_spill] sm:$0xff] }
 0x1de   :  { %2045 = vmatpush.msra.mxu3 %v1559_v56  ;;  %1195 = vrot.lane.b32.xlu1 %v4909_v35, %s3809_s5  ;;  %vm7627_vm13 = vcmp.lt.s32.totalorder %v3901_v14, 121  ;;  %v7308_v45 = vunpack.i.h.bf16 %v5386_v12  ;;  %v7628_v56 = vunpack.i.l.bf16 %v4096_v62 }
 0x1df   :  { %2090 = vmatpush.msrb.mxu1 %v1525_v16  ;;  %1162 = vrot.lane.b32.xlu2 %v4909_v35, %s3808_s4 }
 0x1e0   :  { %2050 = vmatpush.msrb.mxu3 %v4481_v42  ;;  %1228 = vrot.lane.b32.xlu0 %v4909_v35, %s3804_s27  ;;  %v5539_v42 = vpop.permute.xlu1 %3489 }
 0x1e1   :  { %2091 = vmatpush.msrb.mxu1 %v1492_v19  ;;  %v7307_v28 = vunpack.i.l.bf16 %v5539_v42  ;;  %v5545_v16 = vpop.permute.xlu2 %3539  ;;  %2764 = vmatmul.msk.f32.vlgmr.msra.gmra.mxu3 %vm1966_vm3, %v5541_v46  ;;  %v5557_v19 = vld [vmem:[#allocation3] sm:$0xff] }
 0x1e2   :  { %2051 = vmatpush.msrb.mxu3 %v4352_v9  ;;  %v5547_v53 = vpop.permute.xlu0 %3484  ;;  %v1459_v9 = vsel %vm7627_vm13, %v7626_v15, %v7305_v34  ;;  %vm7629_vm13 = vcmp.lt.s32.totalorder %v3901_v14, 122  ;;  %1986 = vmatmul.f32.vlgmr.msra.gmra.mxu0 %v5557_v19 }
 0x1e3   :  { %v3486_v3 = vunpack.i.l.bf16 %v5547_v53  ;;  %2092 = vmatpush.msrb.mxu1 %v1459_v9  ;;  %v5570_v15 = vsel %vm7629_vm13, %v7628_v56, %v7306_v49  ;;  %v1558_v34 = vsel %vm1553_vm5, %v3472_v17, %v7307_v28  ;;  %v7631_v49 = vunpack.i.h.bf16 %v3978_v38 }
 0x1e4   :  { %2052 = vmatpush.msrb.mxu3 %v4331_v41  ;;  %2006 = vmatmul.f32.vlgmr.msra.gmra.mxu1 %v5562_v54  ;;  %v7630_v41 = vunpack.i.h.bf16 %v5326_v18  ;;  %v7632_v17 = vunpack.i.l.bf16 %v3978_v38  ;;  %vm7633_vm13 = vcmp.lt.s32.totalorder %v3901_v14, 123 }
 0x1e5   :  { %2093 = vmatpush.msrb.mxu1 %v5570_v15  ;;  %2125 = vmatpush.msrb.mxu2 %v1558_v34 }
 0x1e6   :  { %2053 = vmatpush.msrb.mxu3 %v4309_v39  ;;  %v974_v9 = vsel %vm968_vm15, %v7630_v41, %v3486_v3  ;;  %v5591_v28 = vsel %vm7633_vm13, %v7632_v17, %v7631_v49  ;;  %v3331_v39 = vunpack.i.l.bf16 %v4952_v25  ;;  %v7634_v41 = vunpack.i.l.bf16 %v5386_v12  ;;  %1129 = vrot.lane.b32.xlu1 %v4909_v35, %s3810_s6 }
 0x1e7   :  { %2073 = vmatpush.msrb.mxu0 %v974_v9  ;;  %2094 = vmatpush.msrb.mxu1 %v5591_v28  ;;  %v7310_v9 = vunpack.i.h.bf16 %v4013_v48  ;;  %vm7636_vm13 = vcmp.lt.s32.totalorder %v3901_v14, 124  ;;  %v7813_v12 = vunpack.i.h.bf16 %v5436_v10 }
 0x1e8   :  { %2054 = vmatpush.msrb.mxu3 %v4258_v26  ;;  %v1072_v34 = vsel %vm1067_vm14, %v7634_v41, %v7308_v45  ;;  %1096 = vrot.lane.b32.xlu2 %v4909_v35, %s3811_s7  ;;  %v5608_v26 = vld [vmem:[#allocation6] sm:$0xff]  ;;  %v5612_v49 = vpop.permute.xlu1 %3504  ;;  %v7635_v41 = vunpack.i.l.bf16 %v4013_v48  ;;  %v7638_v45 = vunpack.i.l.bf16 %v5436_v10 }
 0x1e9   :  { %2150 = vmatpush.msra.mxu2 %v1072_v34  ;;  %1438 = vrot.lane.b32.xlu0 %v5608_v26, %s3796_s21  ;;  %v7637_v34 = vunpack.i.h.bf16 %v5436_v10  ;;  %v5631_v17 = vpop.permute.xlu2 %3554 }
 0x1ea   :  { %2074 = vmatpush.msrb.mxu0 %v5147_v33  ;;  %2055 = vmatpush.msrb.mxu3 %v4228_v52  ;;  %v5623_v35 = vsel %vm7636_vm13, %v7635_v41, %v7310_v9  ;;  %v5633_v33 = vpop.permute.xlu0 %3499  ;;  %v908_v41 = vsel %vm902_vm9, %v7639_v30, %v3331_v39  ;;  %v7640_v9 = vunpack.i.h.bf16 %v5484_v59  ;;  %vm7642_vm13 = vcmp.lt.s32.totalorder %v3901_v14, 39 }
 0x1eb   :  { %v1039_v56 = vsel %vm7311_vm4, %v7638_v45, %v7637_v34  ;;  %2095 = vmatpush.msrb.mxu1 %v5623_v35  ;;  %v7316_v52 = vunpack.i.l.bf16 %v5633_v33  ;;  %v7641_v45 = vunpack.i.l.bf16 %v5484_v59  ;;  %vm7644_vm4 = vcmp.lt.s32.totalorder %v3901_v14, 12  ;;  %2765 = vmatmul.msk.f32.vlgmr.msrb.gmra.mxu2 %vm1966_vm3, %v5541_v46 }
 0x1ec   :  { %2151 = vmatpush.msra.mxu2 %v1039_v56  ;;  %2075 = vmatpush.msrb.mxu0 %v908_v41  ;;  %v7643_v56 = vunpack.i.h.bf16 %v5208_v37  ;;  %v7315_v30 = vunpack.i.l.bf16 %v5434_v44 }
 0x1ed   :  { %2056 = vmatpush.msrb.mxu3 %v4205_v20  ;;  %v1006_v34 = vsel %vm7642_vm13, %v7641_v45, %v7640_v9  ;;  %v7645_v20 = vunpack.i.h.bf16 %v5547_v53  ;;  %v7646_v9 = vunpack.i.h.bf16 %v5132_v47  ;;  %v7647_v45 = vunpack.i.l.bf16 %v5132_v47 }
 0x1ee   :  { %2152 = vmatpush.msra.mxu2 %v1006_v34  ;;  %v1403_v29 = vsel %vm7644_vm4, %v7643_v56, %v7316_v52  ;;  %2076 = vmatpush.msrb.mxu0 %v5050_v61  ;;  %vm7649_vm4 = vcmp.lt.s32.totalorder %v3901_v14, 13  ;;  %v7695_v52 = vld [vmem:[#allocation58_spill] sm:$0xff]  ;;  %vm7721_vm13 = vcmp.lt.s32.totalorder %v3901_v14, 101 }
 0x1ef   :  { %2057 = vmatpush.msrb.mxu3 %v4159_v58  ;;  %v973_v41 = vsel %vm968_vm15, %v3486_v3, %v7645_v20  ;;  %2096 = vmatpush.msrb.mxu1 %v1403_v29  ;;  %v940_v61 = vsel %vm935_vm11, %v7647_v45, %v7646_v9  ;;  %v7312_v3 = vunpack.i.l.bf16 %v5487_v50  ;;  %v7650_v29 = vunpack.i.h.bf16 %v4952_v25 }
 0x1f0   :  { %2153 = vmatpush.msra.mxu2 %v973_v41  ;;  %2077 = vmatpush.msrb.mxu0 %v5012_v1  ;;  %v5671_v58 = vpop.permute.xlu1 %3519  ;;  %v7651_v41 = vunpack.i.h.bf16 %v5097_v55  ;;  %vm7652_vm11 = vcmp.lt.s32.totalorder %v3901_v14, 14  ;;  %v7654_v45 = vunpack.i.l.bf16 %v5026_v4 }
 0x1f1   :  { %2058 = vmatpush.msrb.mxu3 %v4129_v36  ;;  %1395 = vrot.lane.b32.xlu1 %v5299_v0, %s3800_s23  ;;  %v7648_v36 = vunpack.i.h.bf16 %v5204_v51  ;;  %v7314_v47 = vunpack.i.l.bf16 %v5671_v58  ;;  %v5685_v34 = vpop.permute.xlu2 %3569  ;;  %v907_v20 = vsel %vm902_vm9, %v3331_v39, %v7650_v29  ;;  %vm7656_vm9 = vcmp.lt.s32.totalorder %v3901_v14, 15  ;;  %v7661_v29 = vld [vmem:[#allocation29_spill] sm:$0xff] }
 0x1f2   :  { %2154 = vmatpush.msra.mxu2 %v940_v61  ;;  %1362 = vrot.lane.b32.xlu2 %v5299_v0, %s3798_s1  ;;  %v5687_v56 = vpop.permute.xlu0 %3514  ;;  %v7657_v61 = vld [vmem:[#allocation124_spill] sm:$0xff] }
 0x1f3   :  { %1551 = vrot.lane.b32.xlu0 %v5299_v0, %s3812_s8  ;;  %v1370_v1 = vsel %vm7649_vm4, %v7648_v36, %v7315_v30  ;;  %2078 = vmatpush.msrb.mxu0 %v4920_v13  ;;  %v1337_v9 = vsel %vm7652_vm11, %v7651_v41, %v7314_v47  ;;  %v7653_v13 = vunpack.i.h.bf16 %v5026_v4  ;;  %v7684_v30 = vld [vmem:[#allocation80_spill] sm:$0xff]  ;;  %vm7726_vm4 = vcmp.lt.s32.totalorder %v3901_v14, 82 }
 0x1f4   :  { %2097 = vmatpush.msrb.mxu1 %v1370_v1  ;;  %2059 = vmatpush.msrb.mxu3 %v4106_v7  ;;  %v7655_v7 = vunpack.i.h.bf16 %v5235_v11  ;;  %vm7729_vm11 = vcmp.lt.s32.totalorder %v3901_v14, 122 }
 0x1f5   :  { %2155 = vmatpush.msra.mxu2 %v907_v20  ;;  %2079 = vmatpush.msrb.mxu0 %v4887_v40  ;;  %v874_v25 = vsel %vm869_vm10, %v7654_v45, %v7653_v13  ;;  %v7658_v40 = vld [vmem:[#allocation139_spill] sm:$0xff]  ;;  %v7663_v20 = vld [vmem:[#allocation114_spill] sm:$0xff]  ;;  %vm7715_vm10 = vcmp.lt.s32.totalorder %v3901_v14, 81 }
 0x1f6   :  { %2098 = vmatpush.msrb.mxu1 %v1337_v9  ;;  %2060 = vmatpush.msrb.mxu3 %v4060_v63  ;;  %v1304_v39 = vsel %vm7656_vm9, %v7655_v7, %v7312_v3  ;;  %v7659_v36 = vunpack.i.h.bf16 %v7658_v40  ;;  %v7660_v4 = vunpack.i.l.bf16 %v7658_v40  ;;  %v7662_v63 = vld [vmem:[#allocation109_spill] sm:$0xff]  ;;  %v7664_v41 = vunpack.i.h.bf16 %v7663_v20  ;;  %v7667_v40 = vld [vmem:[#allocation107_spill] sm:$0xff] }
 0x1f7   :  { %2156 = vmatpush.msra.mxu2 %v874_v25  ;;  %2080 = vmatpush.msrb.mxu0 %v7657_v61  ;;  %v7665_v9 = vunpack.i.l.bf16 %v7663_v20  ;;  %v7666_v25 = vld [vmem:[#allocation27_spill] sm:$0xff]  ;;  %v7672_v20 = vld [vmem:[#allocation156_spill] sm:$0xff]  ;;  %vm7732_vm9 = vcmp.lt.s32.totalorder %v3901_v14, 102 }
 0x1f8   :  { %v841_v1 = vsel %vm836_vm8, %v7660_v4, %v7659_v36  ;;  %2099 = vmatpush.msrb.mxu1 %v1304_v39  ;;  %2061 = vmatpush.msrb.mxu3 %v7661_v29  ;;  %v5732_v45 = vpop.permute.xlu1 %3534  ;;  %v7668_v36 = vld [vmem:[#allocation13_spill] sm:$0xff]  ;;  %v7669_v4 = vld [vmem:[#allocation126_spill] sm:$0xff]  ;;  %vm7708_vm8 = vcmp.lt.s32.totalorder %v3901_v14, 18 }
 0x1f9   :  { %2157 = vmatpush.msra.mxu2 %v841_v1  ;;  %2081 = vmatpush.msrb.mxu0 %v7662_v63  ;;  %v808_v13 = vsel %vm803_vm6, %v7665_v9, %v7664_v41  ;;  %v5735_v7 = vpop.permute.xlu2 %3584  ;;  %v7670_v1 = vunpack.i.h.bf16 %v7669_v4  ;;  %v7671_v29 = vunpack.i.l.bf16 %v7669_v4  ;;  %v7673_v41 = vunpack.i.h.bf16 %v7672_v20  ;;  %v7712_v20 = vld [vmem:[#allocation70_spill] sm:$0xff] }
 0x1fa   :  { %1296 = vrot.lane.b32.xlu1 %v5299_v0, %s3803_s26  ;;  %2062 = vmatpush.msrb.mxu3 %v7666_v25  ;;  %v5737_v39 = vpop.permute.xlu0 %3529  ;;  %vm7674_vm6 = vcmp.lt.s32.totalorder %v3901_v14, 16  ;;  %v7675_v25 = vld [vmem:[#allocation103_spill] sm:$0xff]  ;;  %v7713_v5 = vunpack.i.h.bf16 %v7712_v20  ;;  %v3537_v37 = vunpack.i.h.bf16 %v5732_v45 }
 0x1fb   :  { %2158 = vmatpush.msra.mxu2 %v808_v13  ;;  %1263 = vrot.lane.b32.xlu2 %v5299_v0, %s3802_s25  ;;  %v7313_v61 = vunpack.i.l.bf16 %v5737_v39  ;;  %v775_v63 = vsel %vm770_vm7, %v7671_v29, %v7670_v1  ;;  %v3452_v13 = vunpack.i.h.bf16 %v5233_v23  ;;  %v7319_v29 = vunpack.i.l.bf16 %v5732_v45 }
 0x1fc   :  { %1329 = vrot.lane.b32.xlu0 %v5299_v0, %s3799_s22  ;;  %2082 = vmatpush.msrb.mxu0 %v7667_v40  ;;  %v7676_v40 = vld [vmem:[#allocation21_spill] sm:$0xff]  ;;  %vm7705_vm7 = vcmp.lt.s32.totalorder %v3901_v14, 120 }
 0x1fd   :  { %2063 = vmatpush.msrb.mxu3 %v7668_v36  ;;  %2159 = vmatpush.msra.mxu2 %v775_v63  ;;  %v1271_v9 = vsel %vm7674_vm6, %v7673_v41, %v7313_v61  ;;  %v7677_v36 = vld [vmem:[#allocation121_spill] sm:$0xff]  ;;  %v7680_v63 = vld [vmem:[#allocation88_spill] sm:$0xff] }
 0x1fe   :  { %2083 = vmatpush.msrb.mxu0 %v7675_v25  ;;  %v7678_v3 = vunpack.i.h.bf16 %v7677_v36  ;;  %v7679_v4 = vunpack.i.l.bf16 %v7677_v36  ;;  %2100 = vmatpush.msrb.mxu1 %v1271_v9  ;;  %v3677_v41 = vld [vmem:[#allocation6 + $0x8] sm:$0xff]  ;;  %v7685_v9 = vld [vmem:[#allocation86_spill] sm:$0xff]  ;;  %v7700_v36 = vld [vmem:[#allocation100_spill] sm:$0xff] }
 0x1ff   :  { %2064 = vmatpush.msrb.mxu3 %v7676_v40  ;;  %v7681_v61 = vld [vmem:[#allocation93_spill] sm:$0xff]  ;;  %v7701_v18 = vunpack.i.h.bf16 %v7700_v36  ;;  %v7702_v60 = vunpack.i.l.bf16 %v7700_v36 }
 0x200   :  { %v742_v1 = vsel %vm737_vm0, %v7679_v4, %v7678_v3  ;;  %2084 = vmatpush.msrb.mxu0 %v7680_v63  ;;  %v7682_v47 = vunpack.i.h.bf16 %v7681_v61  ;;  %v7683_v25 = vunpack.i.l.bf16 %v7681_v61  ;;  %v5777_v3 = vpop.permute.xlu1 %3549  ;;  %v7686_v4 = vld [vmem:[#allocation105_spill] sm:$0xff]  ;;  %v7689_v61 = vunpack.i.l.bf16 %v5233_v23  ;;  %v7692_v23 = vld [vmem:[#allocation168_spill] sm:$0xff] }
 0x201   :  { %2160 = vmatpush.msra.mxu2 %v742_v1  ;;  %2065 = vmatpush.msrb.mxu3 %v3677_v41  ;;  %v7687_v1 = vunpack.i.h.bf16 %v7686_v4  ;;  %v7688_v63 = vunpack.i.l.bf16 %v7686_v4  ;;  %vm7690_vm0 = vcmp.lt.s32.totalorder %v3901_v14, 119  ;;  %v7691_v4 = vld [vmem:[#allocation62_spill] sm:$0xff] }
 0x202   :  { %v709_v40 = vsel %vm704_vm1, %v7683_v25, %v7682_v47  ;;  %2085 = vmatpush.msrb.mxu0 %v7685_v9  ;;  %v1524_v47 = vsel %vm7690_vm0, %v7689_v61, %v3452_v13  ;;  %1197 = vrot.lane.b32.xlu1 %v5299_v0, %s3809_s5  ;;  %v5794_v25 = vpop.permute.xlu0 %3544  ;;  %vm7694_vm1 = vcmp.lt.s32.totalorder %v3901_v14, 17  ;;  %vm7734_vm6 = vmmov %vm7690_vm0  ;;  %vm7739_vm0 = vcmp.lt.s32.totalorder %v3901_v14, 123 }
 0x203   :  { %2161 = vmatpush.msra.mxu2 %v709_v40  ;;  %2130 = vmatpush.msra.mxu3 %v7684_v30  ;;  %v676_v41 = vsel %vm671_vm2, %v7688_v63, %v7687_v1  ;;  %v5792_v30 = vpop.permute.xlu2 %3599  ;;  %v7693_v63 = vunpack.i.h.bf16 %v7692_v23  ;;  %vm7698_vm2 = vcmp.lt.s32.totalorder %v3901_v14, 84  ;;  %v7699_v40 = vld [vmem:[#allocation38_spill] sm:$0xff]  ;;  %v643_v23 = vsel %vm638_vm12, %v7702_v60, %v7701_v18  ;;  %v7710_v60 = vld [vmem:[#allocation36_spill] sm:$0xff]  ;;  %v7740_v18 = vld [vmem:[#allocation35_spill] sm:$0xff] }
 0x204   :  { %2170 = vmatpush.msra.mxu0 %v1524_v47  ;;  %1164 = vrot.lane.b32.xlu2 %v5299_v0, %s3808_s4  ;;  %v7697_v47 = vunpack.i.l.bf16 %v7695_v52  ;;  %vm7718_vm12 = vcmp.lt.s32.totalorder %v3901_v14, 121  ;;  %v7737_v11 = vunpack.i.l.bf16 %v7710_v60 }
 0x205   :  { %2162 = vmatpush.msra.mxu2 %v676_v41  ;;  %1230 = vrot.lane.b32.xlu0 %v5299_v0, %s3804_s27  ;;  %v1238_v61 = vsel %vm7694_vm1, %v7693_v63, %v7319_v29  ;;  %v7696_v41 = vunpack.i.h.bf16 %v7695_v52  ;;  %v7703_v63 = vunpack.i.h.bf16 %v5293_v8  ;;  %v7704_v29 = vunpack.i.l.bf16 %v5293_v8 }
 0x206   :  { %2101 = vmatpush.msrb.mxu1 %v1238_v61  ;;  %v7709_v61 = vld [vmem:[#allocation46_spill] sm:$0xff]  ;;  %vm7744_vm1 = vcmp.lt.s32.totalorder %v3901_v14, 34  ;;  %2086 = vmatmul.f32.vlgmr.msrb.gmra.mxu0 %v5562_v54 }
 0x207   :  { %v511_v1 = vsel %vm7698_vm2, %v7697_v47, %v7696_v41  ;;  %v1491_v52 = vsel %vm7705_vm7, %v7704_v29, %v7703_v63  ;;  %v7706_v41 = vunpack.i.l.bf16 %v5794_v25  ;;  %v7707_v47 = vunpack.i.h.bf16 %v5336_v32  ;;  %2163 = vmatpush.msra.mxu2 %v643_v23  ;;  %2066 = vmatmul.f32.vlgmr.msrb.gmra.mxu3 %v5557_v19 }
 0x208   :  { %2131 = vmatpush.msra.mxu3 %v511_v1  ;;  %2171 = vmatpush.msra.mxu0 %v1491_v52  ;;  %v7714_v29 = vunpack.i.l.bf16 %v7712_v20  ;;  %v7716_v32 = vunpack.i.h.bf16 %v5334_v21  ;;  %v7719_v23 = vunpack.i.h.bf16 %v7691_v4  ;;  %v7722_v52 = vld [vmem:[#allocation18_spill] sm:$0xff]  ;;  %vm7746_vm2 = vcmp.lt.s32.totalorder %v3901_v14, 103 }
 0x209   :  { %v1205_v1 = vsel %vm7708_vm8, %v7707_v47, %v7706_v41  ;;  %v7717_v41 = vunpack.i.l.bf16 %v5334_v21  ;;  %vm7748_vm7 = vcmp.lt.s32.totalorder %v3901_v14, 35  ;;  %vm7751_vm8 = vcmp.lt.s32.totalorder %v3901_v14, 120 }
 0x20a   :  { %2132 = vmatpush.msra.mxu3 %v7711_v6  ;;  %v610_v63 = vsel %vm7715_vm10, %v7714_v29, %v7713_v5  ;;  %2102 = vmatpush.msrb.mxu1 %v1205_v1  ;;  %v7720_v6 = vunpack.i.l.bf16 %v7691_v4  ;;  %v7723_v29 = vld [vmem:[#allocation84_spill] sm:$0xff]  ;;  %v7727_v1 = vunpack.i.l.bf16 %v7699_v40  ;;  %vm7754_vm10 = vcmp.lt.s32.totalorder %v3901_v14, 124 }
 0x20b   :  { %v1458_v47 = vsel %vm7718_vm12, %v7717_v41, %v7716_v32  ;;  %2164 = vmatpush.msra.mxu2 %v610_v63  ;;  %v7724_v36 = vunpack.i.h.bf16 %v7723_v29  ;;  %v7725_v9 = vunpack.i.l.bf16 %v7723_v29  ;;  %v7728_v63 = vunpack.i.h.bf16 %v4096_v62  ;;  %1098 = vrot.lane.b32.xlu1 %v5299_v0, %s3811_s7 }
 0x20c   :  { %2172 = vmatpush.msra.mxu0 %v1458_v47  ;;  %v445_v20 = vsel %vm7721_vm13, %v7720_v6, %v7719_v23  ;;  %v5874_v47 = vpop.permute.xlu1 %3564  ;;  %v7733_v6 = vunpack.i.l.bf16 %v5384_v57  ;;  %v7736_v23 = vld [vmem:[#allocation51_spill] sm:$0xff]  ;;  %1537 = vrot.lane.b32.xlu2 %v5608_v26, %s3812_s8  ;;  %v7747_v26 = vunpack.i.h.bf16 %v5379_v22  ;;  %vm7757_vm12 = vcmp.lt.s32.totalorder %v3901_v14, 104 }
 0x20d   :  { %2133 = vmatpush.msra.mxu3 %v445_v20  ;;  %v577_v32 = vsel %vm7726_vm4, %v7725_v9, %v7724_v36  ;;  %v5870_v41 = vsel %vm7729_vm11, %v7728_v63, %v7727_v1  ;;  %v7730_v9 = vunpack.i.h.bf16 %v7709_v61  ;;  %v7731_v36 = vunpack.i.l.bf16 %v7709_v61  ;;  %v5889_v1 = vpop.permute.xlu2 %3614  ;;  %v5891_v63 = vpop.permute.xlu0 %3559  ;;  %1131 = vrot.lane.b32.xlu0 %v5299_v0, %s3810_s6 }
 0x20e   :  { %2165 = vmatpush.msra.mxu2 %v577_v32  ;;  %2173 = vmatpush.msra.mxu0 %v5870_v41  ;;  %v1523_v20 = vsel %vm7734_vm6, %v3452_v13, %v7733_v6  ;;  %v7326_v29 = vunpack.i.l.bf16 %v5874_v47  ;;  %v7735_v32 = vld [vmem:[#allocation50_spill] sm:$0xff]  ;;  %v7324_v5 = vunpack.i.h.bf16 %v7736_v23  ;;  %v7745_v13 = vunpack.i.l.bf16 %v7736_v23 }
 0x20f   :  { %v412_v62 = vsel %vm7732_vm9, %v7731_v36, %v7730_v9  ;;  %v7738_v9 = vunpack.i.h.bf16 %v3978_v38  ;;  %v7741_v38 = vunpack.i.l.bf16 %v5631_v17  ;;  %vm7760_vm13 = vcmp.lt.s32.totalorder %v3901_v14, 121  ;;  %2166 = vmatmul.f32.vlgmr.msra.gmra.mxu2 %v5562_v54 }
 0x210   :  { %2134 = vmatpush.msra.mxu3 %v412_v62  ;;  %2250 = vmatpush.msrb.mxu2 %v1523_v20  ;;  %v379_v62 = vsel %vm7746_vm2, %v7745_v13, %v7324_v5  ;;  %v1139_v0 = vsel %vm7748_vm7, %v7747_v26, %v7326_v29  ;;  %v7752_v13 = vunpack.i.l.bf16 %v7722_v52  ;;  %v7753_v5 = vunpack.i.h.bf16 %v4013_v48 }
 0x211   :  { %v5901_v36 = vsel %vm7739_vm0, %v7738_v9, %v7737_v11  ;;  %v7742_v11 = vld [vmem:[#allocation164_spill] sm:$0xff]  ;;  %v7758_v48 = vunpack.i.l.bf16 %v5687_v56  ;;  %vm7763_vm4 = vcmp.lt.s32.totalorder %v3901_v14, 12  ;;  %vm7767_vm11 = vcmp.lt.s32.totalorder %v3901_v14, 105 }
 0x212   :  { %2174 = vmatpush.msra.mxu0 %v5901_v36  ;;  %v7743_v20 = vunpack.i.h.bf16 %v7742_v11  ;;  %2135 = vmatpush.msra.mxu3 %v379_v62  ;;  %v5944_v22 = vsel %vm7754_vm10, %v7753_v5, %v7752_v13  ;;  %v7755_v62 = vunpack.i.h.bf16 %v7735_v32  ;;  %v7759_v5 = vunpack.i.h.bf16 %v5334_v21 }
 0x213   :  { %v7762_v13 = vunpack.i.l.bf16 %v5633_v33  ;;  %v7766_v21 = vunpack.i.l.bf16 %v7740_v18  ;;  %vm7769_vm9 = vcmp.lt.s32.totalorder %v3901_v14, 122  ;;  %vm7772_vm6 = vcmp.lt.s32.totalorder %v3901_v14, 13 }
 0x214   :  { %v1172_v9 = vsel %vm7744_vm1, %v7743_v20, %v7741_v38  ;;  %v7749_v38 = vunpack.i.l.bf16 %v5612_v49  ;;  %v7750_v20 = vunpack.i.h.bf16 %v5293_v8  ;;  %2175 = vmatpush.msra.mxu0 %v5944_v22  ;;  %vm7774_vm0 = vcmp.lt.s32.totalorder %v3901_v14, 106 }
 0x215   :  { %2103 = vmatpush.msrb.mxu1 %v1172_v9  ;;  %v7756_v9 = vunpack.i.l.bf16 %v7735_v32  ;;  %v7775_v6 = vunpack.i.h.bf16 %v7710_v60  ;;  %v7776_v26 = vunpack.i.l.bf16 %v7710_v60  ;;  %vm7777_vm1 = vcmp.lt.s32.totalorder %v3901_v14, 123 }
 0x216   :  { %v1490_v11 = vsel %vm7751_vm8, %v7750_v20, %v7749_v38  ;;  %v7327_v38 = vunpack.i.h.bf16 %v7699_v40  ;;  %v7761_v20 = vunpack.i.h.bf16 %v5633_v33  ;;  %vm7780_vm2 = vcmp.lt.s32.totalorder %v3901_v14, 14  ;;  %vm7785_vm8 = vmmov %vm7754_vm10 }
 0x217   :  { %2251 = vmatpush.msrb.mxu2 %v1490_v11  ;;  %v346_v8 = vsel %vm7757_vm12, %v7756_v9, %v7755_v62  ;;  %v1457_v11 = vsel %vm7760_vm13, %v7759_v5, %v7758_v48  ;;  %2104 = vmatpush.msrb.mxu1 %v1139_v0  ;;  %v7764_v62 = vld [vmem:[#allocation39_spill] sm:$0xff]  ;;  %v5975_v5 = vpop.permute.xlu1 %3579  ;;  %v7768_v0 = vunpack.i.l.bf16 %v7699_v40  ;;  %vm7782_vm7 = vcmp.lt.s32.totalorder %v3901_v14, 36  ;;  %vm7792_vm12 = vmmov %vm7763_vm4 }
 0x218   :  { %2136 = vmatpush.msra.mxu3 %v346_v8  ;;  %v1402_v29 = vsel %vm7763_vm4, %v7762_v13, %v7761_v20  ;;  %v7328_v9 = vunpack.i.h.bf16 %v7764_v62  ;;  %v7765_v8 = vunpack.i.h.bf16 %v7740_v18  ;;  %v7771_v20 = vunpack.i.l.bf16 %v5434_v44  ;;  %vm7800_vm4 = vmmov %vm7772_vm6 }
 0x219   :  { %2252 = vmatpush.msrb.mxu2 %v1457_v11  ;;  %2176 = vmatpush.msra.mxu0 %v1402_v29  ;;  %v5984_v11 = vsel %vm7769_vm9, %v7768_v0, %v7327_v38  ;;  %v7770_v29 = vunpack.i.h.bf16 %v5434_v44  ;;  %v7773_v0 = vunpack.i.l.bf16 %v7764_v62  ;;  %v7783_v55 = vunpack.i.h.bf16 %v7722_v52 }
 0x21a   :  { %v313_v48 = vsel %vm7767_vm11, %v7766_v21, %v7765_v8  ;;  %v5992_v8 = vpop.permute.xlu2 %3629  ;;  %v5994_v21 = vpop.permute.xlu0 %3574  ;;  %v7784_v51 = vunpack.i.l.bf16 %v7722_v52  ;;  %vm7789_vm10 = vcmp.lt.s32.totalorder %v3901_v14, 15  ;;  %vm7797_vm13 = vcmp.lt.s32.totalorder %v3901_v14, 16 }
 0x21b   :  { %2137 = vmatpush.msra.mxu3 %v313_v48  ;;  %v1369_v13 = vsel %vm7772_vm6, %v7771_v20, %v7770_v29  ;;  %2253 = vmatpush.msrb.mxu2 %v5984_v11  ;;  %v280_v38 = vsel %vm7774_vm0, %v7773_v0, %v7328_v9  ;;  %v7333_v29 = vunpack.i.l.bf16 %v5994_v21  ;;  %v6013_v48 = vsel %vm7777_vm1, %v7776_v26, %v7775_v6  ;;  %vm7811_vm6 = vmmov %vm7780_vm2 }
 0x21c   :  { %2177 = vmatpush.msra.mxu0 %v1369_v13  ;;  %v7778_v0 = vunpack.i.h.bf16 %v5671_v58  ;;  %v7781_v6 = vunpack.i.h.bf16 %v5429_v24  ;;  %v7337_v13 = vunpack.i.l.bf16 %v5891_v63  ;;  %v7793_v24 = vld [vmem:[#allocation12_spill] sm:$0xff]  ;;  %vm7804_vm11 = vcmp.lt.s32.totalorder %v3901_v14, 17 }
 0x21d   :  { %2138 = vmatpush.msra.mxu3 %v280_v38  ;;  %2254 = vmatpush.msrb.mxu2 %v6013_v48  ;;  %v7779_v38 = vunpack.i.l.bf16 %v5671_v58  ;;  %vm7807_vm9 = vcmp.lt.s32.totalorder %v3901_v14, 125  ;;  %vm7814_vm0 = vcmp.lt.s32.totalorder %v3901_v14, 38  ;;  %vm7817_vm1 = vcmp.lt.s32.totalorder %v3901_v14, 18 }
 0x21e   :  { %v1106_v26 = vsel %vm7782_vm7, %v7781_v6, %v7333_v29  ;;  %vm7823_vm7 = vmmov %vm7789_vm10 }
 0x21f   :  { %v1336_v9 = vsel %vm7780_vm2, %v7779_v38, %v7778_v0  ;;  %2139 = vmatpush.msra.mxu3 %v5570_v15  ;;  %v6040_v0 = vsel %vm7785_vm8, %v7784_v51, %v7783_v55  ;;  %v7786_v38 = vld [vmem:[#allocation26_spill] sm:$0xff]  ;;  %v7788_v15 = vunpack.i.l.bf16 %v5487_v50  ;;  %2105 = vmatpush.msrb.mxu1 %v1106_v26  ;;  %v7790_v55 = vunpack.i.l.bf16 %v5545_v16 }
 0x220   :  { %2178 = vmatpush.msra.mxu0 %v1336_v9  ;;  %2255 = vmatpush.msrb.mxu2 %v6040_v0  ;;  %v7787_v9 = vunpack.i.h.bf16 %v5487_v50  ;;  %v7791_v51 = vunpack.i.h.bf16 %v5633_v33  ;;  %v7795_v26 = vunpack.i.h.bf16 %v5737_v39  ;;  %v6070_v33 = vpop.permute.xlu1 %3594  ;;  %v7806_v20 = vunpack.i.l.bf16 %v7786_v38 }
 0x221   :  { %2140 = vmatpush.msra.mxu3 %v5591_v28  ;;  %2106 = vmatmul.f32.vlgmr.msrb.gmra.mxu1 %v5445_v27  ;;  %vm7820_vm2 = vcmp.lt.s32.totalorder %v3901_v14, 126  ;;  %vm7825_vm8 = vcmp.lt.s32.totalorder %v3901_v14, 34 }
 0x222   :  { %v1303_v29 = vsel %vm7789_vm10, %v7788_v15, %v7787_v9  ;;  %v1401_v6 = vsel %vm7792_vm12, %v7791_v51, %v7790_v55  ;;  %v7798_v15 = vunpack.i.l.bf16 %v5777_v3  ;;  %v7801_v51 = vunpack.i.h.bf16 %v5539_v42  ;;  %v6087_v9 = vpop.permute.xlu2 %1452  ;;  %vm7830_vm12 = vmmov %vm7797_vm13 }
 0x223   :  { %2179 = vmatpush.msra.mxu0 %v1303_v29  ;;  %2256 = vmatpush.msrb.mxu2 %v1401_v6  ;;  %v7796_v29 = vunpack.i.l.bf16 %v5737_v39  ;;  %v7799_v6 = vunpack.i.h.bf16 %v5434_v44  ;;  %v7803_v44 = vunpack.i.l.bf16 %v5732_v45  ;;  %v7339_v45 = vunpack.i.l.bf16 %v5975_v5 }
 0x224   :  { %2141 = vmatpush.msra.mxu3 %v5623_v35  ;;  %v3557_v35 = vunpack.i.h.bf16 %v5631_v17  ;;  %vm7828_vm10 = vcmp.lt.s32.totalorder %v3901_v14, 127 }
 0x225   :  { %v1270_v28 = vsel %vm7797_vm13, %v7796_v29, %v7795_v26  ;;  %v1368_v55 = vsel %vm7800_vm4, %v7799_v6, %v7798_v15  ;;  %v7802_v26 = vunpack.i.l.bf16 %v5539_v42  ;;  %v1237_v15 = vsel %vm7804_vm11, %v7803_v44, %v3537_v37  ;;  %vm7831_vm13 = vmmov %vm7804_vm11 }
 0x226   :  { %2180 = vmatpush.msra.mxu0 %v1270_v28  ;;  %v6089_v28 = vpop.permute.xlu0 %3589  ;;  %2257 = vmatpush.msrb.mxu2 %v1368_v55  ;;  %v7805_v6 = vunpack.i.h.bf16 %v7786_v38  ;;  %v7810_v44 = vunpack.i.h.bf16 %v5671_v58  ;;  %vm7833_vm4 = vcmp.lt.s32.totalorder %v3901_v14, 35  ;;  %vm7835_vm11 = vcmp.lt.s32.totalorder %v3901_v14, 36 }
 0x227   :  { %v1557_v29 = vsel %vm1553_vm5, %v7802_v26, %v7801_v51  ;;  %v7808_v26 = vunpack.i.l.bf16 %v5735_v7 }
 0x228   :  { %v148_v51 = vsel %vm7807_vm9, %v7806_v20, %v7805_v6  ;;  %2205 = vmatpush.msra.mxu1 %v1557_v29  ;;  %2181 = vmatpush.msra.mxu0 %v1237_v15  ;;  %v1335_v43 = vsel %vm7811_vm6, %v7810_v44, %v7337_v13  ;;  %v7338_v20 = vunpack.i.l.bf16 %v6089_v28  ;;  %v7812_v29 = vunpack.i.l.bf16 %v6070_v33  ;;  %vm7839_vm9 = vmmov %vm7817_vm1 }
 0x229   :  { %v1071_v55 = vsel %vm1067_vm14, %v7809_v2, %v7808_v26  ;;  %2142 = vmatpush.msra.mxu3 %v148_v51  ;;  %v7345_v6 = vunpack.i.h.bf16 %v5874_v47  ;;  %2258 = vmatpush.msrb.mxu2 %v1335_v43  ;;  %v7815_v15 = vunpack.i.h.bf16 %v5794_v25  ;;  %v7816_v51 = vunpack.i.l.bf16 %v5794_v25 }
 0x22a   :  { %v1038_v2 = vsel %vm7814_vm0, %v7813_v12, %v7812_v29  ;;  %v7818_v26 = vunpack.i.h.bf16 %v7793_v24  ;;  %v7819_v44 = vunpack.i.l.bf16 %v7793_v24  ;;  %2230 = vmatpush.msrb.mxu1 %v1071_v55  ;;  %v7821_v29 = vunpack.i.l.bf16 %v5685_v34  ;;  %vm7843_vm0 = vmmov %vm7825_vm8 }
 0x22b   :  { %v1204_v58 = vsel %vm7817_vm1, %v7816_v51, %v7815_v15  ;;  %v7822_v43 = vunpack.i.h.bf16 %v5487_v50  ;;  %v7340_v13 = vunpack.i.h.bf16 %v5994_v21  ;;  %v7824_v15 = vunpack.i.l.bf16 %v5631_v17  ;;  %2766 = vmatmul.msk.f32.vlgmr.msra.gmra.mxu1 %vm1966_vm3, %v5541_v46 }
 0x22c   :  { %v115_v10 = vsel %vm7820_vm2, %v7819_v44, %v7818_v26  ;;  %2182 = vmatpush.msra.mxu0 %v1204_v58  ;;  %v7826_v26 = vunpack.i.h.bf16 %v7794_v31  ;;  %v7827_v55 = vunpack.i.l.bf16 %v7794_v31  ;;  %2231 = vmatpush.msrb.mxu1 %v1038_v2  ;;  %v7342_v50 = vunpack.i.l.bf16 %v5792_v30 }
 0x22d   :  { %2143 = vmatpush.msra.mxu3 %v115_v10  ;;  %v1302_v12 = vsel %vm7823_vm7, %v7822_v43, %v7821_v29  ;;  %v1171_v51 = vsel %vm7825_vm8, %v7824_v15, %v3557_v35  ;;  %v7344_v44 = vunpack.i.l.bf16 %v5992_v8  ;;  %v7829_v17 = vunpack.i.h.bf16 %v5737_v39 }
 0x22e   :  { %2259 = vmatpush.msrb.mxu2 %v1302_v12  ;;  %v82_v58 = vsel %vm7828_vm10, %v7827_v55, %v7826_v26  ;;  %2183 = vmatpush.msra.mxu0 %v1171_v51  ;;  %v1236_v29 = vsel %vm7831_vm13, %v3537_v37, %v7338_v20  ;;  %v7832_v2 = vunpack.i.l.bf16 %v5874_v47  ;;  %v6170_v12 = vpop.permute.xlu1 %3609  ;;  %v7343_v39 = vunpack.i.h.bf16 %v5735_v7  ;;  %v3678_v51 = vld [vmem:[#allocation6 + $0x10] sm:$0xff]  ;;  %v6177_v26 = vpop.permute.xlu2 %1360 }
 0x22f   :  { %2144 = vmatpush.msra.mxu3 %v82_v58  ;;  %v1269_v10 = vsel %vm7830_vm12, %v7829_v17, %v7339_v45  ;;  %v7348_v15 = vunpack.i.h.bf16 %v6070_v33  ;;  %v7341_v37 = vunpack.i.l.bf16 %v6170_v12  ;;  %v6179_v55 = vpop.permute.xlu0 %3604  ;;  %v7834_v58 = vunpack.i.l.bf16 %v5994_v21  ;;  %vm7864_vm12 = vmmov %vm7833_vm4 }
 0x230   :  { %2260 = vmatpush.msrb.mxu2 %v1269_v10  ;;  %v1138_v43 = vsel %vm7833_vm4, %v7832_v2, %v7345_v6  ;;  %v3606_v10 = vunpack.i.l.bf16 %v6179_v55  ;;  %v3616_v2 = vunpack.i.l.bf16 %v5889_v1  ;;  %v7838_v45 = vunpack.i.h.bf16 %v5794_v25  ;;  %vm7871_vm4 = vmmov %vm7835_vm11 }
 0x231   :  { %2184 = vmatpush.msra.mxu0 %v1138_v43  ;;  %2145 = vmatpush.msra.mxu3 %v3678_v51  ;;  %v1105_v17 = vsel %vm7835_vm11, %v7834_v58, %v7340_v13  ;;  %v7836_v43 = vld [vmem:[#allocation81_spill] sm:$0xff]  ;;  %v7837_v51 = vunpack.i.h.bf16 %v5539_v42  ;;  %v7346_v58 = vunpack.i.h.bf16 %v6179_v55  ;;  %vm7842_vm6 = vcmp.lt.s32.totalorder %v3901_v14, 39 }
 0x232   :  { %2146 = vmatmul.f32.vlgmr.msra.gmra.mxu3 %v5557_v19  ;;  %2261 = vmatpush.msrb.mxu2 %v1236_v29  ;;  %v1203_v29 = vsel %vm7839_vm9, %v7838_v45, %v7342_v50  ;;  %v7840_v13 = vld [vmem:[#allocation61_spill] sm:$0xff]  ;;  %v7347_v25 = vunpack.i.h.bf16 %v5889_v1  ;;  %vm7847_vm1 = vcmp.lt.s32.totalorder %v3901_v14, 38  ;;  %v7849_v50 = vld [vmem:[#allocation64_spill] sm:$0xff]  ;;  %vm7850_vm2 = vmmov %vm7842_vm6  ;;  %vm7854_vm7 = vcmp.lt.s32.totalorder %v3901_v14, 101 }
 0x233   :  { %2185 = vmatpush.msra.mxu0 %v1105_v17  ;;  %2210 = vmatpush.msrb.mxu3 %v7836_v43  ;;  %v1556_v20 = vsel %vm1553_vm5, %v7837_v51, %v7344_v44  ;;  %v7349_v17 = vunpack.i.l.bf16 %v7840_v13  ;;  %v7841_v43 = vunpack.i.h.bf16 %v5484_v59  ;;  %v1170_v51 = vsel %vm7843_vm0, %v3557_v35, %v7341_v37  ;;  %v7844_v45 = vld [vmem:[#allocation73_spill] sm:$0xff]  ;;  %v7852_v44 = vld [vmem:[#allocation42_spill] sm:$0xff] }
 0x234   :  { %2262 = vmatpush.msrb.mxu2 %v1203_v29  ;;  %2186 = vmatmul.f32.vlgmr.msra.gmra.mxu0 %v5445_v27  ;;  %v7846_v29 = vunpack.i.l.bf16 %v6070_v33  ;;  %v7356_v6 = vunpack.i.l.bf16 %v7852_v44  ;;  %vm7857_vm8 = vcmp.lt.s32.totalorder %v3901_v14, 102  ;;  %vm7861_vm10 = vcmp.lt.s32.totalorder %v3901_v14, 103 }
 0x235   :  { %2285 = vmatpush.msrb.mxu0 %v1556_v20  ;;  %v1005_v42 = vsel %vm7842_vm6, %v7841_v43, %v3606_v10  ;;  %2211 = vmatpush.msrb.mxu3 %v7844_v45  ;;  %v7845_v20 = vunpack.i.l.bf16 %v5735_v7  ;;  %v7848_v43 = vld [vmem:[#allocation59_spill] sm:$0xff]  ;;  %v1004_v45 = vsel %vm7850_vm2, %v3606_v10, %v7346_v58  ;;  %v7858_v58 = vld [vmem:[#allocation158_spill] sm:$0xff]  ;;  %vm7867_vm13 = vcmp.lt.s32.totalorder %v3901_v14, 104  ;;  %vm7895_vm6 = vmmov %vm7854_vm7 }
 0x236   :  { %v1037_v35 = vsel %vm7847_vm1, %v7846_v29, %v7348_v15  ;;  %v7357_v37 = vunpack.i.l.bf16 %v7848_v43  ;;  %2232 = vmatpush.msrb.mxu1 %v1005_v42  ;;  %2263 = vmatpush.msrb.mxu2 %v1170_v51  ;;  %v6245_v42 = vpop.permute.xlu1 %3624  ;;  %v7855_v51 = vld [vmem:[#allocation49_spill] sm:$0xff]  ;;  %v6252_v29 = vpop.permute.xlu2 %3654  ;;  %v7860_v15 = vunpack.i.h.bf16 %v7736_v23  ;;  %v7866_v23 = vunpack.i.h.bf16 %v7735_v32  ;;  %vm7903_vm1 = vmmov %vm7857_vm8 }
 0x237   :  { %v1070_v59 = vsel %vm1067_vm14, %v7845_v20, %v7343_v39  ;;  %2212 = vmatpush.msrb.mxu3 %v7849_v50  ;;  %v7851_v20 = vunpack.i.h.bf16 %v5547_v53  ;;  %v7355_v10 = vunpack.i.l.bf16 %v7855_v51  ;;  %v971_v53 = vsel %vm968_vm15, %v3616_v2, %v7347_v25 }
 0x238   :  { %2310 = vmatpush.msra.mxu0 %v1070_v59  ;;  %v7853_v59 = vunpack.i.h.bf16 %v7691_v4  ;;  %v7350_v4 = vunpack.i.h.bf16 %v5992_v8  ;;  %vm7874_vm11 = vcmp.lt.s32.totalorder %v3901_v14, 105  ;;  %vm7878_vm9 = vcmp.lt.s32.totalorder %v3901_v14, 106 }
 0x239   :  { %v972_v39 = vsel %vm968_vm15, %v7851_v20, %v3616_v2  ;;  %v6254_v20 = vpop.permute.xlu0 %3619  ;;  %v7859_v2 = vld [vmem:[#allocation47_spill] sm:$0xff]  ;;  %vm7898_vm0 = vcmp.lt.s32.totalorder %v3901_v14, 125  ;;  %vm7906_vm2 = vcmp.lt.s32.totalorder %v3901_v14, 126 }
 0x23a   :  { %v444_v50 = vsel %vm7854_vm7, %v7853_v59, %v7349_v17  ;;  %2311 = vmatpush.msra.mxu0 %v1037_v35  ;;  %2233 = vmatpush.msrb.mxu1 %v972_v39  ;;  %v7856_v39 = vunpack.i.h.bf16 %v7709_v61  ;;  %v7351_v59 = vunpack.i.l.bf16 %v6245_v42  ;;  %v7354_v25 = vunpack.i.l.bf16 %v7859_v2  ;;  %v7862_v17 = vld [vmem:[#allocation153_spill] sm:$0xff]  ;;  %vm7910_vm7 = vmmov %vm7861_vm10 }
 0x23b   :  { %2213 = vmatpush.msrb.mxu3 %v444_v50  ;;  %v7352_v50 = vunpack.i.l.bf16 %v6254_v20  ;;  %v378_v61 = vsel %vm7861_vm10, %v7860_v15, %v7356_v6  ;;  %v345_v15 = vsel %vm7867_vm13, %v7866_v23, %v7355_v10  ;;  %v7893_v10 = vld [vmem:[#allocation55_spill] sm:$0xff]  ;;  %v7902_v6 = vunpack.i.h.bf16 %v7848_v43  ;;  %vm7919_vm10 = vmmov %vm7867_vm13 }
 0x23c   :  { %v411_v35 = vsel %vm7857_vm8, %v7856_v39, %v7357_v37  ;;  %2312 = vmatpush.msra.mxu0 %v1004_v45  ;;  %2234 = vmatpush.msrb.mxu1 %v7858_v58  ;;  %v7863_v45 = vunpack.i.h.bf16 %v5874_v47  ;;  %v7865_v39 = vld [vmem:[#allocation31_spill] sm:$0xff]  ;;  %v7870_v47 = vunpack.i.h.bf16 %v5994_v21  ;;  %v7875_v21 = vld [vmem:[#allocation154_spill] sm:$0xff]  ;;  %v7897_v37 = vunpack.i.h.bf16 %v7786_v38 }
 0x23d   :  { %2214 = vmatpush.msrb.mxu3 %v411_v35  ;;  %v7353_v35 = vunpack.i.l.bf16 %v7865_v39  ;;  %vm7914_vm8 = vcmp.lt.s32.totalorder %v3901_v14, 127  ;;  %vm7929_vm13 = vcmp.lt.s32.totalorder %v3901_v14, 119  ;;  %2767 = vmatmul.msk.f32.vlgmr.msrb.gmra.mxu0 %vm1966_vm3, %v5541_v46  ;;  %v7941_v46 = vunpack.i.h.bf16 %v7865_v39 }
 0x23e   :  { %2313 = vmatpush.msra.mxu0 %v971_v53  ;;  %2235 = vmatpush.msrb.mxu1 %v7862_v17  ;;  %v1137_v58 = vsel %vm7864_vm12, %v7863_v45, %v7352_v50  ;;  %v7868_v53 = vld [vmem:[#allocation157_spill] sm:$0xff]  ;;  %v7869_v17 = vld [vmem:[#allocation143_spill] sm:$0xff]  ;;  %v7872_v45 = vunpack.i.l.bf16 %v5992_v8  ;;  %vm7926_vm12 = vmmov %vm7874_vm11 }
 0x23f   :  { %2215 = vmatpush.msrb.mxu3 %v378_v61  ;;  %2264 = vmatpush.msrb.mxu2 %v1137_v58  ;;  %v1104_v61 = vsel %vm7871_vm4, %v7870_v47, %v7351_v59  ;;  %v7873_v58 = vunpack.i.h.bf16 %v7740_v18  ;;  %v6311_v47 = vpop.permute.xlu2 %1261  ;;  %v7890_v50 = vld [vmem:[#allocation23_spill] sm:$0xff]  ;;  %vm7934_vm4 = vmmov %vm7929_vm13 }
 0x240   :  { %2314 = vmatpush.msra.mxu0 %v7868_v53  ;;  %2236 = vmatpush.msrb.mxu1 %v7869_v17  ;;  %v1555_v32 = vsel %vm1553_vm5, %v7872_v45, %v7350_v4  ;;  %v7876_v53 = vld [vmem:[#allocation142_spill] sm:$0xff]  ;;  %v6309_v17 = vpop.permute.xlu1 %3639  ;;  %v7359_v4 = vunpack.i.h.bf16 %v7840_v13 }
 0x241   :  { %2216 = vmatpush.msrb.mxu3 %v345_v15  ;;  %2265 = vmatpush.msrb.mxu2 %v1104_v61  ;;  %v312_v23 = vsel %vm7874_vm11, %v7873_v58, %v7354_v25  ;;  %v6313_v45 = vpop.permute.xlu0 %3634  ;;  %v7877_v15 = vunpack.i.h.bf16 %v7764_v62  ;;  %v7879_v61 = vld [vmem:[#allocation133_spill] sm:$0xff]  ;;  %v7880_v58 = vld [vmem:[#allocation135_spill] sm:$0xff]  ;;  %vm7939_vm11 = vcmp.lt.s32.totalorder %v3901_v14, 100 }
 0x242   :  { %2315 = vmatpush.msra.mxu0 %v7875_v21  ;;  %2237 = vmatpush.msrb.mxu1 %v7876_v53  ;;  %v7883_v21 = vld [vmem:[#allocation52_spill] sm:$0xff]  ;;  %v7884_v62 = vld [vmem:[#allocation127_spill] sm:$0xff] }
 0x243   :  { %2217 = vmatpush.msrb.mxu3 %v312_v23  ;;  %2365 = vmatpush.msra.mxu2 %v1555_v32  ;;  %v279_v18 = vsel %vm7878_vm9, %v7877_v15, %v7353_v35  ;;  %v7881_v23 = vld [vmem:[#allocation140_spill] sm:$0xff]  ;;  %v7882_v32 = vld [vmem:[#allocation78_spill] sm:$0xff]  ;;  %v7358_v53 = vunpack.i.l.bf16 %v7883_v21  ;;  %v7885_v15 = vld [vmem:[#allocation25_spill] sm:$0xff] }
 0x244   :  { %2316 = vmatpush.msra.mxu0 %v7879_v61  ;;  %2238 = vmatpush.msrb.mxu1 %v7880_v58  ;;  %v7360_v59 = vunpack.i.l.bf16 %v7885_v15  ;;  %v7886_v61 = vld [vmem:[#allocation136_spill] sm:$0xff]  ;;  %v7887_v58 = vld [vmem:[#allocation74_spill] sm:$0xff]  ;;  %v7891_v25 = vld [vmem:[#allocation115_spill] sm:$0xff] }
 0x245   :  { %2218 = vmatpush.msrb.mxu3 %v279_v18  ;;  %2266 = vmatmul.f32.vlgmr.msrb.gmra.mxu2 %v5445_v27  ;;  %v7888_v18 = vld [vmem:[#allocation57_spill] sm:$0xff] }
 0x246   :  { %2317 = vmatpush.msra.mxu0 %v7881_v23  ;;  %2370 = vmatpush.msrb.mxu2 %v7882_v32  ;;  %v7361_v27 = vunpack.i.l.bf16 %v7888_v18  ;;  %v7889_v32 = vld [vmem:[#allocation125_spill] sm:$0xff]  ;;  %v7901_v23 = vld [vmem:[#allocation106_spill] sm:$0xff] }
 0x247   :  { %2219 = vmatpush.msrb.mxu3 %v5870_v41  ;;  %2239 = vmatpush.msrb.mxu1 %v7884_v62  ;;  %v7892_v41 = vld [vmem:[#allocation67_spill] sm:$0xff] }
 0x248   :  { %2318 = vmatpush.msra.mxu0 %v7886_v61  ;;  %2371 = vmatpush.msrb.mxu2 %v7887_v58  ;;  %v6340_v62 = vpop.permute.xlu1 %3644  ;;  %v7894_v58 = vld [vmem:[#allocation117_spill] sm:$0xff]  ;;  %v7900_v61 = vld [vmem:[#allocation40_spill] sm:$0xff]  ;;  %v409_v38 = vsel %vm7903_vm1, %v7902_v6, %v7361_v27  ;;  %vm7949_vm1 = vcmp.lt.s32.totalorder %v3901_v14, 101 }
 0x249   :  { %2220 = vmatpush.msrb.mxu3 %v5901_v36  ;;  %2240 = vmatpush.msrb.mxu1 %v7889_v32  ;;  %v442_v36 = vsel %vm7895_vm6, %v7359_v4, %v7358_v53  ;;  %v6351_v32 = vpop.permute.xlu2 %1162  ;;  %v7362_v53 = vunpack.i.h.bf16 %v7852_v44  ;;  %v7911_v27 = vld [vmem:[#allocation45_spill] sm:$0xff]  ;;  %vm7943_vm6 = vcmp.lt.s32.totalorder %v3901_v14, 120 }
 0x24a   :  { %2319 = vmatpush.msra.mxu0 %v7891_v25  ;;  %2372 = vmatpush.msrb.mxu2 %v7892_v41  ;;  %v6353_v25 = vpop.permute.xlu0 %1393  ;;  %v7896_v41 = vld [vmem:[#allocation14_spill] sm:$0xff]  ;;  %v7923_v4 = vld [vmem:[#allocation97_spill] sm:$0xff] }
 0x24b   :  { %2221 = vmatpush.msrb.mxu3 %v5944_v22  ;;  %2241 = vmatpush.msrb.mxu1 %v7894_v58  ;;  %v147_v22 = vsel %vm7898_vm0, %v7897_v37, %v7360_v59  ;;  %v7899_v58 = vld [vmem:[#allocation122_spill] sm:$0xff]  ;;  %v7904_v37 = vunpack.i.l.bf16 %v7890_v50  ;;  %v7912_v35 = vunpack.i.l.bf16 %v7896_v41  ;;  %vm7945_vm0 = vmmov %vm7943_vm6 }
 0x24c   :  { %2320 = vmatpush.msra.mxu0 %v7899_v58  ;;  %2373 = vmatpush.msrb.mxu2 %v442_v36  ;;  %v7905_v36 = vunpack.i.h.bf16 %v7793_v24  ;;  %v7907_v59 = vld [vmem:[#allocation118_spill] sm:$0xff]  ;;  %v7920_v24 = vld [vmem:[#allocation101_spill] sm:$0xff] }
 0x24d   :  { %2222 = vmatpush.msrb.mxu3 %v147_v22  ;;  %2242 = vmatpush.msrb.mxu1 %v7901_v23  ;;  %v7908_v22 = vld [vmem:[#allocation104_spill] sm:$0xff]  ;;  %v7909_v23 = vunpack.i.l.bf16 %v7893_v10  ;;  %v7931_v10 = vld [vmem:[#allocation71_spill] sm:$0xff] }
 0x24e   :  { %v114_v58 = vsel %vm7906_vm2, %v7905_v36, %v7904_v37  ;;  %2321 = vmatpush.msra.mxu0 %v7907_v59  ;;  %2374 = vmatpush.msrb.mxu2 %v409_v38  ;;  %v7913_v37 = vunpack.i.h.bf16 %v7794_v31  ;;  %v7915_v38 = vld [vmem:[#allocation94_spill] sm:$0xff]  ;;  %v3497_v36 = vunpack.i.h.bf16 %v5384_v57  ;;  %vm7951_vm2 = vcmp.lt.s32.totalorder %v3901_v14, 122 }
 0x24f   :  { %2223 = vmatpush.msrb.mxu3 %v114_v58  ;;  %2243 = vmatpush.msrb.mxu1 %v7908_v22  ;;  %v376_v6 = vsel %vm7910_vm7, %v7362_v53, %v7909_v23  ;;  %v7916_v58 = vld [vmem:[#allocation96_spill] sm:$0xff]  ;;  %v7917_v22 = vunpack.i.l.bf16 %v7900_v61  ;;  %v7918_v23 = vunpack.i.h.bf16 %v7855_v51  ;;  %vm7953_vm7 = vcmp.lt.s32.totalorder %v3901_v14, 121 }
 0x250   :  { %v81_v59 = vsel %vm7914_vm8, %v7913_v37, %v7912_v35  ;;  %2322 = vmatpush.msra.mxu0 %v7915_v38  ;;  %2375 = vmatpush.msrb.mxu2 %v376_v6  ;;  %v6405_v31 = vpop.permute.xlu1 %1327  ;;  %v3679_v6 = vld [vmem:[#allocation6 + $0x18] sm:$0xff]  ;;  %v7921_v37 = vld [vmem:[#allocation85_spill] sm:$0xff]  ;;  %vm7954_vm8 = vmmov %vm7953_vm7 }
 0x251   :  { %2224 = vmatpush.msrb.mxu3 %v81_v59  ;;  %2244 = vmatpush.msrb.mxu1 %v7916_v58  ;;  %v343_v53 = vsel %vm7919_vm10, %v7918_v23, %v7917_v22  ;;  %v7922_v38 = vld [vmem:[#allocation43_spill] sm:$0xff]  ;;  %v7924_v22 = vunpack.i.l.bf16 %v7911_v27  ;;  %v6420_v23 = vpop.permute.xlu2 %1096  ;;  %v7930_v58 = vld [vmem:[#allocation28_spill] sm:$0xff]  ;;  %vm7958_vm10 = vcmp.lt.s32.totalorder %v3901_v14, 102 }
 0x252   :  { %2323 = vmatpush.msra.mxu0 %v7920_v24  ;;  %2376 = vmatpush.msrb.mxu2 %v343_v53  ;;  %v6409_v59 = vpop.permute.xlu0 %3649  ;;  %v7925_v53 = vunpack.i.h.bf16 %v7859_v2  ;;  %v7927_v35 = vld [vmem:[#allocation79_spill] sm:$0xff]  ;;  %v2941_v27 = vunpack.i.l.bf16 %v7930_v58 }
 0x253   :  { %2225 = vmatpush.msrb.mxu3 %v3679_v6  ;;  %2245 = vmatpush.msrb.mxu1 %v7921_v37  ;;  %v3507_v6 = vunpack.i.h.bf16 %v5612_v49  ;;  %v7936_v37 = vld [vmem:[#allocation54_spill] sm:$0xff] }
 0x254   :  { %2226 = vmatmul.f32.vlgmr.msrb.gmra.mxu3 %v5557_v19  ;;  %2324 = vmatpush.msra.mxu0 %v7923_v4  ;;  %v310_v24 = vsel %vm7926_vm12, %v7925_v53, %v7924_v22  ;;  %v7928_v19 = vunpack.i.l.bf16 %v5384_v57  ;;  %v3517_v22 = vunpack.i.h.bf16 %v5687_v56  ;;  %v7932_v53 = vld [vmem:[#allocation75_spill] sm:$0xff]  ;;  %v7937_v18 = vunpack.i.h.bf16 %v7936_v37 }
 0x255   :  { %2290 = vmatpush.msra.mxu3 %v7927_v35  ;;  %2377 = vmatpush.msrb.mxu2 %v310_v24  ;;  %v7933_v35 = vunpack.i.l.bf16 %v6313_v45  ;;  %v7935_v24 = vld [vmem:[#allocation34_spill] sm:$0xff]  ;;  %v7938_v61 = vunpack.i.l.bf16 %v7936_v37  ;;  %vm7960_vm12 = vcmp.lt.s32.totalorder %v3901_v14, 123 }
 0x256   :  { %v1522_v4 = vsel %vm7929_vm13, %v7928_v19, %v3497_v36  ;;  %2325 = vmatpush.msra.mxu0 %v7931_v10  ;;  %v2921_v19 = vunpack.i.l.bf16 %v7935_v24  ;;  %2246 = vmatmul.f32.vlgmr.msrb.gmra.mxu1 %v5562_v54  ;;  %v7946_v54 = vld [vmem:[#allocation32_spill] sm:$0xff]  ;;  %vm7963_vm13 = vmmov %vm7951_vm2 }
 0x257   :  { %2330 = vmatpush.msra.mxu1 %v1522_v4  ;;  %2291 = vmatpush.msra.mxu3 %v7932_v53  ;;  %v1521_v57 = vsel %vm7934_vm4, %v3497_v36, %v7933_v35  ;;  %v476_v10 = vsel %vm7939_vm11, %v7938_v61, %v7937_v18  ;;  %v7940_v4 = vunpack.i.l.bf16 %v7922_v38  ;;  %v7942_v36 = vunpack.i.l.bf16 %v5612_v49 }
 0x258   :  { %2410 = vmatpush.msrb.mxu0 %v1521_v57  ;;  %v7944_v35 = vunpack.i.l.bf16 %v6309_v17  ;;  %v2901_v61 = vunpack.i.l.bf16 %v7946_v54  ;;  %v7947_v57 = vunpack.i.h.bf16 %v7840_v13  ;;  %v7948_v38 = vunpack.i.l.bf16 %v7840_v13 }
 0x259   :  { %v277_v53 = vsel %vm7878_vm9, %v7941_v46, %v7940_v4  ;;  %2292 = vmatpush.msra.mxu3 %v476_v10  ;;  %v1489_v37 = vsel %vm7943_vm6, %v7942_v36, %v3507_v6  ;;  %v7950_v49 = vunpack.i.h.bf16 %v7699_v40  ;;  %v1455_v13 = vsel %vm7954_vm8, %v3517_v22, %v6087_v9  ;;  %vm7971_vm6 = vmmov %vm7960_vm12 }
 0x25a   :  { %2378 = vmatpush.msrb.mxu2 %v277_v53  ;;  %v1488_v18 = vsel %vm7945_vm0, %v3507_v6, %v7944_v35  ;;  %v443_v10 = vsel %vm7949_vm1, %v7948_v38, %v7947_v57  ;;  %2331 = vmatpush.msra.mxu1 %v1489_v37  ;;  %v7952_v6 = vunpack.i.l.bf16 %v5687_v56  ;;  %v6480_v53 = vpop.permute.xlu0 %1294  ;;  %v7955_v38 = vld [vmem:[#allocation15_spill] sm:$0xff]  ;;  %v2877_v40 = vunpack.i.h.bf16 %v7885_v15  ;;  %v6494_v57 = vpop.permute.xlu1 %3659 }
 0x25b   :  { %2411 = vmatpush.msrb.mxu0 %v1488_v18  ;;  %v244_v4 = vsel %vm7951_vm2, %v7950_v49, %v2941_v27  ;;  %2293 = vmatpush.msra.mxu3 %v443_v10  ;;  %v2881_v36 = vunpack.i.l.bf16 %v7955_v38  ;;  %v7956_v37 = vunpack.i.h.bf16 %v7848_v43  ;;  %v7957_v35 = vunpack.i.l.bf16 %v7848_v43  ;;  %v7961_v10 = vld [vmem:[#allocation22_spill] sm:$0xff] }
 0x25c   :  { %2379 = vmatpush.msrb.mxu2 %v244_v4  ;;  %v1456_v46 = vsel %vm7953_vm7, %v7952_v6, %v3517_v22  ;;  %v7959_v18 = vunpack.i.h.bf16 %v7710_v60  ;;  %v2861_v49 = vunpack.i.l.bf16 %v7961_v10  ;;  %v7962_v6 = vunpack.i.h.bf16 %v7930_v58 }
 0x25d   :  { %v410_v56 = vsel %vm7958_vm10, %v7957_v35, %v7956_v37  ;;  %2332 = vmatpush.msra.mxu1 %v1456_v46  ;;  %2412 = vmatpush.msrb.mxu0 %v1455_v13  ;;  %v6503_v37 = vpop.permute.xlu2 %1362  ;;  %v7964_v60 = vunpack.i.h.bf16 %v7852_v44  ;;  %v7965_v13 = vunpack.i.l.bf16 %v7852_v44  ;;  %vm7966_vm4 = vcmp.lt.s32.totalorder %v3901_v14, 103 }
 0x25e   :  { %v211_v22 = vsel %vm7960_vm12, %v7959_v18, %v2921_v19  ;;  %2294 = vmatpush.msra.mxu3 %v410_v56  ;;  %v6501_v43 = vsel %vm7963_vm13, %v2941_v27, %v7962_v6  ;;  %v7967_v58 = vunpack.i.h.bf16 %v7722_v52  ;;  %vm7968_vm11 = vcmp.lt.s32.totalorder %v3901_v14, 124  ;;  %v7972_v6 = vld [vmem:[#allocation17_spill] sm:$0xff] }
 0x25f   :  { %2380 = vmatpush.msrb.mxu2 %v211_v22  ;;  %v377_v35 = vsel %vm7966_vm4, %v7965_v13, %v7964_v60  ;;  %2333 = vmatpush.msra.mxu1 %v244_v4  ;;  %vm7969_vm9 = vcmp.lt.s32.totalorder %v3901_v14, 13  ;;  %v3542_v18 = vunpack.i.h.bf16 %v5545_v16  ;;  %v7970_v44 = vunpack.i.h.bf16 %v7935_v24  ;;  %vm7978_vm2 = vmmov %vm7968_vm11 }
 0x260   :  { %2413 = vmatpush.msrb.mxu0 %v6501_v43  ;;  %v178_v27 = vsel %vm7968_vm11, %v7967_v58, %v2901_v61  ;;  %v6521_v56 = vsel %vm7969_vm9, %v6177_v26, %v6503_v37  ;;  %2295 = vmatpush.msra.mxu3 %v377_v35  ;;  %v2837_v52 = vunpack.i.h.bf16 %v7896_v41  ;;  %v2841_v60 = vunpack.i.l.bf16 %v7972_v6  ;;  %vm7992_vm11 = vmmov %vm7969_vm9 }
 0x261   :  { %2381 = vmatpush.msrb.mxu2 %v178_v27  ;;  %v6528_v4 = vsel %vm7971_vm6, %v2921_v19, %v7970_v44  ;;  %v7973_v13 = vunpack.i.h.bf16 %v7855_v51  ;;  %v7974_v58 = vunpack.i.l.bf16 %v7855_v51  ;;  %vm7975_vm0 = vcmp.lt.s32.totalorder %v3901_v14, 104  ;;  %2334 = vmatpush.msra.mxu1 %v211_v22 }
 0x262   :  { %2414 = vmatpush.msrb.mxu0 %v6528_v4  ;;  %vm7976_vm1 = vcmp.lt.s32.totalorder %v3901_v14, 125  ;;  %v3552_v19 = vunpack.i.h.bf16 %v5777_v3  ;;  %v7977_v35 = vunpack.i.h.bf16 %v7946_v54  ;;  %v7979_v22 = vunpack.i.h.bf16 %v7859_v2 }
 0x263   :  { %v344_v46 = vsel %vm7975_vm0, %v7974_v58, %v7973_v13  ;;  %v145_v24 = vsel %vm7976_vm1, %v2877_v40, %v2881_v36  ;;  %v7980_v44 = vunpack.i.l.bf16 %v7859_v2  ;;  %vm7981_vm7 = vcmp.lt.s32.totalorder %v3901_v14, 105  ;;  %2335 = vmatpush.msra.mxu1 %v178_v27 }
 0x264   :  { %2296 = vmatpush.msra.mxu3 %v344_v46  ;;  %2382 = vmatpush.msrb.mxu2 %v145_v24  ;;  %v6550_v51 = vsel %vm7978_vm2, %v2901_v61, %v7977_v35  ;;  %v7982_v46 = vunpack.i.h.bf16 %v7890_v50  ;;  %vm7983_vm8 = vcmp.lt.s32.totalorder %v3901_v14, 126  ;;  %v3562_v61 = vunpack.i.h.bf16 %v5891_v63  ;;  %v6573_v24 = vpop.permute.xlu0 %1228 }
 0x265   :  { %v311_v13 = vsel %vm7981_vm7, %v7980_v44, %v7979_v22  ;;  %2415 = vmatpush.msrb.mxu0 %v6550_v51  ;;  %v7984_v58 = vunpack.i.l.bf16 %v5545_v16  ;;  %vm7985_vm10 = vcmp.lt.s32.totalorder %v3901_v14, 12  ;;  %v3572_v35 = vunpack.i.h.bf16 %v5685_v34 }
 0x266   :  { %v112_v54 = vsel %vm7983_vm8, %v7982_v46, %v2861_v49  ;;  %2297 = vmatpush.msra.mxu3 %v311_v13  ;;  %vm7986_vm12 = vmmov %vm7985_vm10  ;;  %v7987_v22 = vunpack.i.h.bf16 %v7865_v39  ;;  %v7988_v44 = vunpack.i.l.bf16 %v7865_v39  ;;  %vm7989_vm13 = vcmp.lt.s32.totalorder %v3901_v14, 106 }
 0x267   :  { %2383 = vmatpush.msrb.mxu2 %v112_v54  ;;  %v1400_v2 = vsel %vm7985_vm10, %v7984_v58, %v3542_v18  ;;  %v1399_v27 = vsel %vm7986_vm12, %v3542_v18, %v6353_v25  ;;  %vm7990_vm4 = vcmp.lt.s32.totalorder %v3901_v14, 127  ;;  %v3647_v18 = vunpack.i.h.bf16 %v6340_v62 }
 0x268   :  { %v278_v13 = vsel %vm7989_vm13, %v7988_v44, %v7987_v22  ;;  %2336 = vmatpush.msra.mxu1 %v1400_v2  ;;  %2416 = vmatpush.msrb.mxu0 %v1399_v27  ;;  %v79_v16 = vsel %vm7990_vm4, %v2837_v52, %v2841_v60  ;;  %v3646_v46 = vunpack.i.l.bf16 %v6340_v62  ;;  %v7991_v39 = vunpack.i.l.bf16 %v5777_v3  ;;  %v6598_v27 = vpop.permute.xlu1 %1195  ;;  %v6600_v22 = vpop.permute.xlu2 %1263  ;;  %v3680_v3 = vld [vmem:[#allocation6 + $0x28] sm:$0xff] }
 0x269   :  { %2298 = vmatpush.msra.mxu3 %v278_v13  ;;  %2384 = vmatpush.msrb.mxu2 %v79_v16  ;;  %v1366_v58 = vsel %vm7969_vm9, %v3552_v19, %v6177_v26  ;;  %v3582_v2 = vunpack.i.h.bf16 %v5975_v5  ;;  %v3652_v44 = vunpack.i.h.bf16 %v6409_v59  ;;  %v3651_v13 = vunpack.i.l.bf16 %v6409_v59 }
 0x26a   :  { %v1367_v54 = vsel %vm7992_vm11, %v7991_v39, %v3552_v19  ;;  %2417 = vmatpush.msrb.mxu0 %v1366_v58  ;;  %v7993_v16 = vunpack.i.l.bf16 %v5891_v63  ;;  %vm7994_vm6 = vcmp.lt.s32.totalorder %v3901_v14, 14  ;;  %v1068_v19 = vsel %vm1067_vm14, %v3646_v46, %v3647_v18  ;;  %v6615_v39 = vld [vmem:[#allocation3 + $0x18] sm:$0xff] }
 0x26b   :  { %2337 = vmatpush.msra.mxu1 %v1367_v54  ;;  %2299 = vmatpush.msra.mxu3 %v5984_v11  ;;  %vm7995_vm0 = vmmov %vm7994_vm6  ;;  %v3592_v11 = vunpack.i.h.bf16 %v6089_v28  ;;  %v7996_v54 = vunpack.i.l.bf16 %v5685_v34  ;;  %vm7997_vm1 = vcmp.lt.s32.totalorder %v3901_v14, 15  ;;  %vm8000_vm7 = vcmp.lt.s32.totalorder %v3901_v14, 16 }
 0x26c   :  { %2385 = vmatpush.msrb.mxu2 %v3680_v3  ;;  %v1334_v26 = vsel %vm7994_vm6, %v7993_v16, %v3562_v61  ;;  %v1333_v63 = vsel %vm7995_vm0, %v3562_v61, %v6405_v31  ;;  %v3602_v3 = vunpack.i.h.bf16 %v5792_v30  ;;  %v3657_v16 = vunpack.i.h.bf16 %v6252_v29  ;;  %vm7998_vm2 = vmmov %vm7997_vm1 }
 0x26d   :  { %2338 = vmatpush.msra.mxu1 %v1334_v26  ;;  %2768 = vmatmul.msk.f32.vlgmr.msra.gmra.mxu2 %vm1966_vm3, %v6615_v39  ;;  %v1301_v58 = vsel %vm7997_vm1, %v7996_v54, %v3572_v35  ;;  %v1300_v61 = vsel %vm7998_vm2, %v3572_v35, %v6480_v53  ;;  %v7999_v26 = vunpack.i.l.bf16 %v5975_v5  ;;  %v3656_v34 = vunpack.i.l.bf16 %v6252_v29  ;;  %vm8004_vm12 = vmmov %vm8000_vm7  ;;  %v8152_v29 = vld [vmem:[#allocation170_spill] sm:$0xff] }
 0x26e   :  { %2300 = vmatpush.msra.mxu3 %v6013_v48  ;;  %2418 = vmatpush.msrb.mxu0 %v1333_v63  ;;  %v3662_v63 = vunpack.i.h.bf16 %v6494_v57  ;;  %v3661_v54 = vunpack.i.l.bf16 %v6494_v57  ;;  %vm8001_vm8 = vcmp.lt.s32.totalorder %v3901_v14, 38  ;;  %v8002_v5 = vunpack.i.l.bf16 %v7885_v15 }
 0x26f   :  { %2470 = vmatpush.msra.mxu2 %v1068_v19  ;;  %2339 = vmatpush.msra.mxu1 %v1301_v58  ;;  %v1268_v48 = vsel %vm8000_vm7, %v7999_v26, %v3582_v2  ;;  %v1035_v35 = vsel %vm8001_vm8, %v3651_v13, %v3652_v44  ;;  %vm8003_vm10 = vcmp.lt.s32.totalorder %v3901_v14, 125  ;;  %v6656_v58 = vpop.permute.xlu0 %1438  ;;  %vm8005_vm13 = vcmp.lt.s32.totalorder %v3901_v14, 39 }
 0x270   :  { %2301 = vmatpush.msra.mxu3 %v6040_v0  ;;  %2419 = vmatpush.msrb.mxu0 %v1300_v61  ;;  %v146_v19 = vsel %vm8003_vm10, %v8002_v5, %v2877_v40  ;;  %v1267_v0 = vsel %vm8004_vm12, %v3582_v2, %v6311_v47  ;;  %v3612_v61 = vunpack.i.h.bf16 %v6170_v12  ;;  %v1002_v26 = vsel %vm8005_vm13, %v3656_v34, %v3657_v16 }
 0x271   :  { %2471 = vmatpush.msra.mxu2 %v1035_v35  ;;  %2340 = vmatpush.msra.mxu1 %v1268_v48  ;;  %v8006_v15 = vunpack.i.l.bf16 %v6089_v28  ;;  %vm8007_vm4 = vcmp.lt.s32.totalorder %v3901_v14, 17  ;;  %v969_v2 = vsel %vm968_vm15, %v3661_v54, %v3662_v63  ;;  %v8008_v48 = vunpack.i.h.bf16 %v7890_v50 }
 0x272   :  { %2302 = vmatpush.msra.mxu3 %v146_v19  ;;  %2420 = vmatpush.msrb.mxu0 %v1267_v0  ;;  %v8009_v35 = vunpack.i.l.bf16 %v7890_v50  ;;  %vm8010_vm11 = vcmp.lt.s32.totalorder %v3901_v14, 126  ;;  %vm8011_vm9 = vmmov %vm8007_vm4  ;;  %v8012_v19 = vunpack.i.l.bf16 %v5792_v30  ;;  %vm8013_vm6 = vcmp.lt.s32.totalorder %v3901_v14, 18 }
 0x273   :  { %v1235_v40 = vsel %vm8007_vm4, %v8006_v15, %v3592_v11  ;;  %2472 = vmatpush.msra.mxu2 %v1002_v26  ;;  %v1234_v28 = vsel %vm8011_vm9, %v3592_v11, %v6573_v24  ;;  %v6686_v26 = vpop.permute.xlu2 %1164  ;;  %v8014_v50 = vunpack.i.l.bf16 %v7896_v41  ;;  %vm8015_vm0 = vcmp.lt.s32.totalorder %v3901_v14, 127  ;;  %vm8016_vm1 = vmmov %vm8013_vm6  ;;  %v8019_v41 = vld [vmem:[#allocation146_spill] sm:$0xff] }
 0x274   :  { %v113_v5 = vsel %vm8010_vm11, %v8009_v35, %v8008_v48  ;;  %2341 = vmatpush.msra.mxu1 %v1235_v40  ;;  %2421 = vmatpush.msrb.mxu0 %v1234_v28  ;;  %v1202_v0 = vsel %vm8013_vm6, %v8012_v19, %v3602_v3  ;;  %v1201_v11 = vsel %vm8016_vm1, %v3602_v3, %v6598_v27  ;;  %v6697_v40 = vpop.permute.xlu1 %1129  ;;  %v3622_v30 = vunpack.i.h.bf16 %v6254_v20  ;;  %v3682_v35 = vld [vmem:[#allocation6 + $0x20] sm:$0xff]  ;;  %v8023_v19 = vld [vmem:[#allocation151_spill] sm:$0xff] }
 0x275   :  { %2303 = vmatpush.msra.mxu3 %v113_v5  ;;  %2473 = vmatpush.msra.mxu2 %v969_v2  ;;  %v80_v15 = vsel %vm8015_vm0, %v8014_v50, %v2837_v52  ;;  %v8017_v2 = vunpack.i.l.bf16 %v6170_v12  ;;  %vm8018_vm2 = vcmp.lt.s32.totalorder %v3901_v14, 34  ;;  %v3627_v3 = vunpack.i.h.bf16 %v6245_v42  ;;  %v6712_v12 = vld [vmem:[#allocation3] sm:$0xff] }
 0x276   :  { %2342 = vmatpush.msra.mxu1 %v1202_v0  ;;  %2422 = vmatpush.msrb.mxu0 %v1201_v11  ;;  %vm8020_vm7 = vmmov %vm8018_vm2  ;;  %vm8021_vm8 = vcmp.lt.s32.totalorder %v3901_v14, 35  ;;  %v8022_v28 = vunpack.i.h.bf16 %v5735_v7  ;;  %v6722_v0 = vld [vmem:[#allocation3 + $0x8] sm:$0xff]  ;;  %v8024_v50 = vunpack.i.l.bf16 %v6254_v20  ;;  %v8026_v7 = vunpack.i.h.bf16 %v6070_v33 }
 0x277   :  { %2304 = vmatpush.msra.mxu3 %v80_v15  ;;  %v1169_v48 = vsel %vm8018_vm2, %v8017_v2, %v3612_v61  ;;  %2474 = vmatpush.msra.mxu2 %v8019_v41  ;;  %v1168_v52 = vsel %vm8020_vm7, %v3612_v61, %v6351_v32  ;;  %v1135_v5 = vsel %vm8021_vm8, %v3622_v30, %v6697_v40  ;;  %vm8025_vm10 = vmmov %vm8021_vm8  ;;  %vm8027_vm12 = vcmp.lt.s32.totalorder %v3901_v14, 38  ;;  %v1552_v11 = vpop.permute.xlu0 %1551  ;;  %v8028_v2 = vld [vmem:[#allocation147_spill] sm:$0xff] }
 0x278   :  { %2343 = vmatpush.msra.mxu1 %v1169_v48  ;;  %2423 = vmatpush.msrb.mxu0 %v1168_v52  ;;  %v1069_v61 = vsel %vm1067_vm14, %v8022_v28, %v3646_v46  ;;  %v1136_v15 = vsel %vm8025_vm10, %v8024_v50, %v3622_v30  ;;  %v1036_v46 = vsel %vm8027_vm12, %v8026_v7, %v3651_v13  ;;  %v8029_v48 = vunpack.i.l.bf16 %v6245_v42  ;;  %v8034_v52 = vld [vmem:[#allocation129_spill] sm:$0xff]  ;;  %v8038_v28 = vld [vmem:[#allocation159_spill] sm:$0xff]  ;;  %v8045_v7 = vld [vmem:[#allocation148_spill] sm:$0xff] }
 0x279   :  { %2305 = vmatpush.msra.mxu3 %v3682_v35  ;;  %2475 = vmatpush.msra.mxu2 %v8023_v19  ;;  %vm8030_vm13 = vcmp.lt.s32.totalorder %v3901_v14, 36  ;;  %v8032_v33 = vunpack.i.h.bf16 %v6179_v55  ;;  %vm8033_vm11 = vcmp.lt.s32.totalorder %v3901_v14, 39  ;;  %v8035_v42 = vunpack.i.h.bf16 %v5992_v8  ;;  %v8037_v8 = vld [vmem:[#allocation134_spill] sm:$0xff]  ;;  %v8043_v50 = vld [vmem:[#allocation65_spill] sm:$0xff] }
 0x27a   :  { %2306 = vmatmul.f32.vlgmr.msra.gmra.mxu3 %v6712_v12  ;;  %2326 = vmatmul.f32.vlgmr.msra.gmra.mxu0 %v6722_v0  ;;  %v1103_v20 = vsel %vm8030_vm13, %v8029_v48, %v3627_v3  ;;  %vm8031_vm4 = vmmov %vm8030_vm13  ;;  %v8036_v55 = vunpack.i.h.bf16 %v5889_v1  ;;  %v8040_v1 = vld [vmem:[#allocation66_spill] sm:$0xff]  ;;  %v8049_v48 = vld [vmem:[#allocation141_spill] sm:$0xff]  ;;  %vm8053_vm9 = vcmp.lt.s32.totalorder %v3901_v14, 101  ;;  %vm8060_vm6 = vcmp.lt.s32.totalorder %v3901_v14, 102 }
 0x27b   :  { %2390 = vmatpush.msrb.mxu3 %v1069_v61  ;;  %2344 = vmatpush.msra.mxu1 %v1136_v15  ;;  %v1102_v30 = vsel %vm8031_vm4, %v3627_v3, %v6420_v23  ;;  %v1003_v13 = vsel %vm8033_vm11, %v8032_v33, %v3656_v34  ;;  %v6747_v41 = vpop.permute.xlu2 %1537  ;;  %v1554_v35 = vsel %vm1553_vm5, %v8035_v42, %v1552_v11  ;;  %v8039_v61 = vld [vmem:[#allocation130_spill] sm:$0xff]  ;;  %v8044_v15 = vld [vmem:[#allocation72_spill] sm:$0xff]  ;;  %v8052_v33 = vunpack.i.l.bf16 %v7883_v21 }
 0x27c   :  { %2424 = vmatpush.msrb.mxu0 %v1135_v5  ;;  %2476 = vmatpush.msra.mxu2 %v8028_v2  ;;  %v1561_v3 = vsel %vm1553_vm5, %v1552_v11, %v6747_v41  ;;  %v970_v34 = vsel %vm968_vm15, %v8036_v55, %v3661_v54  ;;  %v6763_v5 = vld [vmem:[#allocation3 + $0x10] sm:$0xff]  ;;  %v8041_v54 = vld [vmem:[#allocation155_spill] sm:$0xff]  ;;  %v8047_v11 = vld [vmem:[#allocation76_spill] sm:$0xff]  ;;  %v3637_v42 = vunpack.i.h.bf16 %v6313_v45  ;;  %vm8067_vm0 = vcmp.lt.s32.totalorder %v3901_v14, 103 }
 0x27d   :  { %2391 = vmatpush.msrb.mxu3 %v1036_v46  ;;  %2345 = vmatpush.msra.mxu1 %v1103_v20  ;;  %v8042_v19 = vld [vmem:[#allocation110_spill] sm:$0xff]  ;;  %v8046_v46 = vld [vmem:[#allocation116_spill] sm:$0xff]  ;;  %v8050_v20 = vld [vmem:[#allocation111_spill] sm:$0xff]  ;;  %vm8073_vm1 = vcmp.lt.s32.totalorder %v3901_v14, 119  ;;  %vm8078_vm2 = vcmp.lt.s32.totalorder %v3901_v14, 104  ;;  %vm8082_vm7 = vcmp.lt.s32.totalorder %v3901_v14, 120 }
 0x27e   :  { %2425 = vmatpush.msrb.mxu0 %v1102_v30  ;;  %2477 = vmatpush.msra.mxu2 %v8034_v52  ;;  %v8048_v2 = vld [vmem:[#allocation68_spill] sm:$0xff]  ;;  %v8051_v30 = vunpack.i.h.bf16 %v7883_v21  ;;  %v8054_v52 = vld [vmem:[#allocation69_spill] sm:$0xff]  ;;  %vm8087_vm8 = vcmp.lt.s32.totalorder %v3901_v14, 105  ;;  %vm8091_vm10 = vcmp.lt.s32.totalorder %v3901_v14, 121  ;;  %vm8096_vm12 = vcmp.lt.s32.totalorder %v3901_v14, 106  ;;  %vm8106_vm13 = vmmov %vm8073_vm1 }
 0x27f   :  { %2392 = vmatpush.msrb.mxu3 %v1003_v13  ;;  %2346 = vmatmul.f32.vlgmr.msra.gmra.mxu1 %v6763_v5  ;;  %v8057_v55 = vld [vmem:[#allocation57_spill] sm:$0xff]  ;;  %vm8110_vm4 = vmmov %vm8082_vm7  ;;  %vm8113_vm11 = vcmp.lt.s32.totalorder %v3901_v14, 12 }
 0x280   :  { %2525 = vmatpush.msra.mxu0 %v1561_v3  ;;  %2478 = vmatpush.msra.mxu2 %v8037_v8  ;;  %v441_v13 = vsel %vm8053_vm9, %v8052_v33, %v8051_v30  ;;  %v8056_v3 = vld [vmem:[#allocation89_spill] sm:$0xff]  ;;  %v8059_v8 = vunpack.i.l.bf16 %v8057_v55  ;;  %vm8115_vm9 = vcmp.lt.s32.totalorder %v3901_v14, 125 }
 0x281   :  { %2393 = vmatpush.msrb.mxu3 %v970_v34  ;;  %2445 = vmatpush.msrb.mxu1 %v1554_v35  ;;  %v8055_v35 = vld [vmem:[#allocation137_spill] sm:$0xff]  ;;  %v8058_v34 = vunpack.i.h.bf16 %v8057_v55 }
 0x282   :  { %2386 = vmatmul.f32.vlgmr.msrb.gmra.mxu2 %v6712_v12  ;;  %2426 = vmatmul.f32.vlgmr.msrb.gmra.mxu0 %v6763_v5  ;;  %v8061_v21 = vld [vmem:[#allocation53_spill] sm:$0xff] }
 0x283   :  { %2394 = vmatpush.msrb.mxu3 %v8038_v28  ;;  %2479 = vmatpush.msra.mxu2 %v8039_v61  ;;  %v408_v28 = vsel %vm8060_vm6, %v8059_v8, %v8058_v34  ;;  %v3642_v61 = vunpack.i.h.bf16 %v6309_v17  ;;  %v8079_v34 = vld [vmem:[#allocation119_spill] sm:$0xff]  ;;  %v8080_v8 = vld [vmem:[#allocation160_spill] sm:$0xff]  ;;  %vm8117_vm6 = vmmov %vm8091_vm10 }
 0x284   :  { %2450 = vmatpush.msra.mxu1 %v8040_v1  ;;  %2530 = vmatpush.msrb.mxu0 %v8043_v50  ;;  %v8062_v1 = vld [vmem:[#allocation131_spill] sm:$0xff] }
 0x285   :  { %2395 = vmatpush.msrb.mxu3 %v8041_v54  ;;  %2480 = vmatpush.msra.mxu2 %v8042_v19  ;;  %v8063_v54 = vld [vmem:[#allocation95_spill] sm:$0xff] }
 0x286   :  { %2451 = vmatpush.msra.mxu1 %v8044_v15  ;;  %2531 = vmatpush.msrb.mxu0 %v8047_v11  ;;  %v8064_v19 = vld [vmem:[#allocation55_spill] sm:$0xff]  ;;  %v8068_v11 = vld [vmem:[#allocation60_spill] sm:$0xff] }
 0x287   :  { %2396 = vmatpush.msrb.mxu3 %v8045_v7  ;;  %2481 = vmatpush.msra.mxu2 %v8046_v46  ;;  %v8065_v50 = vunpack.i.h.bf16 %v8064_v19  ;;  %v8066_v15 = vunpack.i.l.bf16 %v8064_v19  ;;  %v6808_v46 = vpop.permute.xlu1 %1395 }
 0x288   :  { %2452 = vmatpush.msra.mxu1 %v8048_v2  ;;  %2532 = vmatpush.msrb.mxu0 %v8054_v52  ;;  %v8069_v2 = vld [vmem:[#allocation123_spill] sm:$0xff]  ;;  %v8075_v52 = vld [vmem:[#allocation40_spill] sm:$0xff] }
 0x289   :  { %2397 = vmatpush.msrb.mxu3 %v8049_v48  ;;  %2482 = vmatpush.msra.mxu2 %v8050_v20  ;;  %v375_v7 = vsel %vm8067_vm0, %v8066_v15, %v8065_v50  ;;  %v8070_v48 = vld [vmem:[#allocation90_spill] sm:$0xff]  ;;  %vm8120_vm0 = vcmp.lt.s32.totalorder %v3901_v14, 13 }
 0x28a   :  { %2453 = vmatpush.msra.mxu1 %v441_v13  ;;  %2533 = vmatpush.msrb.mxu0 %v8061_v21  ;;  %v8071_v20 = vld [vmem:[#allocation162_spill] sm:$0xff]  ;;  %v8074_v13 = vld [vmem:[#allocation56_spill] sm:$0xff] }
 0x28b   :  { %2398 = vmatpush.msrb.mxu3 %v8055_v35  ;;  %2483 = vmatpush.msra.mxu2 %v8056_v3  ;;  %v8072_v30 = vunpack.i.l.bf16 %v8071_v20  ;;  %v8076_v35 = vunpack.i.h.bf16 %v8075_v52  ;;  %v8077_v3 = vunpack.i.l.bf16 %v8075_v52  ;;  %v8092_v20 = vld [vmem:[#allocation48_spill] sm:$0xff] }
 0x28c   :  { %2454 = vmatpush.msra.mxu1 %v408_v28  ;;  %2534 = vmatpush.msrb.mxu0 %v8068_v11  ;;  %v8081_v28 = vunpack.i.l.bf16 %v8080_v8  ;;  %v8089_v11 = vld [vmem:[#allocation145_spill] sm:$0xff]  ;;  %v8100_v8 = vld [vmem:[#allocation98_spill] sm:$0xff] }
 0x28d   :  { %2399 = vmatpush.msrb.mxu3 %v8062_v1  ;;  %2484 = vmatpush.msra.mxu2 %v8063_v54  ;;  %v1527_v33 = vsel %vm8073_vm1, %v3637_v42, %v8072_v30  ;;  %v342_v55 = vsel %vm8078_vm2, %v8077_v3, %v8076_v35  ;;  %v8083_v1 = vld [vmem:[#allocation41_spill] sm:$0xff]  ;;  %v8093_v30 = vld [vmem:[#allocation43_spill] sm:$0xff]  ;;  %v8097_v35 = vld [vmem:[#allocation102_spill] sm:$0xff]  ;;  %v6850_v3 = vpop.permute.xlu0 %1329  ;;  %vm8122_vm1 = vcmp.lt.s32.totalorder %v3901_v14, 126  ;;  %vm8126_vm2 = vcmp.lt.s32.totalorder %v3901_v14, 14 }
 0x28e   :  { %2455 = vmatpush.msra.mxu1 %v375_v7  ;;  %2535 = vmatpush.msrb.mxu0 %v8074_v13  ;;  %v1494_v21 = vsel %vm8082_vm7, %v3642_v61, %v8081_v28  ;;  %v8084_v54 = vld [vmem:[#allocation45_spill] sm:$0xff]  ;;  %v8088_v7 = vld [vmem:[#allocation112_spill] sm:$0xff]  ;;  %v8095_v13 = vunpack.i.l.bf16 %v8093_v30  ;;  %vm8128_vm7 = vcmp.lt.s32.totalorder %v3901_v14, 127 }
 0x28f   :  { %2400 = vmatpush.msrb.mxu3 %v8069_v2  ;;  %2485 = vmatpush.msra.mxu2 %v8070_v48  ;;  %v8085_v19 = vunpack.i.h.bf16 %v8084_v54  ;;  %v8086_v50 = vunpack.i.l.bf16 %v8084_v54  ;;  %v8090_v2 = vunpack.i.l.bf16 %v8089_v11  ;;  %v6856_v28 = vpop.permute.xlu1 %1296  ;;  %v8103_v54 = vld [vmem:[#allocation91_spill] sm:$0xff]  ;;  %v8109_v11 = vunpack.i.l.bf16 %v6309_v17  ;;  %v8116_v17 = vld [vmem:[#allocation16_spill] sm:$0xff] }
 0x290   :  { %2456 = vmatpush.msra.mxu1 %v342_v55  ;;  %2536 = vmatpush.msrb.mxu0 %v8083_v1  ;;  %v8098_v55 = vld [vmem:[#allocation44_spill] sm:$0xff]  ;;  %v8102_v1 = vld [vmem:[#allocation82_spill] sm:$0xff] }
 0x291   :  { %2570 = vmatpush.msrb.mxu2 %v1527_v33  ;;  %2401 = vmatpush.msrb.mxu3 %v8079_v34  ;;  %v309_v15 = vsel %vm8087_vm8, %v8086_v50, %v8085_v19  ;;  %v1461_v48 = vsel %vm8091_vm10, %v6656_v58, %v8090_v2  ;;  %v8094_v33 = vunpack.i.h.bf16 %v8093_v30  ;;  %v8099_v34 = vld [vmem:[#allocation77_spill] sm:$0xff]  ;;  %v8105_v50 = vunpack.i.l.bf16 %v6313_v45 }
 0x292   :  { %2457 = vmatpush.msra.mxu1 %v309_v15  ;;  %2537 = vmatpush.msrb.mxu0 %v8092_v20  ;;  %v8104_v19 = vld [vmem:[#allocation37_spill] sm:$0xff]  ;;  %v8118_v20 = vld [vmem:[#allocation163_spill] sm:$0xff]  ;;  %vm8132_vm8 = vcmp.lt.s32.totalorder %v3901_v14, 15  ;;  %vm8137_vm10 = vcmp.lt.s32.totalorder %v3901_v14, 16 }
 0x293   :  { %2571 = vmatpush.msrb.mxu2 %v1494_v21  ;;  %2402 = vmatpush.msrb.mxu3 %v8088_v7  ;;  %v276_v52 = vsel %vm8096_vm12, %v8095_v13, %v8094_v33  ;;  %v8101_v21 = vld [vmem:[#allocation30_spill] sm:$0xff]  ;;  %v1528_v15 = vsel %vm8106_vm13, %v8105_v50, %v3637_v42  ;;  %v8108_v7 = vld [vmem:[#allocation33_spill] sm:$0xff]  ;;  %v8114_v42 = vunpack.i.h.bf16 %v7955_v38  ;;  %v8119_v30 = vunpack.i.l.bf16 %v8118_v20  ;;  %v8135_v50 = vld [vmem:[#allocation156_spill] sm:$0xff] }
 0x294   :  { %2458 = vmatpush.msra.mxu1 %v276_v52  ;;  %2538 = vmatpush.msrb.mxu0 %v8098_v55  ;;  %v8111_v2 = vld [vmem:[#allocation165_spill] sm:$0xff]  ;;  %v8121_v38 = vunpack.i.h.bf16 %v7961_v10  ;;  %v8123_v52 = vld [vmem:[#allocation24_spill] sm:$0xff]  ;;  %vm8138_vm12 = vmmov %vm8113_vm11  ;;  %vm8144_vm13 = vcmp.lt.s32.totalorder %v3901_v14, 17 }
 0x295   :  { %2572 = vmatpush.msrb.mxu2 %v1461_v48  ;;  %2403 = vmatpush.msrb.mxu3 %v8097_v35  ;;  %v8112_v48 = vunpack.i.l.bf16 %v8111_v2  ;;  %v1372_v33 = vsel %vm8120_vm0, %v6503_v37, %v8119_v30  ;;  %v1231_v13 = vpop.permute.xlu0 %1230  ;;  %v8127_v37 = vunpack.i.h.bf16 %v7972_v6  ;;  %v8129_v55 = vld [vmem:[#allocation20_spill] sm:$0xff]  ;;  %v8133_v6 = vld [vmem:[#allocation166_spill] sm:$0xff]  ;;  %vm8157_vm0 = vmmov %vm8132_vm8 }
 0x296   :  { %2459 = vmatpush.msra.mxu1 %v6501_v43  ;;  %2539 = vmatpush.msrb.mxu0 %v8101_v21  ;;  %v8107_v43 = vld [vmem:[#allocation83_spill] sm:$0xff] }
 0x297   :  { %2573 = vmatpush.msrb.mxu2 %v8099_v34  ;;  %2404 = vmatpush.msrb.mxu3 %v8100_v8  ;;  %v1405_v45 = vsel %vm8113_vm11, %v6808_v46, %v8112_v48  ;;  %v78_v10 = vsel %vm8128_vm7, %v2841_v60, %v8127_v37  ;;  %v8130_v34 = vld [vmem:[#allocation167_spill] sm:$0xff]  ;;  %v8134_v60 = vunpack.i.l.bf16 %v8133_v6  ;;  %vm8150_vm11 = vcmp.lt.s32.totalorder %v3901_v14, 18  ;;  %vm8167_vm7 = vmmov %vm8144_vm13  ;;  %v8172_v37 = vld [vmem:[#allocation138_spill] sm:$0xff] }
 0x298   :  { %2460 = vmatpush.msra.mxu1 %v6528_v4  ;;  %2540 = vmatpush.msrb.mxu0 %v8104_v19  ;;  %v1495_v4 = vsel %vm8110_vm4, %v8109_v11, %v3642_v61  ;;  %v1462_v61 = vsel %vm8117_vm6, %v6087_v9, %v6656_v58  ;;  %v8124_v9 = vld [vmem:[#allocation150_spill] sm:$0xff]  ;;  %v8131_v8 = vunpack.i.l.bf16 %v8130_v34  ;;  %vm8147_vm4 = vcmp.lt.s32.totalorder %v3901_v14, 39  ;;  %v8181_v34 = vld [vmem:[#allocation87_spill] sm:$0xff] }
 0x299   :  { %2574 = vmatpush.msrb.mxu2 %v8102_v1  ;;  %2405 = vmatpush.msrb.mxu3 %v8103_v54  ;;  %v8125_v58 = vunpack.i.l.bf16 %v8124_v9  ;;  %v1075_v54 = vsel %vm1067_vm14, %v3647_v18, %v8134_v60  ;;  %vm8141_vm14 = vcmp.lt.s32.totalorder %v3901_v14, 38  ;;  %v8142_v18 = vld [vmem:[#allocation168_spill] sm:$0xff]  ;;  %vm8156_vm6 = vcmp.lt.s32.totalorder %v3901_v14, 34 }
 0x29a   :  { %2406 = vmatmul.f32.vlgmr.msrb.gmra.mxu3 %v6722_v0  ;;  %2461 = vmatpush.msra.mxu1 %v6550_v51  ;;  %v144_v51 = vsel %vm8115_vm9, %v2881_v36, %v8114_v42  ;;  %v111_v36 = vsel %vm8122_vm1, %v2861_v49, %v8121_v38  ;;  %v1198_v49 = vpop.permute.xlu1 %1197  ;;  %v1306_v1 = vsel %vm8132_vm8, %v6856_v28, %v8131_v8  ;;  %v3687_v42 = vld [vmem:[#allocation6 + $0x38] sm:$0xff]  ;;  %vm8151_vm9 = vmmov %vm8126_vm2  ;;  %vm8160_vm1 = vcmp.lt.s32.totalorder %v3901_v14, 35  ;;  %v8161_v38 = vld [vmem:[#allocation144_spill] sm:$0xff] }
 0x29b   :  { %2490 = vmatpush.msra.mxu3 %v1528_v15  ;;  %2575 = vmatpush.msrb.mxu2 %v8107_v43  ;;  %v1339_v35 = vsel %vm8126_vm2, %v6850_v3, %v8125_v58  ;;  %v8136_v15 = vunpack.i.l.bf16 %v8135_v50  ;;  %v1398_v43 = vsel %vm8138_vm12, %v6353_v25, %v6808_v46  ;;  %v8145_v25 = vld [vmem:[#allocation161_spill] sm:$0xff]  ;;  %vm8165_vm2 = vcmp.lt.s32.totalorder %v3901_v14, 36  ;;  %vm8169_vm8 = vmmov %vm8150_vm11  ;;  %v8182_v8 = vld [vmem:[#allocation99_spill] sm:$0xff]  ;;  %v1987_v14 = vpop.f32.mrf.mxu0 }
 0x29c   :  { %2541 = vmatpush.msrb.mxu0 %v8108_v7  ;;  %2462 = vmatpush.msra.mxu1 %v144_v51  ;;  %v8146_v46 = vunpack.i.l.bf16 %v8145_v25  ;;  %v1233_v58 = vsel %vm8167_vm7, %v6573_v24, %v1231_v13  ;;  %vm8173_vm12 = vmmov %vm8160_vm1 }
 0x29d   :  { %2491 = vmatpush.msra.mxu3 %v1495_v4  ;;  %2576 = vmatpush.msrb.mxu2 %v1405_v45  ;;  %v8143_v4 = vunpack.i.l.bf16 %v8142_v18  ;;  %v1132_v51 = vpop.permute.xlu0 %1131 }
 0x29e   :  { %2542 = vmatpush.msrb.mxu0 %v8116_v17  ;;  %2463 = vmatpush.msra.mxu1 %v111_v36  ;;  %v1009_v59 = vsel %vm8147_vm4, %v3657_v16, %v8146_v46  ;;  %v8153_v17 = vunpack.i.l.bf16 %v8152_v29  ;;  %v1134_v24 = vsel %vm8173_vm12, %v6697_v40, %v1132_v51  ;;  %v8179_v40 = vld [vmem:[#allocation120_spill] sm:$0xff] }
 0x29f   :  { %2492 = vmatpush.msra.mxu3 %v1462_v61  ;;  %2577 = vmatpush.msrb.mxu2 %v1372_v33  ;;  %v1240_v2 = vsel %vm8144_vm13, %v1231_v13, %v8143_v4  ;;  %v8154_v61 = vld [vmem:[#allocation164_spill] sm:$0xff] }
 0x2a0   :  { %2543 = vmatpush.msrb.mxu0 %v8123_v52  ;;  %2464 = vmatpush.msra.mxu1 %v78_v10  ;;  %v976_v16 = vsel %vm968_vm15, %v3662_v63, %v8153_v17  ;;  %v8155_v20 = vunpack.i.l.bf16 %v8154_v61  ;;  %vm8162_vm15 = vmmov %vm8137_vm10  ;;  %v8163_v52 = vld [vmem:[#allocation173_spill] sm:$0xff]  ;;  %v8174_v13 = vld [vmem:[#allocation132_spill] sm:$0xff] }
 0x2a1   :  { %2493 = vmatpush.msra.mxu3 %v8101_v21  ;;  %2578 = vmatpush.msrb.mxu2 %v1339_v35  ;;  %v3686_v21 = vld [vmem:[#allocation6 + $0x30] sm:$0xff]  ;;  %v1266_v36 = vsel %vm8162_vm15, %v6311_v47, %v6600_v22  ;;  %v8164_v9 = vunpack.i.l.bf16 %v8163_v52  ;;  %v8168_v35 = vld [vmem:[#allocation149_spill] sm:$0xff]  ;;  %v1200_v47 = vsel %vm8169_vm8, %v6598_v27, %v1198_v49 }
 0x2a2   :  { %2544 = vmatpush.msrb.mxu0 %v8129_v55  ;;  %2465 = vmatpush.msra.mxu1 %v3686_v21  ;;  %v1174_v30 = vsel %vm8156_vm6, %v6686_v26, %v8155_v20  ;;  %v1099_v33 = vpop.permute.xlu1 %1098  ;;  %v8176_v10 = vld [vmem:[#allocation174_spill] sm:$0xff]  ;;  %v8180_v55 = vld [vmem:[#allocation113_spill] sm:$0xff] }
 0x2a3   :  { %2494 = vmatpush.msra.mxu3 %v8104_v19  ;;  %2579 = vmatpush.msrb.mxu2 %v1306_v1  ;;  %v1273_v19 = vsel %vm8137_vm10, %v6600_v22, %v8136_v15  ;;  %v8170_v22 = vld [vmem:[#allocation128_spill] sm:$0xff]  ;;  %vm8171_vm10 = vmmov %vm8156_vm6  ;;  %v2027_v1 = vpop.f32.mrf.mxu2  ;;  %v2087_v21 = vpop.f32.mrf.mxu0 }
 0x2a4   :  { %2486 = vmatmul.f32.vlgmr.msra.gmra.mxu2 %v6722_v0  ;;  %2769 = vmatmul.msk.f32.vlgmr.msrb.gmra.mxu1 %vm1966_vm3, %v6615_v39 }
 0x2a5   :  { %2495 = vmatpush.msra.mxu3 %v8108_v7  ;;  %2550 = vmatpush.msrb.mxu1 %v1075_v54  ;;  %v8139_v7 = vld [vmem:[#allocation169_spill] sm:$0xff] }
 0x2a6   :  { %2580 = vmatpush.msrb.mxu2 %v1273_v19  ;;  %v8140_v11 = vunpack.i.l.bf16 %v8139_v7  ;;  %2770 = vmatmul.msk.f32.vlgmr.msra.gmra.mxu0 %vm1966_vm3, %v6615_v39 }
 0x2a7   :  { %2496 = vmatpush.msra.mxu3 %v1398_v43  ;;  %2545 = vmatpush.msrb.mxu0 %v3687_v42 }
 0x2a8   :  { %v1042_v62 = vsel %vm8141_vm14, %v3652_v44, %v8140_v11  ;;  %2581 = vmatpush.msrb.mxu2 %v1240_v2  ;;  %v8148_v44 = vld [vmem:[#allocation171_spill] sm:$0xff]  ;;  %vm8175_vm14 = vmmov %vm8165_vm2 }
 0x2a9   :  { %2551 = vmatpush.msrb.mxu1 %v1042_v62  ;;  %2497 = vmatpush.msra.mxu3 %v6521_v56  ;;  %v8149_v48 = vunpack.i.l.bf16 %v8148_v44  ;;  %v1332_v56 = vsel %vm8151_vm9, %v6405_v31, %v6850_v3  ;;  %v1299_v31 = vsel %vm8157_vm0, %v6480_v53, %v6856_v28  ;;  %v8158_v3 = vld [vmem:[#allocation172_spill] sm:$0xff]  ;;  %v1108_v53 = vsel %vm8165_vm2, %v1099_v33, %v8164_v9 }
 0x2aa   :  { %v8159_v57 = vunpack.i.l.bf16 %v8158_v3  ;;  %v8166_v28 = vld [vmem:[#allocation152_spill] sm:$0xff]  ;;  %v1101_v27 = vsel %vm8175_vm14, %v6420_v23, %v1099_v33 }
 0x2ab   :  { %v1207_v45 = vsel %vm8150_vm11, %v1198_v49, %v8149_v48  ;;  %2552 = vmatpush.msrb.mxu1 %v1009_v59  ;;  %2498 = vmatpush.msra.mxu3 %v1332_v56  ;;  %v8177_v49 = vunpack.i.l.bf16 %v8176_v10  ;;  %v8183_v23 = vld [vmem:[#allocation92_spill] sm:$0xff]  ;;  %v2127_v60 = vpop.f32.mrf.mxu2 }
 0x2ac   :  { %2582 = vmatpush.msrb.mxu2 %v1207_v45  ;;  %v1141_v63 = vsel %vm8160_vm1, %v1132_v51, %v8159_v57  ;;  %2466 = vmatmul.f32.vlgmr.msra.gmra.mxu1 %v6712_v12  ;;  %v2611_v48 = vld [vmem:[#allocation6 + $0x4] ss:$8 sm:$0xf] }
 0x2ad   :  { %2553 = vmatpush.msrb.mxu1 %v976_v16  ;;  %2499 = vmatpush.msra.mxu3 %v1299_v31  ;;  %v2612_v45 = vld [vmem:[#allocation6 + $0x4] ss:$8 sm:$0xf0] }
 0x2ae   :  { %2583 = vmatpush.msrb.mxu2 %v1174_v30  ;;  %2546 = vmatmul.f32.vlgmr.msrb.gmra.mxu0 %v6712_v12  ;;  %v1167_v12 = vsel %vm8171_vm10, %v6351_v32, %v6686_v26  ;;  %v1560_v32 = vsel %vm1553_vm5, %v6747_v41, %v8177_v49  ;;  %v8178_v26 = vld [vmem:[#allocation108_spill] sm:$0xff]  ;;  %v2007_v41 = vpop.f32.mrf.mxu1  ;;  %v2613_v16 = vor.u32 %v2612_v45, %v2611_v48 }
 0x2af   :  { %2554 = vmatpush.msrb.mxu1 %v8161_v38  ;;  %2500 = vmatpush.msra.mxu3 %v1266_v36  ;;  %v2008_v46 = vadd.f32 %v2007_v41, %v1987_v14 }
 0x2b0   :  { %2584 = vmatpush.msrb.mxu2 %v1141_v63  ;;  %v2616_v31 = vperm.slane %v2613_v16, 1  ;;  %v2615_v38 = vperm.slane %v2613_v16, 0  ;;  %v2617_v52 = vperm.slane %v2613_v16, 2 }
 0x2b1   :  { %2555 = vmatpush.msrb.mxu1 %v8166_v28  ;;  %2501 = vmatpush.msra.mxu3 %v1233_v58  ;;  %v2187_v50 = vpop.f32.mrf.mxu0  ;;  %v2028_v17 = vadd.f32 %v2027_v1, %v2008_v46  ;;  %v2621_v1 = vperm.slane %v2613_v16, 6  ;;  %v2622_v46 = vperm.slane %v2613_v16, 7 }
 0x2b2   :  { %2585 = vmatpush.msrb.mxu2 %v1108_v53 }
 0x2b3   :  { %2586 = vmatmul.f32.vlgmr.msrb.gmra.mxu2 %v6763_v5  ;;  %2556 = vmatpush.msrb.mxu1 %v8168_v35  ;;  %v2167_v19 = vpop.f32.mrf.mxu2  ;;  %v2618_v35 = vperm.slane %v2613_v16, 3 }
 0x2b4   :  { %2502 = vmatpush.msra.mxu3 %v1200_v47 }
 0x2b5   :  { %2557 = vmatpush.msrb.mxu1 %v8170_v22 }
 0x2b6   :  { %2503 = vmatpush.msra.mxu3 %v1167_v12  ;;  %v2107_v6 = vpop.f32.mrf.mxu1 }
 0x2b7   :  { %2558 = vmatpush.msrb.mxu1 %v8172_v37 }
 0x2b8   :  { %2504 = vmatpush.msra.mxu3 %v1134_v24 }
 0x2b9   :  { %2559 = vmatpush.msrb.mxu1 %v8174_v13 }
 0x2ba   :  { %2505 = vmatpush.msra.mxu3 %v1101_v27  ;;  %v2287_v7 = vpop.f32.mrf.mxu0  ;;  %v2619_v27 = vperm.slane %v2613_v16, 4 }
 0x2bb   :  { %2560 = vmatpush.msrb.mxu1 %v8178_v26  ;;  %2506 = vmatmul.f32.vlgmr.msra.gmra.mxu3 %v6763_v5  ;;  %v2047_v5 = vpop.f32.mrf.mxu3 }
 0x2bc   :  { %2605 = vmatpush.msrb.mxu3 %v1560_v32  ;;  %v7037_v63 = vadd.f32 %v2047_v5, %v2028_v17 }
 0x2bd   :  { %2561 = vmatpush.msrb.mxu1 %v8179_v40  ;;  %v2620_v40 = vperm.slane %v2613_v16, 5 }
 0x2be   :  { %v2207_v15 = vpop.f32.mrf.mxu1  ;;  %v2631_v37 = vmul.f32 %v2615_v38, %v7037_v63 }
 0x2bf   :  { %2562 = vmatpush.msrb.mxu1 %v8180_v55 }
 0x2c1   :  { %2563 = vmatpush.msrb.mxu1 %v8181_v34  ;;  %v2648_v34 = vmul.f32 %v2631_v37, %v2631_v37 }
 0x2c3   :  { %2564 = vmatpush.msrb.mxu1 %v8182_v8  ;;  %2771 = vmatmul.msk.f32.vlgmr.msrb.gmra.mxu3 %vm1966_vm3, %v6615_v39  ;;  %v2067_v54 = vpop.f32.mrf.mxu3 }
 0x2c4   :  { %v2088_v25 = vadd.f32 %v2087_v21, %v2067_v54 }
 0x2c5   :  { %2565 = vmatpush.msrb.mxu1 %v8183_v23 }
 0x2c6   :  { %2566 = vmatmul.f32.vlgmr.msrb.gmra.mxu1 %v6722_v0  ;;  %v2108_v42 = vadd.f32 %v2107_v6, %v2088_v25 }
 0x2c8   :  { %v2267_v62 = vpop.f32.mrf.mxu2  ;;  %v7035_v33 = vadd.f32 %v2127_v60, %v2108_v42 }
 0x2ca   :  { %v2632_v28 = vmul.f32 %v2616_v31, %v7035_v33  ;;  %v3813_v31 = vmov 0  }
 0x2cb   :  { %v2147_v43 = vpop.f32.mrf.mxu3  ;;  %3663 = vset.pattern.permute.xlu2 %v3813_v31 }
 0x2cc   :  { %v2168_v59 = vadd.f32 %v2167_v19, %v2147_v43  ;;  %v2649_v10 = vmul.f32 %v2632_v28, %v2632_v28  ;;  %v2639_v14 = vadd.f32 %v2632_v28, %v2631_v37  ;;  %v2680_v37 = vld [vmem:[%s7072_s2] sm:$0xff]  ;;  %s3816_s2 = smov [#allocation8]  }
 0x2cd   :  { %s2751_s12 = sshll.u32 %s3816_s2, 4  ;;  %s2752_s12 = int_to_ptr.vmem [resolvable:$true] %s2751_s12 }
 0x2ce   :  { %v2188_v61 = vadd.f32 %v2187_v50, %v2168_v59  ;;  %v2656_v5 = vadd.f32 %v2649_v10, %v2648_v34 }
 0x2d0   :  { %v7039_v36 = vadd.f32 %v2207_v15, %v2188_v61 }
 0x2d2   :  { %v2633_v24 = vmul.f32 %v2617_v52, %v7039_v36 }
 0x2d3   :  { %v2247_v11 = vpop.f32.mrf.mxu1 }
 0x2d4   :  { %v2650_v8 = vmul.f32 %v2633_v24, %v2633_v24  ;;  %v2640_v54 = vadd.f32 %v2639_v14, %v2633_v24 }
 0x2d6   :  { %v2657_v15 = vadd.f32 %v2656_v5, %v2650_v8 }
 0x2d7   :  { %v2227_v39 = vpop.f32.mrf.mxu3 }
 0x2d8   :  { %v2248_v51 = vadd.f32 %v2247_v11, %v2227_v39 }
 0x2da   :  { %v2268_v3 = vadd.f32 %v2267_v62, %v2248_v51 }
 0x2dc   :  { %v7042_v58 = vadd.f32 %v2287_v7, %v2268_v3 }
 0x2de   :  { %v2634_v49 = vmul.f32 %v2618_v35, %v7042_v58 }
 0x2e0   :  { %v2651_v21 = vmul.f32 %v2634_v49, %v2634_v49  ;;  %v2641_v7 = vadd.f32 %v2640_v54, %v2634_v49  ;;  %v3815_v49 = vmov 1  }
 0x2e1   :  { %3665 = vset.pattern.permute.xlu0 %v3815_v49 }
 0x2f0   :  { %v2367_v2 = vpop.f32.mrf.mxu2 }
 0x2f7   :  { %v2327_v18 = vpop.f32.mrf.mxu0 }
 0x2fc   :  { %v2347_v4 = vpop.f32.mrf.mxu1 }
 0x2fd   :  { %v2307_v0 = vpop.f32.mrf.mxu3 }
 0x2fe   :  { %v2328_v30 = vadd.f32 %v2327_v18, %v2307_v0  ;;  %v2658_v18 = vadd.f32 %v2657_v15, %v2651_v21 }
 0x2ff   :  { %v2427_v44 = vpop.f32.mrf.mxu0 }
 0x300   :  { %v2348_v53 = vadd.f32 %v2347_v4, %v2328_v30 }
 0x302   :  { %v7046_v13 = vadd.f32 %v2367_v2, %v2348_v53 }
 0x304   :  { %v2635_v41 = vmul.f32 %v2619_v27, %v7046_v13 }
 0x305   :  { %v2387_v29 = vpop.f32.mrf.mxu2 }
 0x306   :  { %v2652_v11 = vmul.f32 %v2635_v41, %v2635_v41  ;;  %v2642_v4 = vadd.f32 %v2641_v7, %v2635_v41 }
 0x308   :  { %v2659_v59 = vadd.f32 %v2658_v18, %v2652_v11 }
 0x31d   :  { %v2407_v20 = vpop.f32.mrf.mxu3 }
 0x31e   :  { %v2408_v57 = vadd.f32 %v2407_v20, %v2387_v29 }
 0x320   :  { %v2428_v22 = vadd.f32 %v2427_v44, %v2408_v57 }
 0x321   :  { %v2447_v56 = vpop.f32.mrf.mxu1 }
 0x322   :  { %v7049_v26 = vadd.f32 %v2447_v56, %v2428_v22 }
 0x323   :  { %v2527_v9 = vpop.f32.mrf.mxu0 }
 0x324   :  { %v2636_v50 = vmul.f32 %v2620_v40, %v7049_v26 }
 0x326   :  { %v2653_v2 = vmul.f32 %v2636_v50, %v2636_v50  ;;  %v2643_v44 = vadd.f32 %v2642_v4, %v2636_v50 }
 0x327   :  { %v2487_v12 = vpop.f32.mrf.mxu2 }
 0x328   :  { %v2660_v42 = vadd.f32 %v2659_v59, %v2653_v2 }
 0x329   :  { %v2467_v47 = vpop.f32.mrf.mxu1 }
 0x32a   :  { %v2488_v32 = vadd.f32 %v2487_v12, %v2467_v47 }
 0x32b   :  { %v2547_v60 = vpop.f32.mrf.mxu0 }
 0x336   :  { %v2587_v43 = vpop.f32.mrf.mxu2 }
 0x33e   :  { %v2507_v55 = vpop.f32.mrf.mxu3 }
 0x33f   :  { %v2508_v23 = vadd.f32 %v2507_v55, %v2488_v32 }
 0x341   :  { %v7052_v6 = vadd.f32 %v2527_v9, %v2508_v23 }
 0x343   :  { %v2567_v19 = vpop.f32.mrf.mxu1  ;;  %v2637_v62 = vmul.f32 %v2621_v1, %v7052_v6 }
 0x344   :  { %v2568_v39 = vadd.f32 %v2567_v19, %v2547_v60 }
 0x345   :  { %v2654_v48 = vmul.f32 %v2637_v62, %v2637_v62  ;;  %v2644_v56 = vadd.f32 %v2643_v44, %v2637_v62 }
 0x346   :  { %v2588_v0 = vadd.f32 %v2587_v43, %v2568_v39  ;;  %v2607_v25 = vpop.f32.mrf.mxu3 }
 0x347   :  { %v2661_v61 = vadd.f32 %v2660_v42, %v2654_v48 }
 0x348   :  { %v2608_v45 = vadd.f32 %v2607_v25, %v2588_v0 }
 0x34a   :  { %v2638_v51 = vmul.f32 %v2622_v46, %v2608_v45 }
 0x34c   :  { %v2655_v29 = vmul.f32 %v2638_v51, %v2638_v51  ;;  %v2645_v17 = vadd.f32 %v2644_v56, %v2638_v51 }
 0x34e   :  { %2646 = vadd.xlane.f32.xlu0 %v2645_v17  ;;  %v2662_v20 = vadd.f32 %v2661_v61, %v2655_v29 }
 0x350   :  { %2663 = vadd.xlane.f32.xlu1 %v2662_v20 }
 0x3c1   :  { %v2647_v30 = vpop.xlane.xlu0 %2646 }
 0x3c2   :  { %v2665_v3 = vmul.f32 0.001953125, %v2647_v30 }
 0x3c3   :  { %v2664_v57 = vpop.xlane.xlu1 %2663 }
 0x3c4   :  { %v2667_v38 = vmul.f32 %v2665_v3, %v2665_v3  ;;  %v2666_v16 = vmul.f32 0.001953125, %v2664_v57 }
 0x3c6   :  { %v2668_v52 = vsub.f32 %v2666_v16, %v2667_v38 }
 0x3c8   :  { %v2669_v9 = vadd.f32 1e-05, %v2668_v52 }
 0x3ca   :  { %3666 = vrsqrt.f32 %v2669_v9  ;;  %vm2676_vm3 = vweird.f32 %v2669_v9 }
 0x3d0   :  { %v3667_v53 = vpop.eup %3666 }
 0x3d1   :  { %v2671_v28 = vmul.f32 %v3667_v53, %v2669_v9  ;;  %vm2677_vm5 = vweird.f32 %v3667_v53 }
 0x3d2   :  { %vm2678_vm13 = vmor %vm2676_vm3, %vm2677_vm5 }
 0x3d3   :  { %v2672_v35 = vmul.f32 %v3667_v53, %v2671_v28 }
 0x3d5   :  { %v2673_v47 = vmul.f32 0.5, %v2672_v35 }
 0x3d7   :  { %v2674_v22 = vsub.f32 1.5, %v2673_v47 }
 0x3d9   :  { %v2675_v12 = vmul.f32 %v3667_v53, %v2674_v22 }
 0x3db   :  { %v2679_v24 = vsel %vm2678_vm13, %v3667_v53, %v2675_v12 }
 0x3dc   :  { %v2681_v27 = vmul.f32 %v2680_v37, %v2679_v24 }
 0x3de   :  { %v2682_v10 = vmul.f32 %v2681_v27, %v2665_v3 }
 0x3e0   :  { %2684 = vrot.lane.b32.xlu2 %v2682_v10, %s3814_s11 }
 0x3e8   :  { %2690 = vperm.xlu2 %3663, %v2681_v27  }
 0x3f0   :  { %3664 = vset.pattern.permute.xlu2 %v3815_v49 }
 0x43a   :  { %v2685_v32 = vpop.permute.xlu2 %2684 }
 0x43b   :  { %v2687_v40 = vsub.f32 %v2680_v37, %v2685_v32 }
 0x43d   :  { %2703 = vperm.xlu2 %3664, %v2687_v40  }
 0x442   :  { %v2691_v55 = vpop.permute.xlu2 %2690 }
 0x443   :  { %v2693_v34 = vmul.f32 %v2691_v55, %v7037_v63  ;;  %v2694_v8 = vmul.f32 %v2691_v55, %v7035_v33  ;;  %v2695_v23 = vmul.f32 %v2691_v55, %v7039_v36  ;;  %v2696_v14 = vmul.f32 %v2691_v55, %v7042_v58 }
 0x444   :  { %v2697_v41 = vmul.f32 %v2691_v55, %v7046_v13  ;;  %v2698_v1 = vmul.f32 %v2691_v55, %v7049_v26  ;;  %v2699_v5 = vmul.f32 %v2691_v55, %v7052_v6  ;;  %v2700_v21 = vmul.f32 %v2691_v55, %v2608_v45 }
 0x497   :  { %v2704_v60 = vpop.permute.xlu2 %2703 }
 0x498   :  { %v2706_v54 = vadd.f32 %v2704_v60, %v2693_v34  ;;  %v2707_v50 = vadd.f32 %v2704_v60, %v2694_v8  ;;  %v2708_v15 = vadd.f32 %v2704_v60, %v2695_v23  ;;  %v2709_v19 = vadd.f32 %v2704_v60, %v2696_v14 }
 0x499   :  { %v2710_v43 = vadd.f32 %v2704_v60, %v2697_v41  ;;  %v2711_v63 = vadd.f32 %v2704_v60, %v2698_v1  ;;  %v2712_v7 = vadd.f32 %v2704_v60, %v2699_v5  ;;  %v2713_v33 = vadd.f32 %v2704_v60, %v2700_v21 }
 0x49a   :  { %vm2714_vm4 = vcmp.ge.f32.partialorder %v2706_v54, 0.0  ;;  %vm2715_vm11 = vcmp.ge.f32.partialorder %v2707_v50, 0.0  ;;  %vm2716_vm9 = vcmp.ge.f32.partialorder %v2708_v15, 0.0  ;;  %vm2717_vm6 = vcmp.ge.f32.partialorder %v2709_v19, 0.0 }
 0x49b   :  { %vm2718_vm0 = vcmp.ge.f32.partialorder %v2710_v43, 0.0  ;;  %v2722_v36 = vmul.f32 0.01, %v2706_v54  ;;  %v2723_v58 = vmul.f32 0.01, %v2707_v50  ;;  %vm2719_vm1 = vcmp.ge.f32.partialorder %v2711_v63, 0.0 }
 0x49c   :  { %v2724_v13 = vmul.f32 0.01, %v2708_v15  ;;  %v2725_v26 = vmul.f32 0.01, %v2709_v19  ;;  %v2726_v6 = vmul.f32 0.01, %v2710_v43 }
 0x49d   :  { %v2727_v11 = vmul.f32 0.01, %v2711_v63  ;;  %v2728_v62 = vmul.f32 0.01, %v2712_v7  ;;  %v2730_v39 = vsel %vm2714_vm4, %v2706_v54, %v2722_v36  ;;  %v2731_v18 = vsel %vm2715_vm11, %v2707_v50, %v2723_v58 }
 0x49e   :  { %vm2720_vm15 = vcmp.ge.f32.partialorder %v2712_v7, 0.0  ;;  %v2729_v4 = vmul.f32 0.01, %v2713_v33  ;;  %v2732_v2 = vsel %vm2716_vm9, %v2708_v15, %v2724_v13  ;;  %v2733_v0 = vsel %vm2717_vm6, %v2709_v19, %v2725_v26  ;;  %2738 = vst [vmem:[#allocation8] sm:$0xff] %v2730_v39 }
 0x49f   :  { %vm2721_vm2 = vcmp.ge.f32.partialorder %v2713_v33, 0.0  ;;  %v2734_v25 = vsel %vm2718_vm0, %v2710_v43, %v2726_v6  ;;  %2739 = vst [vmem:[#allocation8 + $0x8] sm:$0xff] %v2731_v18  ;;  %v2735_v46 = vsel %vm2719_vm1, %v2711_v63, %v2727_v11  ;;  %v2736_v59 = vsel %vm2720_vm15, %v2712_v7, %v2728_v62 }
 0x4a0   :  { %2740 = vst [vmem:[#allocation8 + $0x10] sm:$0xff] %v2732_v2  ;;  %v2737_v44 = vsel %vm2721_vm2, %v2713_v33, %v2729_v4 }
 0x4a1   :  { %2741 = vst [vmem:[#allocation8 + $0x18] sm:$0xff] %v2733_v0 }
 0x4a2   :  { %2742 = vst [vmem:[#allocation8 + $0x20] sm:$0xff] %v2734_v25 }
 0x4a3   :  { %2743 = vst [vmem:[#allocation8 + $0x28] sm:$0xff] %v2735_v46 }
 0x4a4   :  { %2744 = vst [vmem:[#allocation8 + $0x30] sm:$0xff] %v2736_v59 }
 0x4a5   :  { %2745 = vst [vmem:[#allocation8 + $0x38] sm:$0xff] %v2737_v44 }
 0x4a6   :  { %2756 = dma.vmem_to_hbm [thread:$0]  %s2752_s12, 1024, %s2754_s15, [#allocation5]  }
 0x4a7   :  { %3764 = dma.done.wait [#allocation5], 1024  }
 0x4a8   :  { %3765 = vsyncadd [#allocation5], 4294966272 }
 0x4a9   :  { %2761 = vsyncpa [#allocation4], 1 }
 0x4aa   :  { %2762 = vsyncpa [#allocation7], 1 }
 0x4ab   :  { %2763 = vsyncpa [#allocation5], 1 }

</bundles_post_ra>
